<compile_context>
chip_gen: v7x
topology: tpu7x:2x2x1
jax: 0.10.0
libtpu: 0.0.40
codegen_flags: <defaults>
</compile_context>

<pallas_src>
import functools

import jax
import jax.numpy as jnp
from jax import lax
from jax.experimental import pallas as pl
from jax.experimental.pallas import tpu as pltpu

_BN_EPS = 1e-5
# MXU operand / activation-storage dtype.  Set to jnp.float32 for a strict-f32
# path (all epilogue math is f32 either way).
_MXU_DTYPE = jnp.bfloat16
_HPAD = 128           # left halo width (lane-aligned); must be >= W + 1


# ----------------------------------------------------------------------------
# Fused BottleNeck kernel:
#   BN1 -> Conv1x1 -> PReLU -> BN2 -> Conv3x3 (im2col GEMM) -> PReLU
# Output: only the k new channels (the dense concat is done once, outside).
# ----------------------------------------------------------------------------
def _bottleneck_kernel(*refs, n_prev, n_imgs, img_w, hw, hpad, t_width):
    # refs layout:
    #   prev[0..n_prev)      : (c_i, N*HW) bf16 activation slabs (base + layers)
    #   w1 (C1, Cprev) bf16  : 1x1 conv weights
    #   b1 (C1, 1)     f32   : 1x1 conv bias
    #   g1/be1 (Cprev,1) f32 : BN1 gamma / beta
    #   w2 (C2, 9*C1)  bf16  : 3x3 conv weights, tap-major
    #   b2 (C2, 1)     f32   : 3x3 conv bias
    #   g2/be2 (C1,1)  f32   : BN2 gamma / beta
    #   cm (2, N*HW)   bf16  : column validity masks (dj=0 / dj=2 taps)
    #   a  (2,) SMEM   f32   : PReLU slopes [a1, a2]
    #   y  (C2, N*HW)  bf16  : output (new channels only)
    #   t  (N, C1, T)  bf16  : VMEM scratch, halo-padded BN2(conv1x1) output
    prev = refs[:n_prev]
    (w1_ref, b1_ref, g1_ref, be1_ref,
     w2_ref, b2_ref, g2_ref, be2_ref,
     cm_ref, a_ref, y_ref, t_ref) = refs[n_prev:]

    c1 = w1_ref.shape[0]
    nhw = n_imgs * hw
    inv_cnt = 1.0 / float(nhw)

    # -------- Composite 1: BatchNorm (batch stats) -> 1x1 conv -> PReLU -----
    xs = [r[...].astype(jnp.float32) for r in prev]
    x = xs[0] if len(xs) == 1 else jnp.concatenate(xs, axis=0)   # (Cprev, NHW)
    mean1 = jnp.sum(x, axis=1, keepdims=True) * inv_cnt
    var1 = jnp.maximum(
        jnp.sum(x * x, axis=1, keepdims=True) * inv_cnt - mean1 * mean1, 0.0)
    scale1 = g1_ref[...] * lax.rsqrt(var1 + _BN_EPS)
    shift1 = be1_ref[...] - mean1 * scale1
    xbn = (x * scale1 + shift1).astype(w1_ref.dtype)             # (Cprev, NHW)
    acc1 = jnp.dot(w1_ref[...], xbn,
                   preferred_element_type=jnp.float32) + b1_ref[...]
    a1 = a_ref[0]
    y1 = jnp.where(acc1 > 0, acc1, a1 * acc1)                    # (C1, NHW) f32

    # -------- Composite 2: BatchNorm (batch stats of y1) -> 3x3 conv --------
    mean2 = jnp.sum(y1, axis=1, keepdims=True) * inv_cnt
    var2 = jnp.maximum(
        jnp.sum(y1 * y1, axis=1, keepdims=True) * inv_cnt - mean2 * mean2, 0.0)
    scale2 = g2_ref[...] * lax.rsqrt(var2 + _BN_EPS)
    shift2 = be2_ref[...] - mean2 * scale2
    t_bn = (y1 * scale2 + shift2).astype(t_ref.dtype)            # (C1, NHW) bf16

    # Scatter each image into its lane-aligned halo-padded slab (zero halos
    # reproduce PyTorch's zero padding applied AFTER BatchNorm).
    zl = jnp.zeros((c1, hpad), t_ref.dtype)
    zr = jnp.zeros((c1, t_width - hpad - hw), t_ref.dtype)
    for n in range(n_imgs):
        t_ref[n, :, 0:hpad] = zl
        t_ref[n, :, hpad:hpad + hw] = t_bn[:, n * hw:(n + 1) * hw]
        t_ref[n, :, hpad + hw:] = zr

    # im2col: 9 shifted taps = static lane slices of the halo-padded slab,
    # stacked along sublanes -> one (C2, 9*C1) x (9*C1, NHW) MXU GEMM.
    mask_l = cm_ref[0:1, :]                                      # column w-1 exists
    mask_r = cm_ref[1:2, :]                                      # column w+1 exists
    taps = []
    for di in range(3):
        for dj in range(3):
            off = (di - 1) * img_w + (dj - 1)
            parts = [t_ref[n, :, hpad + off:hpad + off + hw]
                     for n in range(n_imgs)]
            s = parts[0] if n_imgs == 1 else jnp.concatenate(parts, axis=1)
            if dj == 0:
                s = s * mask_l
            elif dj == 2:
                s = s * mask_r
            taps.append(s)
    patches = jnp.concatenate(taps, axis=0)                      # (9*C1, NHW)
    acc2 = jnp.dot(w2_ref[...], patches,
                   preferred_element_type=jnp.float32) + b2_ref[...]
    a2 = a_ref[1]
    y2 = jnp.where(acc2 > 0, acc2, a2 * acc2)                    # (C2, NHW) f32
    y_ref[...] = y2.astype(y_ref.dtype)


def _bottleneck_pallas(pieces, p1, p2, alphas, colmask, n_imgs, img_h, img_w):
    hw = img_h * img_w
    nhw = n_imgs * hw
    c_prev = sum(int(p.shape[0]) for p in pieces)
    c1 = p1["w"].shape[0]
    c2 = p2["w"].shape[0]
    assert img_w + 1 <= _HPAD, "halo too small for this image width"
    t_width = _HPAD + ((hw + img_w + 1 + 127) // 128) * 128

    kernel = functools.partial(
        _bottleneck_kernel, n_prev=len(pieces), n_imgs=n_imgs,
        img_w=img_w, hw=hw, hpad=_HPAD, t_width=t_width)

    small = (p1["w"], p1["b"], p1["gamma"], p1["beta"],
             p2["w"], p2["b"], p2["gamma"], p2["beta"], colmask)
    flops = 2 * nhw * (c1 * c_prev + 9 * c1 * c2) + 12 * nhw * (c_prev + c1)
    bytes_accessed = (sum(p.size * p.dtype.itemsize for p in pieces)
                      + sum(a.size * a.dtype.itemsize for a in small)
                      + c2 * nhw * jnp.dtype(_MXU_DTYPE).itemsize)

    in_specs = ([pl.BlockSpec(tuple(p.shape), lambda i: (0, 0)) for p in pieces]
                + [pl.BlockSpec(tuple(a.shape), lambda i: (0, 0)) for a in small]
                + [pl.BlockSpec(memory_space=pltpu.MemorySpace.SMEM)])

    return pl.pallas_call(
        kernel,
        out_shape=jax.ShapeDtypeStruct((c2, nhw), _MXU_DTYPE),
        grid=(1,),
        in_specs=in_specs,
        out_specs=pl.BlockSpec((c2, nhw), lambda i: (0, 0)),
        scratch_shapes=[pltpu.VMEM((n_imgs, c1, t_width), _MXU_DTYPE)],
        compiler_params=pltpu.CompilerParams(
            dimension_semantics=("arbitrary",)),
        cost_estimate=pl.CostEstimate(
            flops=int(flops), transcendentals=int(c_prev + c1),
            bytes_accessed=int(bytes_accessed)),
    )(*pieces, *small, alphas)


# ----------------------------------------------------------------------------
# DenseBlock forward (NCHW in / NCHW out, like the PyTorch module).
# ----------------------------------------------------------------------------
def dense_block_forward(x_nchw, params):
    n, c_in, img_h, img_w = x_nchw.shape
    hw = img_h * img_w
    nhw = n * hw
    # (N,C,H,W) -> (C, N*H*W) slab: channels on sublanes, lane axis N*HW.
    base = (x_nchw.astype(_MXU_DTYPE)
            .transpose(1, 0, 2, 3).reshape(c_in, nhw))
    # Column-validity masks for the 3x3 taps reading column w-1 / w+1
    # (layer-invariant -> built once per forward).
    col = jnp.arange(nhw, dtype=jnp.int32) % img_w
    colmask = jnp.stack([(col >= 1), (col <= img_w - 2)]).astype(_MXU_DTYPE)

    pieces = [base]
    for p1, p2 in params:
        alphas = jnp.stack([p1["a"], p2["a"]])           # (2,) PReLU slopes
        y = _bottleneck_pallas(pieces, p1, p2, alphas, colmask,
                               n, img_h, img_w)
        pieces.append(y)                                  # only k new channels

    full = jnp.concatenate(pieces, axis=0)                # one concat per block
    c_total = full.shape[0]
    out = (full.reshape(c_total, n, hw).transpose(1, 0, 2)
           .reshape(n, c_total, img_h, img_w))
    return out.astype(jnp.float32)                        # module interface: f32


# ----------------------------------------------------------------------------
# Deterministic parameter init (shapes mirror the PyTorch module __init__);
# conv weights are pre-flattened (tap-major) and pre-cast at init so there is
# no per-forward host-side folding work.
# ----------------------------------------------------------------------------
def init_composite_params(key, cin, cout, ksize):
    kw_key, kb_key = jax.random.split(key)
    fan_in = cin * ksize * ksize
    bound = 1.0 / (fan_in ** 0.5)
    if ksize == 1:
        w = jax.random.uniform(kw_key, (cout, cin), jnp.float32, -bound, bound)
        w_flat = w.astype(_MXU_DTYPE)                               # (Cout, Cin)
    else:
        w = jax.random.uniform(kw_key, (cout, cin, ksize, ksize),
                               jnp.float32, -bound, bound)
        # tap-major rows of the im2col GEMM: [cout, (kh*3+kw)*cin + ci]
        w_flat = (w.transpose(0, 2, 3, 1)
                  .reshape(cout, ksize * ksize * cin).astype(_MXU_DTYPE))
    b = jax.random.uniform(kb_key, (cout, 1), jnp.float32, -bound, bound)
    return dict(w=w_flat, b=b,
                gamma=jnp.ones((cin, 1), jnp.float32),     # BatchNorm2d defaults
                beta=jnp.zeros((cin, 1), jnp.float32),
                a=jnp.array(0.25, jnp.float32))            # PReLU default slope


def init_dense_block(key, layer_num, in_channels, k):
    params = []
    for i in range(layer_num):
        cin = in_channels + k * i
        key, k1, k2 = jax.random.split(key, 3)
        p1 = init_composite_params(k1, cin, 4 * k, ksize=1)   # 1x1, pad 0
        p2 = init_composite_params(k2, 4 * k, k, ksize=3)     # 3x3, pad 1
        params.append((p1, p2))
    return params


# ----------------------------------------------------------------------------
if __name__ == "__main__":
    key = jax.random.PRNGKey(0)
    kx, kp = jax.random.split(key)

    N, C_in, H, W = 2, 4, 16, 16
    layer_num, growth_k = 2, 8

    x = jax.random.normal(kx, (N, C_in, H, W), jnp.float32)   # NCHW like torch
    params = init_dense_block(kp, layer_num, C_in, growth_k)

    fwd = jax.jit(dense_block_forward)
    y = jax.block_until_ready(fwd(x, params))

    expected_c = C_in + layer_num * growth_k
    assert y.shape == (N, expected_c, H, W), y.shape
    assert y.dtype == jnp.float32
    assert bool(jnp.all(jnp.isfinite(y)))
    print("KERNEL_OK")
</pallas_src>

<mosaic_0001>
module attributes {stable_mosaic.version = 11 : i64} {
  func.func @_bottleneck_kernel(%arg0: i32, %arg1: memref<4x512xbf16, #tpu.memory_space<vmem>>, %arg2: memref<32x4xbf16, #tpu.memory_space<vmem>>, %arg3: memref<32x1xf32, #tpu.memory_space<vmem>>, %arg4: memref<4x1xf32, #tpu.memory_space<vmem>>, %arg5: memref<4x1xf32, #tpu.memory_space<vmem>>, %arg6: memref<8x288xbf16, #tpu.memory_space<vmem>>, %arg7: memref<8x1xf32, #tpu.memory_space<vmem>>, %arg8: memref<32x1xf32, #tpu.memory_space<vmem>>, %arg9: memref<32x1xf32, #tpu.memory_space<vmem>>, %arg10: memref<2x512xbf16, #tpu.memory_space<vmem>>, %arg11: memref<2xf32, #tpu.memory_space<smem>>, %arg12: memref<8x512xbf16, #tpu.memory_space<vmem>>, %arg13: memref<2x32x512xbf16, #tpu.memory_space<vmem>>) attributes {dimension_semantics = [#tpu.dimension_semantics<arbitrary>], iteration_bounds = array<i64: 1>, scalar_prefetch = 0 : i64, scratch_operands = 1 : i64, tpu.core_type = #tpu.core_type<tc>, window_params = [{pipeline_mode = #tpu.pipeline_mode<synchronous>, transform_indices = @transform_0, window_bounds = array<i64: 4, 512>}, {pipeline_mode = #tpu.pipeline_mode<synchronous>, transform_indices = @transform_1, window_bounds = array<i64: 32, 4>}, {pipeline_mode = #tpu.pipeline_mode<synchronous>, transform_indices = @transform_2, window_bounds = array<i64: 32, 1>}, {pipeline_mode = #tpu.pipeline_mode<synchronous>, transform_indices = @transform_3, window_bounds = array<i64: 4, 1>}, {pipeline_mode = #tpu.pipeline_mode<synchronous>, transform_indices = @transform_4, window_bounds = array<i64: 4, 1>}, {pipeline_mode = #tpu.pipeline_mode<synchronous>, transform_indices = @transform_5, window_bounds = array<i64: 8, 288>}, {pipeline_mode = #tpu.pipeline_mode<synchronous>, transform_indices = @transform_6, window_bounds = array<i64: 8, 1>}, {pipeline_mode = #tpu.pipeline_mode<synchronous>, transform_indices = @transform_7, window_bounds = array<i64: 32, 1>}, {pipeline_mode = #tpu.pipeline_mode<synchronous>, transform_indices = @transform_8, window_bounds = array<i64: 32, 1>}, {pipeline_mode = #tpu.pipeline_mode<synchronous>, transform_indices = @transform_9, window_bounds = array<i64: 2, 512>}, {transform_indices = @transform_10, window_bounds = array<i64: 2>}, {pipeline_mode = #tpu.pipeline_mode<synchronous>, transform_indices = @transform_11, window_bounds = array<i64: 8, 512>}]} {
    %c0 = arith.constant 0 : index
    %c0_0 = arith.constant 0 : index
    %0 = vector.load %arg1[%c0, %c0_0] : memref<4x512xbf16, #tpu.memory_space<vmem>>, vector<4x512xbf16>
    %1 = arith.extf %0 : vector<4x512xbf16> to vector<4x512xf32>
    %cst = arith.constant dense<0.000000e+00> : vector<4xf32>
    %2 = vector.multi_reduction <add>, %1, %cst [1] : vector<4x512xf32> to vector<4xf32>
    %3 = vector.shape_cast %2 : vector<4xf32> to vector<4x1xf32>
    %cst_1 = arith.constant 0.001953125 : f32
    %4 = vector.broadcast %cst_1 : f32 to vector<4x1xf32>
    %5 = arith.mulf %3, %4 : vector<4x1xf32>
    %6 = arith.mulf %1, %1 : vector<4x512xf32>
    %cst_2 = arith.constant dense<0.000000e+00> : vector<4xf32>
    %7 = vector.multi_reduction <add>, %6, %cst_2 [1] : vector<4x512xf32> to vector<4xf32>
    %8 = vector.shape_cast %7 : vector<4xf32> to vector<4x1xf32>
    %cst_3 = arith.constant 0.001953125 : f32
    %9 = vector.broadcast %cst_3 : f32 to vector<4x1xf32>
    %10 = arith.mulf %8, %9 : vector<4x1xf32>
    %11 = arith.mulf %5, %5 : vector<4x1xf32>
    %12 = arith.subf %10, %11 : vector<4x1xf32>
    %cst_4 = arith.constant 0.000000e+00 : f32
    %13 = vector.broadcast %cst_4 : f32 to vector<4x1xf32>
    %14 = arith.maximumf %12, %13 : vector<4x1xf32>
    %c0_5 = arith.constant 0 : index
    %c0_6 = arith.constant 0 : index
    %15 = vector.load %arg4[%c0_5, %c0_6] : memref<4x1xf32, #tpu.memory_space<vmem>>, vector<4x1xf32>
    %cst_7 = arith.constant 9.99999974E-6 : f32
    %16 = vector.broadcast %cst_7 : f32 to vector<4x1xf32>
    %17 = arith.addf %14, %16 : vector<4x1xf32>
    %18 = math.rsqrt %17 : vector<4x1xf32>
    %19 = arith.mulf %15, %18 : vector<4x1xf32>
    %c0_8 = arith.constant 0 : index
    %c0_9 = arith.constant 0 : index
    %20 = vector.load %arg5[%c0_8, %c0_9] : memref<4x1xf32, #tpu.memory_space<vmem>>, vector<4x1xf32>
    %21 = arith.mulf %5, %19 : vector<4x1xf32>
    %22 = arith.subf %20, %21 : vector<4x1xf32>
    %23 = vector.broadcast %19 : vector<4x1xf32> to vector<4x512xf32>
    %24 = arith.mulf %1, %23 : vector<4x512xf32>
    %25 = vector.broadcast %22 : vector<4x1xf32> to vector<4x512xf32>
    %26 = arith.addf %24, %25 : vector<4x512xf32>
    %27 = arith.truncf %26 : vector<4x512xf32> to vector<4x512xbf16>
    %c0_10 = arith.constant 0 : index
    %c0_11 = arith.constant 0 : index
    %28 = vector.load %arg2[%c0_10, %c0_11] : memref<32x4xbf16, #tpu.memory_space<vmem>>, vector<32x4xbf16>
    %cst_12 = arith.constant dense<0.000000e+00> : vector<32x512xf32>
    %29 = tpu.matmul %28, %27, %cst_12 {dimension_numbers = #tpu.dot_dimension_numbers<[1], [0], [0], [1], [0, 0, 1, 1], [], []>} : vector<32x4xbf16>, vector<4x512xbf16>, vector<32x512xf32> -> vector<32x512xf32>
    %c0_13 = arith.constant 0 : index
    %c0_14 = arith.constant 0 : index
    %30 = vector.load %arg3[%c0_13, %c0_14] : memref<32x1xf32, #tpu.memory_space<vmem>>, vector<32x1xf32>
    %31 = vector.broadcast %30 : vector<32x1xf32> to vector<32x512xf32>
    %32 = arith.addf %29, %31 : vector<32x512xf32>
    %c0_15 = arith.constant 0 : index
    %33 = memref.load %arg11[%c0_15] : memref<2xf32, #tpu.memory_space<smem>>
    %cst_16 = arith.constant 0.000000e+00 : f32
    %34 = vector.broadcast %cst_16 : f32 to vector<32x512xf32>
    %35 = arith.cmpf ogt, %32, %34 : vector<32x512xf32>
    %36 = vector.broadcast %33 : f32 to vector<32x512xf32>
    %37 = arith.mulf %36, %32 : vector<32x512xf32>
    %38 = arith.select %35, %32, %37 : vector<32x512xi1>, vector<32x512xf32>
    %cst_17 = arith.constant dense<0.000000e+00> : vector<32xf32>
    %39 = vector.multi_reduction <add>, %38, %cst_17 [1] : vector<32x512xf32> to vector<32xf32>
    %40 = vector.shape_cast %39 : vector<32xf32> to vector<32x1xf32>
    %cst_18 = arith.constant 0.001953125 : f32
    %41 = vector.broadcast %cst_18 : f32 to vector<32x1xf32>
    %42 = arith.mulf %40, %41 : vector<32x1xf32>
    %43 = arith.mulf %38, %38 : vector<32x512xf32>
    %cst_19 = arith.constant dense<0.000000e+00> : vector<32xf32>
    %44 = vector.multi_reduction <add>, %43, %cst_19 [1] : vector<32x512xf32> to vector<32xf32>
    %45 = vector.shape_cast %44 : vector<32xf32> to vector<32x1xf32>
    %cst_20 = arith.constant 0.001953125 : f32
    %46 = vector.broadcast %cst_20 : f32 to vector<32x1xf32>
    %47 = arith.mulf %45, %46 : vector<32x1xf32>
    %48 = arith.mulf %42, %42 : vector<32x1xf32>
    %49 = arith.subf %47, %48 : vector<32x1xf32>
    %cst_21 = arith.constant 0.000000e+00 : f32
    %50 = vector.broadcast %cst_21 : f32 to vector<32x1xf32>
    %51 = arith.maximumf %49, %50 : vector<32x1xf32>
    %c0_22 = arith.constant 0 : index
    %c0_23 = arith.constant 0 : index
    %52 = vector.load %arg8[%c0_22, %c0_23] : memref<32x1xf32, #tpu.memory_space<vmem>>, vector<32x1xf32>
    %cst_24 = arith.constant 9.99999974E-6 : f32
    %53 = vector.broadcast %cst_24 : f32 to vector<32x1xf32>
    %54 = arith.addf %51, %53 : vector<32x1xf32>
    %55 = math.rsqrt %54 : vector<32x1xf32>
    %56 = arith.mulf %52, %55 : vector<32x1xf32>
    %c0_25 = arith.constant 0 : index
    %c0_26 = arith.constant 0 : index
    %57 = vector.load %arg9[%c0_25, %c0_26] : memref<32x1xf32, #tpu.memory_space<vmem>>, vector<32x1xf32>
    %58 = arith.mulf %42, %56 : vector<32x1xf32>
    %59 = arith.subf %57, %58 : vector<32x1xf32>
    %60 = vector.broadcast %56 : vector<32x1xf32> to vector<32x512xf32>
    %61 = arith.mulf %38, %60 : vector<32x512xf32>
    %62 = vector.broadcast %59 : vector<32x1xf32> to vector<32x512xf32>
    %63 = arith.addf %61, %62 : vector<32x512xf32>
    %64 = arith.truncf %63 : vector<32x512xf32> to vector<32x512xbf16>
    %cst_27 = arith.constant 0.000000e+00 : bf16
    %65 = vector.broadcast %cst_27 : bf16 to vector<32x128xbf16>
    %cst_28 = arith.constant 0.000000e+00 : bf16
    %66 = vector.broadcast %cst_28 : bf16 to vector<32x128xbf16>
    %c0_29 = arith.constant 0 : index
    %c0_30 = arith.constant 0 : index
    %c0_31 = arith.constant 0 : index
    %67 = vector.load %arg13[%c0_29, %c0_30, %c0_31] : memref<2x32x512xbf16, #tpu.memory_space<vmem>>, vector<1x32x128xbf16>
    %68 = vector.shape_cast %67 : vector<1x32x128xbf16> to vector<32x128xbf16>
    %69 = vector.shape_cast %65 : vector<32x128xbf16> to vector<1x32x128xbf16>
    tpu.vector_store %arg13[%c0_29, %c0_30, %c0_31], %69 {strides = array<i32>} : memref<2x32x512xbf16, #tpu.memory_space<vmem>>, vector<1x32x128xbf16>,
    %70 = vector.extract_strided_slice %64 {offsets = [0, 0], sizes = [32, 256], strides = [1, 1]} : vector<32x512xbf16> to vector<32x256xbf16>
    %c0_32 = arith.constant 0 : index
    %c0_33 = arith.constant 0 : index
    %c128 = arith.constant 128 : index
    %71 = vector.load %arg13[%c0_32, %c0_33, %c128] : memref<2x32x512xbf16, #tpu.memory_space<vmem>>, vector<1x32x256xbf16>
    %72 = vector.shape_cast %71 : vector<1x32x256xbf16> to vector<32x256xbf16>
    %73 = vector.shape_cast %70 : vector<32x256xbf16> to vector<1x32x256xbf16>
    tpu.vector_store %arg13[%c0_32, %c0_33, %c128], %73 {strides = array<i32>} : memref<2x32x512xbf16, #tpu.memory_space<vmem>>, vector<1x32x256xbf16>,
    %c0_34 = arith.constant 0 : index
    %c0_35 = arith.constant 0 : index
    %c384 = arith.constant 384 : index
    %74 = vector.load %arg13[%c0_34, %c0_35, %c384] : memref<2x32x512xbf16, #tpu.memory_space<vmem>>, vector<1x32x128xbf16>
    %75 = vector.shape_cast %74 : vector<1x32x128xbf16> to vector<32x128xbf16>
    %76 = vector.shape_cast %66 : vector<32x128xbf16> to vector<1x32x128xbf16>
    tpu.vector_store %arg13[%c0_34, %c0_35, %c384], %76 {strides = array<i32>} : memref<2x32x512xbf16, #tpu.memory_space<vmem>>, vector<1x32x128xbf16>,
    %c1 = arith.constant 1 : index
    %c0_36 = arith.constant 0 : index
    %c0_37 = arith.constant 0 : index
    %77 = vector.load %arg13[%c1, %c0_36, %c0_37] : memref<2x32x512xbf16, #tpu.memory_space<vmem>>, vector<1x32x128xbf16>
    %78 = vector.shape_cast %77 : vector<1x32x128xbf16> to vector<32x128xbf16>
    %79 = vector.shape_cast %65 : vector<32x128xbf16> to vector<1x32x128xbf16>
    tpu.vector_store %arg13[%c1, %c0_36, %c0_37], %79 {strides = array<i32>} : memref<2x32x512xbf16, #tpu.memory_space<vmem>>, vector<1x32x128xbf16>,
    %80 = vector.extract_strided_slice %64 {offsets = [0, 256], sizes = [32, 256], strides = [1, 1]} : vector<32x512xbf16> to vector<32x256xbf16>
    %c1_38 = arith.constant 1 : index
    %c0_39 = arith.constant 0 : index
    %c128_40 = arith.constant 128 : index
    %81 = vector.load %arg13[%c1_38, %c0_39, %c128_40] : memref<2x32x512xbf16, #tpu.memory_space<vmem>>, vector<1x32x256xbf16>
    %82 = vector.shape_cast %81 : vector<1x32x256xbf16> to vector<32x256xbf16>
    %83 = vector.shape_cast %80 : vector<32x256xbf16> to vector<1x32x256xbf16>
    tpu.vector_store %arg13[%c1_38, %c0_39, %c128_40], %83 {strides = array<i32>} : memref<2x32x512xbf16, #tpu.memory_space<vmem>>, vector<1x32x256xbf16>,
    %c1_41 = arith.constant 1 : index
    %c0_42 = arith.constant 0 : index
    %c384_43 = arith.constant 384 : index
    %84 = vector.load %arg13[%c1_41, %c0_42, %c384_43] : memref<2x32x512xbf16, #tpu.memory_space<vmem>>, vector<1x32x128xbf16>
    %85 = vector.shape_cast %84 : vector<1x32x128xbf16> to vector<32x128xbf16>
    %86 = vector.shape_cast %66 : vector<32x128xbf16> to vector<1x32x128xbf16>
    tpu.vector_store %arg13[%c1_41, %c0_42, %c384_43], %86 {strides = array<i32>} : memref<2x32x512xbf16, #tpu.memory_space<vmem>>, vector<1x32x128xbf16>,
    %c0_44 = arith.constant 0 : index
    %c0_45 = arith.constant 0 : index
    %87 = vector.load %arg10[%c0_44, %c0_45] : memref<2x512xbf16, #tpu.memory_space<vmem>>, vector<1x512xbf16>
    %c1_46 = arith.constant 1 : index
    %c0_47 = arith.constant 0 : index
    %88 = vector.load %arg10[%c1_46, %c0_47] : memref<2x512xbf16, #tpu.memory_space<vmem>>, vector<1x512xbf16>
    %c0_48 = arith.constant 0 : index
    %c0_49 = arith.constant 0 : index
    %c111 = arith.constant 111 : index
    %89 = vector.load %arg13[%c0_48, %c0_49, %c111] : memref<2x32x512xbf16, #tpu.memory_space<vmem>>, vector<1x32x256xbf16>
    %90 = vector.shape_cast %89 : vector<1x32x256xbf16> to vector<32x256xbf16>
    %c1_50 = arith.constant 1 : index
    %c0_51 = arith.constant 0 : index
    %c111_52 = arith.constant 111 : index
    %91 = vector.load %arg13[%c1_50, %c0_51, %c111_52] : memref<2x32x512xbf16, #tpu.memory_space<vmem>>, vector<1x32x256xbf16>
    %92 = vector.shape_cast %91 : vector<1x32x256xbf16> to vector<32x256xbf16>
    %93 = tpu.concatenate %90, %92 in 1 : vector<32x256xbf16>, vector<32x256xbf16> -> vector<32x512xbf16>
    %94 = vector.broadcast %87 : vector<1x512xbf16> to vector<32x512xbf16>
    %95 = arith.mulf %93, %94 : vector<32x512xbf16>
    %c0_53 = arith.constant 0 : index
    %c0_54 = arith.constant 0 : index
    %c112 = arith.constant 112 : index
    %96 = vector.load %arg13[%c0_53, %c0_54, %c112] : memref<2x32x512xbf16, #tpu.memory_space<vmem>>, vector<1x32x256xbf16>
    %97 = vector.shape_cast %96 : vector<1x32x256xbf16> to vector<32x256xbf16>
    %c1_55 = arith.constant 1 : index
    %c0_56 = arith.constant 0 : index
    %c112_57 = arith.constant 112 : index
    %98 = vector.load %arg13[%c1_55, %c0_56, %c112_57] : memref<2x32x512xbf16, #tpu.memory_space<vmem>>, vector<1x32x256xbf16>
    %99 = vector.shape_cast %98 : vector<1x32x256xbf16> to vector<32x256xbf16>
    %100 = tpu.concatenate %97, %99 in 1 : vector<32x256xbf16>, vector<32x256xbf16> -> vector<32x512xbf16>
    %c0_58 = arith.constant 0 : index
    %c0_59 = arith.constant 0 : index
    %c113 = arith.constant 113 : index
    %101 = vector.load %arg13[%c0_58, %c0_59, %c113] : memref<2x32x512xbf16, #tpu.memory_space<vmem>>, vector<1x32x256xbf16>
    %102 = vector.shape_cast %101 : vector<1x32x256xbf16> to vector<32x256xbf16>
    %c1_60 = arith.constant 1 : index
    %c0_61 = arith.constant 0 : index
    %c113_62 = arith.constant 113 : index
    %103 = vector.load %arg13[%c1_60, %c0_61, %c113_62] : memref<2x32x512xbf16, #tpu.memory_space<vmem>>, vector<1x32x256xbf16>
    %104 = vector.shape_cast %103 : vector<1x32x256xbf16> to vector<32x256xbf16>
    %105 = tpu.concatenate %102, %104 in 1 : vector<32x256xbf16>, vector<32x256xbf16> -> vector<32x512xbf16>
    %106 = vector.broadcast %88 : vector<1x512xbf16> to vector<32x512xbf16>
    %107 = arith.mulf %105, %106 : vector<32x512xbf16>
    %c0_63 = arith.constant 0 : index
    %c0_64 = arith.constant 0 : index
    %c127 = arith.constant 127 : index
    %108 = vector.load %arg13[%c0_63, %c0_64, %c127] : memref<2x32x512xbf16, #tpu.memory_space<vmem>>, vector<1x32x256xbf16>
    %109 = vector.shape_cast %108 : vector<1x32x256xbf16> to vector<32x256xbf16>
    %c1_65 = arith.constant 1 : index
    %c0_66 = arith.constant 0 : index
    %c127_67 = arith.constant 127 : index
    %110 = vector.load %arg13[%c1_65, %c0_66, %c127_67] : memref<2x32x512xbf16, #tpu.memory_space<vmem>>, vector<1x32x256xbf16>
    %111 = vector.shape_cast %110 : vector<1x32x256xbf16> to vector<32x256xbf16>
    %112 = tpu.concatenate %109, %111 in 1 : vector<32x256xbf16>, vector<32x256xbf16> -> vector<32x512xbf16>
    %113 = vector.broadcast %87 : vector<1x512xbf16> to vector<32x512xbf16>
    %114 = arith.mulf %112, %113 : vector<32x512xbf16>
    %c0_68 = arith.constant 0 : index
    %c0_69 = arith.constant 0 : index
    %c128_70 = arith.constant 128 : index
    %115 = vector.load %arg13[%c0_68, %c0_69, %c128_70] : memref<2x32x512xbf16, #tpu.memory_space<vmem>>, vector<1x32x256xbf16>
    %116 = vector.shape_cast %115 : vector<1x32x256xbf16> to vector<32x256xbf16>
    %c1_71 = arith.constant 1 : index
    %c0_72 = arith.constant 0 : index
    %c128_73 = arith.constant 128 : index
    %117 = vector.load %arg13[%c1_71, %c0_72, %c128_73] : memref<2x32x512xbf16, #tpu.memory_space<vmem>>, vector<1x32x256xbf16>
    %118 = vector.shape_cast %117 : vector<1x32x256xbf16> to vector<32x256xbf16>
    %119 = tpu.concatenate %116, %118 in 1 : vector<32x256xbf16>, vector<32x256xbf16> -> vector<32x512xbf16>
    %c0_74 = arith.constant 0 : index
    %c0_75 = arith.constant 0 : index
    %c129 = arith.constant 129 : index
    %120 = vector.load %arg13[%c0_74, %c0_75, %c129] : memref<2x32x512xbf16, #tpu.memory_space<vmem>>, vector<1x32x256xbf16>
    %121 = vector.shape_cast %120 : vector<1x32x256xbf16> to vector<32x256xbf16>
    %c1_76 = arith.constant 1 : index
    %c0_77 = arith.constant 0 : index
    %c129_78 = arith.constant 129 : index
    %122 = vector.load %arg13[%c1_76, %c0_77, %c129_78] : memref<2x32x512xbf16, #tpu.memory_space<vmem>>, vector<1x32x256xbf16>
    %123 = vector.shape_cast %122 : vector<1x32x256xbf16> to vector<32x256xbf16>
    %124 = tpu.concatenate %121, %123 in 1 : vector<32x256xbf16>, vector<32x256xbf16> -> vector<32x512xbf16>
    %125 = vector.broadcast %88 : vector<1x512xbf16> to vector<32x512xbf16>
    %126 = arith.mulf %124, %125 : vector<32x512xbf16>
    %c0_79 = arith.constant 0 : index
    %c0_80 = arith.constant 0 : index
    %c143 = arith.constant 143 : index
    %127 = vector.load %arg13[%c0_79, %c0_80, %c143] : memref<2x32x512xbf16, #tpu.memory_space<vmem>>, vector<1x32x256xbf16>
    %128 = vector.shape_cast %127 : vector<1x32x256xbf16> to vector<32x256xbf16>
    %c1_81 = arith.constant 1 : index
    %c0_82 = arith.constant 0 : index
    %c143_83 = arith.constant 143 : index
    %129 = vector.load %arg13[%c1_81, %c0_82, %c143_83] : memref<2x32x512xbf16, #tpu.memory_space<vmem>>, vector<1x32x256xbf16>
    %130 = vector.shape_cast %129 : vector<1x32x256xbf16> to vector<32x256xbf16>
    %131 = tpu.concatenate %128, %130 in 1 : vector<32x256xbf16>, vector<32x256xbf16> -> vector<32x512xbf16>
    %132 = vector.broadcast %87 : vector<1x512xbf16> to vector<32x512xbf16>
    %133 = arith.mulf %131, %132 : vector<32x512xbf16>
    %c0_84 = arith.constant 0 : index
    %c0_85 = arith.constant 0 : index
    %c144 = arith.constant 144 : index
    %134 = vector.load %arg13[%c0_84, %c0_85, %c144] : memref<2x32x512xbf16, #tpu.memory_space<vmem>>, vector<1x32x256xbf16>
    %135 = vector.shape_cast %134 : vector<1x32x256xbf16> to vector<32x256xbf16>
    %c1_86 = arith.constant 1 : index
    %c0_87 = arith.constant 0 : index
    %c144_88 = arith.constant 144 : index
    %136 = vector.load %arg13[%c1_86, %c0_87, %c144_88] : memref<2x32x512xbf16, #tpu.memory_space<vmem>>, vector<1x32x256xbf16>
    %137 = vector.shape_cast %136 : vector<1x32x256xbf16> to vector<32x256xbf16>
    %138 = tpu.concatenate %135, %137 in 1 : vector<32x256xbf16>, vector<32x256xbf16> -> vector<32x512xbf16>
    %c0_89 = arith.constant 0 : index
    %c0_90 = arith.constant 0 : index
    %c145 = arith.constant 145 : index
    %139 = vector.load %arg13[%c0_89, %c0_90, %c145] : memref<2x32x512xbf16, #tpu.memory_space<vmem>>, vector<1x32x256xbf16>
    %140 = vector.shape_cast %139 : vector<1x32x256xbf16> to vector<32x256xbf16>
    %c1_91 = arith.constant 1 : index
    %c0_92 = arith.constant 0 : index
    %c145_93 = arith.constant 145 : index
    %141 = vector.load %arg13[%c1_91, %c0_92, %c145_93] : memref<2x32x512xbf16, #tpu.memory_space<vmem>>, vector<1x32x256xbf16>
    %142 = vector.shape_cast %141 : vector<1x32x256xbf16> to vector<32x256xbf16>
    %143 = tpu.concatenate %140, %142 in 1 : vector<32x256xbf16>, vector<32x256xbf16> -> vector<32x512xbf16>
    %144 = vector.broadcast %88 : vector<1x512xbf16> to vector<32x512xbf16>
    %145 = arith.mulf %143, %144 : vector<32x512xbf16>
    %146 = tpu.concatenate %95, %100, %107, %114, %119, %126, %133, %138, %145 in 0 : vector<32x512xbf16>, vector<32x512xbf16>, vector<32x512xbf16>, vector<32x512xbf16>, vector<32x512xbf16>, vector<32x512xbf16>, vector<32x512xbf16>, vector<32x512xbf16>, vector<32x512xbf16> -> vector<288x512xbf16>
    %c0_94 = arith.constant 0 : index
    %c0_95 = arith.constant 0 : index
    %147 = vector.load %arg6[%c0_94, %c0_95] : memref<8x288xbf16, #tpu.memory_space<vmem>>, vector<8x288xbf16>
    %cst_96 = arith.constant dense<0.000000e+00> : vector<8x512xf32>
    %148 = tpu.matmul %147, %146, %cst_96 {dimension_numbers = #tpu.dot_dimension_numbers<[1], [0], [0], [1], [0, 0, 1, 1], [], []>} : vector<8x288xbf16>, vector<288x512xbf16>, vector<8x512xf32> -> vector<8x512xf32>
    %c0_97 = arith.constant 0 : index
    %c0_98 = arith.constant 0 : index
    %149 = vector.load %arg7[%c0_97, %c0_98] : memref<8x1xf32, #tpu.memory_space<vmem>>, vector<8x1xf32>
    %150 = vector.broadcast %149 : vector<8x1xf32> to vector<8x512xf32>
    %151 = arith.addf %148, %150 : vector<8x512xf32>
    %c1_99 = arith.constant 1 : index
    %152 = memref.load %arg11[%c1_99] : memref<2xf32, #tpu.memory_space<smem>>
    %cst_100 = arith.constant 0.000000e+00 : f32
    %153 = vector.broadcast %cst_100 : f32 to vector<8x512xf32>
    %154 = arith.cmpf ogt, %151, %153 : vector<8x512xf32>
    %155 = vector.broadcast %152 : f32 to vector<8x512xf32>
    %156 = arith.mulf %155, %151 : vector<8x512xf32>
    %157 = arith.select %154, %151, %156 : vector<8x512xi1>, vector<8x512xf32>
    %158 = arith.truncf %157 : vector<8x512xf32> to vector<8x512xbf16>
    %c0_101 = arith.constant 0 : index
    %c0_102 = arith.constant 0 : index
    %159 = vector.load %arg12[%c0_101, %c0_102] : memref<8x512xbf16, #tpu.memory_space<vmem>>, vector<8x512xbf16>
    tpu.vector_store %arg12[%c0_101, %c0_102], %158 {strides = array<i32>} : memref<8x512xbf16, #tpu.memory_space<vmem>>, vector<8x512xbf16>,
    return
  }
  func.func @transform_0(%arg0: i32) -> (i32, i32) {
    %c0_i32 = arith.constant 0 : i32
    %c0_i32_0 = arith.constant 0 : i32
    %c0_i32_1 = arith.constant 0 : i32
    return %c0_i32, %c0_i32_0 : i32, i32
  }
  func.func @transform_1(%arg0: i32) -> (i32, i32) {
    %c0_i32 = arith.constant 0 : i32
    %c0_i32_0 = arith.constant 0 : i32
    %c0_i32_1 = arith.constant 0 : i32
    return %c0_i32, %c0_i32_0 : i32, i32
  }
  func.func @transform_2(%arg0: i32) -> (i32, i32) {
    %c0_i32 = arith.constant 0 : i32
    %c0_i32_0 = arith.constant 0 : i32
    %c0_i32_1 = arith.constant 0 : i32
    return %c0_i32, %c0_i32_0 : i32, i32
  }
  func.func @transform_3(%arg0: i32) -> (i32, i32) {
    %c0_i32 = arith.constant 0 : i32
    %c0_i32_0 = arith.constant 0 : i32
    %c0_i32_1 = arith.constant 0 : i32
    return %c0_i32, %c0_i32_0 : i32, i32
  }
  func.func @transform_4(%arg0: i32) -> (i32, i32) {
    %c0_i32 = arith.constant 0 : i32
    %c0_i32_0 = arith.constant 0 : i32
    %c0_i32_1 = arith.constant 0 : i32
    return %c0_i32, %c0_i32_0 : i32, i32
  }
  func.func @transform_5(%arg0: i32) -> (i32, i32) {
    %c0_i32 = arith.constant 0 : i32
    %c0_i32_0 = arith.constant 0 : i32
    %c0_i32_1 = arith.constant 0 : i32
    return %c0_i32, %c0_i32_0 : i32, i32
  }
  func.func @transform_6(%arg0: i32) -> (i32, i32) {
    %c0_i32 = arith.constant 0 : i32
    %c0_i32_0 = arith.constant 0 : i32
    %c0_i32_1 = arith.constant 0 : i32
    return %c0_i32, %c0_i32_0 : i32, i32
  }
  func.func @transform_7(%arg0: i32) -> (i32, i32) {
    %c0_i32 = arith.constant 0 : i32
    %c0_i32_0 = arith.constant 0 : i32
    %c0_i32_1 = arith.constant 0 : i32
    return %c0_i32, %c0_i32_0 : i32, i32
  }
  func.func @transform_8(%arg0: i32) -> (i32, i32) {
    %c0_i32 = arith.constant 0 : i32
    %c0_i32_0 = arith.constant 0 : i32
    %c0_i32_1 = arith.constant 0 : i32
    return %c0_i32, %c0_i32_0 : i32, i32
  }
  func.func @transform_9(%arg0: i32) -> (i32, i32) {
    %c0_i32 = arith.constant 0 : i32
    %c0_i32_0 = arith.constant 0 : i32
    %c0_i32_1 = arith.constant 0 : i32
    return %c0_i32, %c0_i32_0 : i32, i32
  }
  func.func @transform_10(%arg0: i32) -> i32 {
    %c0_i32 = arith.constant 0 : i32
    %c0_i32_0 = arith.constant 0 : i32
    return %c0_i32 : i32
  }
  func.func @transform_11(%arg0: i32) -> (i32, i32) {
    %c0_i32 = arith.constant 0 : i32
    %c0_i32_0 = arith.constant 0 : i32
    %c0_i32_1 = arith.constant 0 : i32
    return %c0_i32, %c0_i32_0 : i32, i32
  }
}

module attributes {stable_mosaic.version = 11 : i64} {
  func.func @_bottleneck_kernel(%arg0: i32, %arg1: memref<4x512xbf16, #tpu.memory_space<vmem>>, %arg2: memref<8x512xbf16, #tpu.memory_space<vmem>>, %arg3: memref<32x12xbf16, #tpu.memory_space<vmem>>, %arg4: memref<32x1xf32, #tpu.memory_space<vmem>>, %arg5: memref<12x1xf32, #tpu.memory_space<vmem>>, %arg6: memref<12x1xf32, #tpu.memory_space<vmem>>, %arg7: memref<8x288xbf16, #tpu.memory_space<vmem>>, %arg8: memref<8x1xf32, #tpu.memory_space<vmem>>, %arg9: memref<32x1xf32, #tpu.memory_space<vmem>>, %arg10: memref<32x1xf32, #tpu.memory_space<vmem>>, %arg11: memref<2x512xbf16, #tpu.memory_space<vmem>>, %arg12: memref<2xf32, #tpu.memory_space<smem>>, %arg13: memref<8x512xbf16, #tpu.memory_space<vmem>>, %arg14: memref<2x32x512xbf16, #tpu.memory_space<vmem>>) attributes {dimension_semantics = [#tpu.dimension_semantics<arbitrary>], iteration_bounds = array<i64: 1>, scalar_prefetch = 0 : i64, scratch_operands = 1 : i64, tpu.core_type = #tpu.core_type<tc>, window_params = [{pipeline_mode = #tpu.pipeline_mode<synchronous>, transform_indices = @transform_0, window_bounds = array<i64: 4, 512>}, {pipeline_mode = #tpu.pipeline_mode<synchronous>, transform_indices = @transform_1, window_bounds = array<i64: 8, 512>}, {pipeline_mode = #tpu.pipeline_mode<synchronous>, transform_indices = @transform_2, window_bounds = array<i64: 32, 12>}, {pipeline_mode = #tpu.pipeline_mode<synchronous>, transform_indices = @transform_3, window_bounds = array<i64: 32, 1>}, {pipeline_mode = #tpu.pipeline_mode<synchronous>, transform_indices = @transform_4, window_bounds = array<i64: 12, 1>}, {pipeline_mode = #tpu.pipeline_mode<synchronous>, transform_indices = @transform_5, window_bounds = array<i64: 12, 1>}, {pipeline_mode = #tpu.pipeline_mode<synchronous>, transform_indices = @transform_6, window_bounds = array<i64: 8, 288>}, {pipeline_mode = #tpu.pipeline_mode<synchronous>, transform_indices = @transform_7, window_bounds = array<i64: 8, 1>}, {pipeline_mode = #tpu.pipeline_mode<synchronous>, transform_indices = @transform_8, window_bounds = array<i64: 32, 1>}, {pipeline_mode = #tpu.pipeline_mode<synchronous>, transform_indices = @transform_9, window_bounds = array<i64: 32, 1>}, {pipeline_mode = #tpu.pipeline_mode<synchronous>, transform_indices = @transform_10, window_bounds = array<i64: 2, 512>}, {transform_indices = @transform_11, window_bounds = array<i64: 2>}, {pipeline_mode = #tpu.pipeline_mode<synchronous>, transform_indices = @transform_12, window_bounds = array<i64: 8, 512>}]} {
    %c0 = arith.constant 0 : index
    %c0_0 = arith.constant 0 : index
    %0 = vector.load %arg1[%c0, %c0_0] : memref<4x512xbf16, #tpu.memory_space<vmem>>, vector<4x512xbf16>
    %1 = arith.extf %0 : vector<4x512xbf16> to vector<4x512xf32>
    %c0_1 = arith.constant 0 : index
    %c0_2 = arith.constant 0 : index
    %2 = vector.load %arg2[%c0_1, %c0_2] : memref<8x512xbf16, #tpu.memory_space<vmem>>, vector<8x512xbf16>
    %3 = arith.extf %2 : vector<8x512xbf16> to vector<8x512xf32>
    %4 = tpu.concatenate %1, %3 in 0 : vector<4x512xf32>, vector<8x512xf32> -> vector<12x512xf32>
    %cst = arith.constant dense<0.000000e+00> : vector<12xf32>
    %5 = vector.multi_reduction <add>, %4, %cst [1] : vector<12x512xf32> to vector<12xf32>
    %6 = vector.shape_cast %5 : vector<12xf32> to vector<12x1xf32>
    %cst_3 = arith.constant 0.001953125 : f32
    %7 = vector.broadcast %cst_3 : f32 to vector<12x1xf32>
    %8 = arith.mulf %6, %7 : vector<12x1xf32>
    %9 = arith.mulf %4, %4 : vector<12x512xf32>
    %cst_4 = arith.constant dense<0.000000e+00> : vector<12xf32>
    %10 = vector.multi_reduction <add>, %9, %cst_4 [1] : vector<12x512xf32> to vector<12xf32>
    %11 = vector.shape_cast %10 : vector<12xf32> to vector<12x1xf32>
    %cst_5 = arith.constant 0.001953125 : f32
    %12 = vector.broadcast %cst_5 : f32 to vector<12x1xf32>
    %13 = arith.mulf %11, %12 : vector<12x1xf32>
    %14 = arith.mulf %8, %8 : vector<12x1xf32>
    %15 = arith.subf %13, %14 : vector<12x1xf32>
    %cst_6 = arith.constant 0.000000e+00 : f32
    %16 = vector.broadcast %cst_6 : f32 to vector<12x1xf32>
    %17 = arith.maximumf %15, %16 : vector<12x1xf32>
    %c0_7 = arith.constant 0 : index
    %c0_8 = arith.constant 0 : index
    %18 = vector.load %arg5[%c0_7, %c0_8] : memref<12x1xf32, #tpu.memory_space<vmem>>, vector<12x1xf32>
    %cst_9 = arith.constant 9.99999974E-6 : f32
    %19 = vector.broadcast %cst_9 : f32 to vector<12x1xf32>
    %20 = arith.addf %17, %19 : vector<12x1xf32>
    %21 = math.rsqrt %20 : vector<12x1xf32>
    %22 = arith.mulf %18, %21 : vector<12x1xf32>
    %c0_10 = arith.constant 0 : index
    %c0_11 = arith.constant 0 : index
    %23 = vector.load %arg6[%c0_10, %c0_11] : memref<12x1xf32, #tpu.memory_space<vmem>>, vector<12x1xf32>
    %24 = arith.mulf %8, %22 : vector<12x1xf32>
    %25 = arith.subf %23, %24 : vector<12x1xf32>
    %26 = vector.broadcast %22 : vector<12x1xf32> to vector<12x512xf32>
    %27 = arith.mulf %4, %26 : vector<12x512xf32>
    %28 = vector.broadcast %25 : vector<12x1xf32> to vector<12x512xf32>
    %29 = arith.addf %27, %28 : vector<12x512xf32>
    %30 = arith.truncf %29 : vector<12x512xf32> to vector<12x512xbf16>
    %c0_12 = arith.constant 0 : index
    %c0_13 = arith.constant 0 : index
    %31 = vector.load %arg3[%c0_12, %c0_13] : memref<32x12xbf16, #tpu.memory_space<vmem>>, vector<32x12xbf16>
    %cst_14 = arith.constant dense<0.000000e+00> : vector<32x512xf32>
    %32 = tpu.matmul %31, %30, %cst_14 {dimension_numbers = #tpu.dot_dimension_numbers<[1], [0], [0], [1], [0, 0, 1, 1], [], []>} : vector<32x12xbf16>, vector<12x512xbf16>, vector<32x512xf32> -> vector<32x512xf32>
    %c0_15 = arith.constant 0 : index
    %c0_16 = arith.constant 0 : index
    %33 = vector.load %arg4[%c0_15, %c0_16] : memref<32x1xf32, #tpu.memory_space<vmem>>, vector<32x1xf32>
    %34 = vector.broadcast %33 : vector<32x1xf32> to vector<32x512xf32>
    %35 = arith.addf %32, %34 : vector<32x512xf32>
    %c0_17 = arith.constant 0 : index
    %36 = memref.load %arg12[%c0_17] : memref<2xf32, #tpu.memory_space<smem>>
    %cst_18 = arith.constant 0.000000e+00 : f32
    %37 = vector.broadcast %cst_18 : f32 to vector<32x512xf32>
    %38 = arith.cmpf ogt, %35, %37 : vector<32x512xf32>
    %39 = vector.broadcast %36 : f32 to vector<32x512xf32>
    %40 = arith.mulf %39, %35 : vector<32x512xf32>
    %41 = arith.select %38, %35, %40 : vector<32x512xi1>, vector<32x512xf32>
    %cst_19 = arith.constant dense<0.000000e+00> : vector<32xf32>
    %42 = vector.multi_reduction <add>, %41, %cst_19 [1] : vector<32x512xf32> to vector<32xf32>
    %43 = vector.shape_cast %42 : vector<32xf32> to vector<32x1xf32>
    %cst_20 = arith.constant 0.001953125 : f32
    %44 = vector.broadcast %cst_20 : f32 to vector<32x1xf32>
    %45 = arith.mulf %43, %44 : vector<32x1xf32>
    %46 = arith.mulf %41, %41 : vector<32x512xf32>
    %cst_21 = arith.constant dense<0.000000e+00> : vector<32xf32>
    %47 = vector.multi_reduction <add>, %46, %cst_21 [1] : vector<32x512xf32> to vector<32xf32>
    %48 = vector.shape_cast %47 : vector<32xf32> to vector<32x1xf32>
    %cst_22 = arith.constant 0.001953125 : f32
    %49 = vector.broadcast %cst_22 : f32 to vector<32x1xf32>
    %50 = arith.mulf %48, %49 : vector<32x1xf32>
    %51 = arith.mulf %45, %45 : vector<32x1xf32>
    %52 = arith.subf %50, %51 : vector<32x1xf32>
    %cst_23 = arith.constant 0.000000e+00 : f32
    %53 = vector.broadcast %cst_23 : f32 to vector<32x1xf32>
    %54 = arith.maximumf %52, %53 : vector<32x1xf32>
    %c0_24 = arith.constant 0 : index
    %c0_25 = arith.constant 0 : index
    %55 = vector.load %arg9[%c0_24, %c0_25] : memref<32x1xf32, #tpu.memory_space<vmem>>, vector<32x1xf32>
    %cst_26 = arith.constant 9.99999974E-6 : f32
    %56 = vector.broadcast %cst_26 : f32 to vector<32x1xf32>
    %57 = arith.addf %54, %56 : vector<32x1xf32>
    %58 = math.rsqrt %57 : vector<32x1xf32>
    %59 = arith.mulf %55, %58 : vector<32x1xf32>
    %c0_27 = arith.constant 0 : index
    %c0_28 = arith.constant 0 : index
    %60 = vector.load %arg10[%c0_27, %c0_28] : memref<32x1xf32, #tpu.memory_space<vmem>>, vector<32x1xf32>
    %61 = arith.mulf %45, %59 : vector<32x1xf32>
    %62 = arith.subf %60, %61 : vector<32x1xf32>
    %63 = vector.broadcast %59 : vector<32x1xf32> to vector<32x512xf32>
    %64 = arith.mulf %41, %63 : vector<32x512xf32>
    %65 = vector.broadcast %62 : vector<32x1xf32> to vector<32x512xf32>
    %66 = arith.addf %64, %65 : vector<32x512xf32>
    %67 = arith.truncf %66 : vector<32x512xf32> to vector<32x512xbf16>
    %cst_29 = arith.constant 0.000000e+00 : bf16
    %68 = vector.broadcast %cst_29 : bf16 to vector<32x128xbf16>
    %cst_30 = arith.constant 0.000000e+00 : bf16
    %69 = vector.broadcast %cst_30 : bf16 to vector<32x128xbf16>
    %c0_31 = arith.constant 0 : index
    %c0_32 = arith.constant 0 : index
    %c0_33 = arith.constant 0 : index
    %70 = vector.load %arg14[%c0_31, %c0_32, %c0_33] : memref<2x32x512xbf16, #tpu.memory_space<vmem>>, vector<1x32x128xbf16>
    %71 = vector.shape_cast %70 : vector<1x32x128xbf16> to vector<32x128xbf16>
    %72 = vector.shape_cast %68 : vector<32x128xbf16> to vector<1x32x128xbf16>
    tpu.vector_store %arg14[%c0_31, %c0_32, %c0_33], %72 {strides = array<i32>} : memref<2x32x512xbf16, #tpu.memory_space<vmem>>, vector<1x32x128xbf16>,
    %73 = vector.extract_strided_slice %67 {offsets = [0, 0], sizes = [32, 256], strides = [1, 1]} : vector<32x512xbf16> to vector<32x256xbf16>
    %c0_34 = arith.constant 0 : index
    %c0_35 = arith.constant 0 : index
    %c128 = arith.constant 128 : index
    %74 = vector.load %arg14[%c0_34, %c0_35, %c128] : memref<2x32x512xbf16, #tpu.memory_space<vmem>>, vector<1x32x256xbf16>
    %75 = vector.shape_cast %74 : vector<1x32x256xbf16> to vector<32x256xbf16>
    %76 = vector.shape_cast %73 : vector<32x256xbf16> to vector<1x32x256xbf16>
    tpu.vector_store %arg14[%c0_34, %c0_35, %c128], %76 {strides = array<i32>} : memref<2x32x512xbf16, #tpu.memory_space<vmem>>, vector<1x32x256xbf16>,
    %c0_36 = arith.constant 0 : index
    %c0_37 = arith.constant 0 : index
    %c384 = arith.constant 384 : index
    %77 = vector.load %arg14[%c0_36, %c0_37, %c384] : memref<2x32x512xbf16, #tpu.memory_space<vmem>>, vector<1x32x128xbf16>
    %78 = vector.shape_cast %77 : vector<1x32x128xbf16> to vector<32x128xbf16>
    %79 = vector.shape_cast %69 : vector<32x128xbf16> to vector<1x32x128xbf16>
    tpu.vector_store %arg14[%c0_36, %c0_37, %c384], %79 {strides = array<i32>} : memref<2x32x512xbf16, #tpu.memory_space<vmem>>, vector<1x32x128xbf16>,
    %c1 = arith.constant 1 : index
    %c0_38 = arith.constant 0 : index
    %c0_39 = arith.constant 0 : index
    %80 = vector.load %arg14[%c1, %c0_38, %c0_39] : memref<2x32x512xbf16, #tpu.memory_space<vmem>>, vector<1x32x128xbf16>
    %81 = vector.shape_cast %80 : vector<1x32x128xbf16> to vector<32x128xbf16>
    %82 = vector.shape_cast %68 : vector<32x128xbf16> to vector<1x32x128xbf16>
    tpu.vector_store %arg14[%c1, %c0_38, %c0_39], %82 {strides = array<i32>} : memref<2x32x512xbf16, #tpu.memory_space<vmem>>, vector<1x32x128xbf16>,
    %83 = vector.extract_strided_slice %67 {offsets = [0, 256], sizes = [32, 256], strides = [1, 1]} : vector<32x512xbf16> to vector<32x256xbf16>
    %c1_40 = arith.constant 1 : index
    %c0_41 = arith.constant 0 : index
    %c128_42 = arith.constant 128 : index
    %84 = vector.load %arg14[%c1_40, %c0_41, %c128_42] : memref<2x32x512xbf16, #tpu.memory_space<vmem>>, vector<1x32x256xbf16>
    %85 = vector.shape_cast %84 : vector<1x32x256xbf16> to vector<32x256xbf16>
    %86 = vector.shape_cast %83 : vector<32x256xbf16> to vector<1x32x256xbf16>
    tpu.vector_store %arg14[%c1_40, %c0_41, %c128_42], %86 {strides = array<i32>} : memref<2x32x512xbf16, #tpu.memory_space<vmem>>, vector<1x32x256xbf16>,
    %c1_43 = arith.constant 1 : index
    %c0_44 = arith.constant 0 : index
    %c384_45 = arith.constant 384 : index
    %87 = vector.load %arg14[%c1_43, %c0_44, %c384_45] : memref<2x32x512xbf16, #tpu.memory_space<vmem>>, vector<1x32x128xbf16>
    %88 = vector.shape_cast %87 : vector<1x32x128xbf16> to vector<32x128xbf16>
    %89 = vector.shape_cast %69 : vector<32x128xbf16> to vector<1x32x128xbf16>
    tpu.vector_store %arg14[%c1_43, %c0_44, %c384_45], %89 {strides = array<i32>} : memref<2x32x512xbf16, #tpu.memory_space<vmem>>, vector<1x32x128xbf16>,
    %c0_46 = arith.constant 0 : index
    %c0_47 = arith.constant 0 : index
    %90 = vector.load %arg11[%c0_46, %c0_47] : memref<2x512xbf16, #tpu.memory_space<vmem>>, vector<1x512xbf16>
    %c1_48 = arith.constant 1 : index
    %c0_49 = arith.constant 0 : index
    %91 = vector.load %arg11[%c1_48, %c0_49] : memref<2x512xbf16, #tpu.memory_space<vmem>>, vector<1x512xbf16>
    %c0_50 = arith.constant 0 : index
    %c0_51 = arith.constant 0 : index
    %c111 = arith.constant 111 : index
    %92 = vector.load %arg14[%c0_50, %c0_51, %c111] : memref<2x32x512xbf16, #tpu.memory_space<vmem>>, vector<1x32x256xbf16>
    %93 = vector.shape_cast %92 : vector<1x32x256xbf16> to vector<32x256xbf16>
    %c1_52 = arith.constant 1 : index
    %c0_53 = arith.constant 0 : index
    %c111_54 = arith.constant 111 : index
    %94 = vector.load %arg14[%c1_52, %c0_53, %c111_54] : memref<2x32x512xbf16, #tpu.memory_space<vmem>>, vector<1x32x256xbf16>
    %95 = vector.shape_cast %94 : vector<1x32x256xbf16> to vector<32x256xbf16>
    %96 = tpu.concatenate %93, %95 in 1 : vector<32x256xbf16>, vector<32x256xbf16> -> vector<32x512xbf16>
    %97 = vector.broadcast %90 : vector<1x512xbf16> to vector<32x512xbf16>
    %98 = arith.mulf %96, %97 : vector<32x512xbf16>
    %c0_55 = arith.constant 0 : index
    %c0_56 = arith.constant 0 : index
    %c112 = arith.constant 112 : index
    %99 = vector.load %arg14[%c0_55, %c0_56, %c112] : memref<2x32x512xbf16, #tpu.memory_space<vmem>>, vector<1x32x256xbf16>
    %100 = vector.shape_cast %99 : vector<1x32x256xbf16> to vector<32x256xbf16>
    %c1_57 = arith.constant 1 : index
    %c0_58 = arith.constant 0 : index
    %c112_59 = arith.constant 112 : index
    %101 = vector.load %arg14[%c1_57, %c0_58, %c112_59] : memref<2x32x512xbf16, #tpu.memory_space<vmem>>, vector<1x32x256xbf16>
    %102 = vector.shape_cast %101 : vector<1x32x256xbf16> to vector<32x256xbf16>
    %103 = tpu.concatenate %100, %102 in 1 : vector<32x256xbf16>, vector<32x256xbf16> -> vector<32x512xbf16>
    %c0_60 = arith.constant 0 : index
    %c0_61 = arith.constant 0 : index
    %c113 = arith.constant 113 : index
    %104 = vector.load %arg14[%c0_60, %c0_61, %c113] : memref<2x32x512xbf16, #tpu.memory_space<vmem>>, vector<1x32x256xbf16>
    %105 = vector.shape_cast %104 : vector<1x32x256xbf16> to vector<32x256xbf16>
    %c1_62 = arith.constant 1 : index
    %c0_63 = arith.constant 0 : index
    %c113_64 = arith.constant 113 : index
    %106 = vector.load %arg14[%c1_62, %c0_63, %c113_64] : memref<2x32x512xbf16, #tpu.memory_space<vmem>>, vector<1x32x256xbf16>
    %107 = vector.shape_cast %106 : vector<1x32x256xbf16> to vector<32x256xbf16>
    %108 = tpu.concatenate %105, %107 in 1 : vector<32x256xbf16>, vector<32x256xbf16> -> vector<32x512xbf16>
    %109 = vector.broadcast %91 : vector<1x512xbf16> to vector<32x512xbf16>
    %110 = arith.mulf %108, %109 : vector<32x512xbf16>
    %c0_65 = arith.constant 0 : index
    %c0_66 = arith.constant 0 : index
    %c127 = arith.constant 127 : index
    %111 = vector.load %arg14[%c0_65, %c0_66, %c127] : memref<2x32x512xbf16, #tpu.memory_space<vmem>>, vector<1x32x256xbf16>
    %112 = vector.shape_cast %111 : vector<1x32x256xbf16> to vector<32x256xbf16>
    %c1_67 = arith.constant 1 : index
    %c0_68 = arith.constant 0 : index
    %c127_69 = arith.constant 127 : index
    %113 = vector.load %arg14[%c1_67, %c0_68, %c127_69] : memref<2x32x512xbf16, #tpu.memory_space<vmem>>, vector<1x32x256xbf16>
    %114 = vector.shape_cast %113 : vector<1x32x256xbf16> to vector<32x256xbf16>
    %115 = tpu.concatenate %112, %114 in 1 : vector<32x256xbf16>, vector<32x256xbf16> -> vector<32x512xbf16>
    %116 = vector.broadcast %90 : vector<1x512xbf16> to vector<32x512xbf16>
    %117 = arith.mulf %115, %116 : vector<32x512xbf16>
    %c0_70 = arith.constant 0 : index
    %c0_71 = arith.constant 0 : index
    %c128_72 = arith.constant 128 : index
    %118 = vector.load %arg14[%c0_70, %c0_71, %c128_72] : memref<2x32x512xbf16, #tpu.memory_space<vmem>>, vector<1x32x256xbf16>
    %119 = vector.shape_cast %118 : vector<1x32x256xbf16> to vector<32x256xbf16>
    %c1_73 = arith.constant 1 : index
    %c0_74 = arith.constant 0 : index
    %c128_75 = arith.constant 128 : index
    %120 = vector.load %arg14[%c1_73, %c0_74, %c128_75] : memref<2x32x512xbf16, #tpu.memory_space<vmem>>, vector<1x32x256xbf16>
    %121 = vector.shape_cast %120 : vector<1x32x256xbf16> to vector<32x256xbf16>
    %122 = tpu.concatenate %119, %121 in 1 : vector<32x256xbf16>, vector<32x256xbf16> -> vector<32x512xbf16>
    %c0_76 = arith.constant 0 : index
    %c0_77 = arith.constant 0 : index
    %c129 = arith.constant 129 : index
    %123 = vector.load %arg14[%c0_76, %c0_77, %c129] : memref<2x32x512xbf16, #tpu.memory_space<vmem>>, vector<1x32x256xbf16>
    %124 = vector.shape_cast %123 : vector<1x32x256xbf16> to vector<32x256xbf16>
    %c1_78 = arith.constant 1 : index
    %c0_79 = arith.constant 0 : index
    %c129_80 = arith.constant 129 : index
    %125 = vector.load %arg14[%c1_78, %c0_79, %c129_80] : memref<2x32x512xbf16, #tpu.memory_space<vmem>>, vector<1x32x256xbf16>
    %126 = vector.shape_cast %125 : vector<1x32x256xbf16> to vector<32x256xbf16>
    %127 = tpu.concatenate %124, %126 in 1 : vector<32x256xbf16>, vector<32x256xbf16> -> vector<32x512xbf16>
    %128 = vector.broadcast %91 : vector<1x512xbf16> to vector<32x512xbf16>
    %129 = arith.mulf %127, %128 : vector<32x512xbf16>
    %c0_81 = arith.constant 0 : index
    %c0_82 = arith.constant 0 : index
    %c143 = arith.constant 143 : index
    %130 = vector.load %arg14[%c0_81, %c0_82, %c143] : memref<2x32x512xbf16, #tpu.memory_space<vmem>>, vector<1x32x256xbf16>
    %131 = vector.shape_cast %130 : vector<1x32x256xbf16> to vector<32x256xbf16>
    %c1_83 = arith.constant 1 : index
    %c0_84 = arith.constant 0 : index
    %c143_85 = arith.constant 143 : index
    %132 = vector.load %arg14[%c1_83, %c0_84, %c143_85] : memref<2x32x512xbf16, #tpu.memory_space<vmem>>, vector<1x32x256xbf16>
    %133 = vector.shape_cast %132 : vector<1x32x256xbf16> to vector<32x256xbf16>
    %134 = tpu.concatenate %131, %133 in 1 : vector<32x256xbf16>, vector<32x256xbf16> -> vector<32x512xbf16>
    %135 = vector.broadcast %90 : vector<1x512xbf16> to vector<32x512xbf16>
    %136 = arith.mulf %134, %135 : vector<32x512xbf16>
    %c0_86 = arith.constant 0 : index
    %c0_87 = arith.constant 0 : index
    %c144 = arith.constant 144 : index
    %137 = vector.load %arg14[%c0_86, %c0_87, %c144] : memref<2x32x512xbf16, #tpu.memory_space<vmem>>, vector<1x32x256xbf16>
    %138 = vector.shape_cast %137 : vector<1x32x256xbf16> to vector<32x256xbf16>
    %c1_88 = arith.constant 1 : index
    %c0_89 = arith.constant 0 : index
    %c144_90 = arith.constant 144 : index
    %139 = vector.load %arg14[%c1_88, %c0_89, %c144_90] : memref<2x32x512xbf16, #tpu.memory_space<vmem>>, vector<1x32x256xbf16>
    %140 = vector.shape_cast %139 : vector<1x32x256xbf16> to vector<32x256xbf16>
    %141 = tpu.concatenate %138, %140 in 1 : vector<32x256xbf16>, vector<32x256xbf16> -> vector<32x512xbf16>
    %c0_91 = arith.constant 0 : index
    %c0_92 = arith.constant 0 : index
    %c145 = arith.constant 145 : index
    %142 = vector.load %arg14[%c0_91, %c0_92, %c145] : memref<2x32x512xbf16, #tpu.memory_space<vmem>>, vector<1x32x256xbf16>
    %143 = vector.shape_cast %142 : vector<1x32x256xbf16> to vector<32x256xbf16>
    %c1_93 = arith.constant 1 : index
    %c0_94 = arith.constant 0 : index
    %c145_95 = arith.constant 145 : index
    %144 = vector.load %arg14[%c1_93, %c0_94, %c145_95] : memref<2x32x512xbf16, #tpu.memory_space<vmem>>, vector<1x32x256xbf16>
    %145 = vector.shape_cast %144 : vector<1x32x256xbf16> to vector<32x256xbf16>
    %146 = tpu.concatenate %143, %145 in 1 : vector<32x256xbf16>, vector<32x256xbf16> -> vector<32x512xbf16>
    %147 = vector.broadcast %91 : vector<1x512xbf16> to vector<32x512xbf16>
    %148 = arith.mulf %146, %147 : vector<32x512xbf16>
    %149 = tpu.concatenate %98, %103, %110, %117, %122, %129, %136, %141, %148 in 0 : vector<32x512xbf16>, vector<32x512xbf16>, vector<32x512xbf16>, vector<32x512xbf16>, vector<32x512xbf16>, vector<32x512xbf16>, vector<32x512xbf16>, vector<32x512xbf16>, vector<32x512xbf16> -> vector<288x512xbf16>
    %c0_96 = arith.constant 0 : index
    %c0_97 = arith.constant 0 : index
    %150 = vector.load %arg7[%c0_96, %c0_97] : memref<8x288xbf16, #tpu.memory_space<vmem>>, vector<8x288xbf16>
    %cst_98 = arith.constant dense<0.000000e+00> : vector<8x512xf32>
    %151 = tpu.matmul %150, %149, %cst_98 {dimension_numbers = #tpu.dot_dimension_numbers<[1], [0], [0], [1], [0, 0, 1, 1], [], []>} : vector<8x288xbf16>, vector<288x512xbf16>, vector<8x512xf32> -> vector<8x512xf32>
    %c0_99 = arith.constant 0 : index
    %c0_100 = arith.constant 0 : index
    %152 = vector.load %arg8[%c0_99, %c0_100] : memref<8x1xf32, #tpu.memory_space<vmem>>, vector<8x1xf32>
    %153 = vector.broadcast %152 : vector<8x1xf32> to vector<8x512xf32>
    %154 = arith.addf %151, %153 : vector<8x512xf32>
    %c1_101 = arith.constant 1 : index
    %155 = memref.load %arg12[%c1_101] : memref<2xf32, #tpu.memory_space<smem>>
    %cst_102 = arith.constant 0.000000e+00 : f32
    %156 = vector.broadcast %cst_102 : f32 to vector<8x512xf32>
    %157 = arith.cmpf ogt, %154, %156 : vector<8x512xf32>
    %158 = vector.broadcast %155 : f32 to vector<8x512xf32>
    %159 = arith.mulf %158, %154 : vector<8x512xf32>
    %160 = arith.select %157, %154, %159 : vector<8x512xi1>, vector<8x512xf32>
    %161 = arith.truncf %160 : vector<8x512xf32> to vector<8x512xbf16>
    %c0_103 = arith.constant 0 : index
    %c0_104 = arith.constant 0 : index
    %162 = vector.load %arg13[%c0_103, %c0_104] : memref<8x512xbf16, #tpu.memory_space<vmem>>, vector<8x512xbf16>
    tpu.vector_store %arg13[%c0_103, %c0_104], %161 {strides = array<i32>} : memref<8x512xbf16, #tpu.memory_space<vmem>>, vector<8x512xbf16>,
    return
  }
  func.func @transform_0(%arg0: i32) -> (i32, i32) {
    %c0_i32 = arith.constant 0 : i32
    %c0_i32_0 = arith.constant 0 : i32
    %c0_i32_1 = arith.constant 0 : i32
    return %c0_i32, %c0_i32_0 : i32, i32
  }
  func.func @transform_1(%arg0: i32) -> (i32, i32) {
    %c0_i32 = arith.constant 0 : i32
    %c0_i32_0 = arith.constant 0 : i32
    %c0_i32_1 = arith.constant 0 : i32
    return %c0_i32, %c0_i32_0 : i32, i32
  }
  func.func @transform_2(%arg0: i32) -> (i32, i32) {
    %c0_i32 = arith.constant 0 : i32
    %c0_i32_0 = arith.constant 0 : i32
    %c0_i32_1 = arith.constant 0 : i32
    return %c0_i32, %c0_i32_0 : i32, i32
  }
  func.func @transform_3(%arg0: i32) -> (i32, i32) {
    %c0_i32 = arith.constant 0 : i32
    %c0_i32_0 = arith.constant 0 : i32
    %c0_i32_1 = arith.constant 0 : i32
    return %c0_i32, %c0_i32_0 : i32, i32
  }
  func.func @transform_4(%arg0: i32) -> (i32, i32) {
    %c0_i32 = arith.constant 0 : i32
    %c0_i32_0 = arith.constant 0 : i32
    %c0_i32_1 = arith.constant 0 : i32
    return %c0_i32, %c0_i32_0 : i32, i32
  }
  func.func @transform_5(%arg0: i32) -> (i32, i32) {
    %c0_i32 = arith.constant 0 : i32
    %c0_i32_0 = arith.constant 0 : i32
    %c0_i32_1 = arith.constant 0 : i32
    return %c0_i32, %c0_i32_0 : i32, i32
  }
  func.func @transform_6(%arg0: i32) -> (i32, i32) {
    %c0_i32 = arith.constant 0 : i32
    %c0_i32_0 = arith.constant 0 : i32
    %c0_i32_1 = arith.constant 0 : i32
    return %c0_i32, %c0_i32_0 : i32, i32
  }
  func.func @transform_7(%arg0: i32) -> (i32, i32) {
    %c0_i32 = arith.constant 0 : i32
    %c0_i32_0 = arith.constant 0 : i32
    %c0_i32_1 = arith.constant 0 : i32
    return %c0_i32, %c0_i32_0 : i32, i32
  }
  func.func @transform_8(%arg0: i32) -> (i32, i32) {
    %c0_i32 = arith.constant 0 : i32
    %c0_i32_0 = arith.constant 0 : i32
    %c0_i32_1 = arith.constant 0 : i32
    return %c0_i32, %c0_i32_0 : i32, i32
  }
  func.func @transform_9(%arg0: i32) -> (i32, i32) {
    %c0_i32 = arith.constant 0 : i32
    %c0_i32_0 = arith.constant 0 : i32
    %c0_i32_1 = arith.constant 0 : i32
    return %c0_i32, %c0_i32_0 : i32, i32
  }
  func.func @transform_10(%arg0: i32) -> (i32, i32) {
    %c0_i32 = arith.constant 0 : i32
    %c0_i32_0 = arith.constant 0 : i32
    %c0_i32_1 = arith.constant 0 : i32
    return %c0_i32, %c0_i32_0 : i32, i32
  }
  func.func @transform_11(%arg0: i32) -> i32 {
    %c0_i32 = arith.constant 0 : i32
    %c0_i32_0 = arith.constant 0 : i32
    return %c0_i32 : i32
  }
  func.func @transform_12(%arg0: i32) -> (i32, i32) {
    %c0_i32 = arith.constant 0 : i32
    %c0_i32_0 = arith.constant 0 : i32
    %c0_i32_1 = arith.constant 0 : i32
    return %c0_i32, %c0_i32_0 : i32, i32
  }
}

</mosaic_0001>

<bundles_post_ra>
// kernel: dense_block_forward.2
= control target key start
LH: loop header
LB: loop body
LE: loop exit
PB: predicated region body
PF: predicated region fallthrough
CT: control target
= control target key end

     0   :  { %16 = vsyncpa [#allocation4], 0  ;;  %s2240_s0 = inlined_call_operand.vmem [shape: bf16[4,512], index: 0, kind: input, shape index: {}]   ;;  %s2241_s1 = inlined_call_operand.vmem [shape: bf16[32,4], index: 1, kind: input, shape index: {}]   ;;  %s2242_s2 = inlined_call_operand.vmem [shape: f32[32,1], index: 2, kind: input, shape index: {}]   ;;  %s2243_s3 = inlined_call_operand.vmem [shape: f32[4,1], index: 3, kind: input, shape index: {}]   ;;  %s2244_s4 = inlined_call_operand.vmem [shape: f32[4,1], index: 4, kind: input, shape index: {}]   ;;  %s2245_s5 = inlined_call_operand.vmem [shape: bf16[8,288], index: 5, kind: input, shape index: {}]   ;;  %s2246_s6 = inlined_call_operand.vmem [shape: f32[8,1], index: 6, kind: input, shape index: {}]   ;;  %s2247_s7 = inlined_call_operand.vmem [shape: f32[32,1], index: 7, kind: input, shape index: {}]   ;;  %s2248_s8 = inlined_call_operand.vmem [shape: f32[32,1], index: 8, kind: input, shape index: {}]   ;;  %s2249_s9 = inlined_call_operand.vmem [shape: bf16[2,512], index: 9, kind: input, shape index: {}]   ;;  %s2250_s10 = inlined_call_operand.vmem [shape: f32[2], index: 10, kind: input, shape index: {}]   ;;  %s2251_s11 = inlined_call_operand.vmem [shape: bf16[8,512], index: 11, kind: output, shape index: {}]  }
   0x1   :  { %s43_s19 = sshll.u32 %s2250_s10, 4  ;;  %s44_s19 = int_to_ptr.vmem [resolvable:$true] %s43_s19 }
   0x2   :  { %s1406_s20 = scalar_lea.vmem %s44_s19, 16  ;;  %p1411_p1 = scmp.lt.s32.totalorder %s44_s19, %s44_s19 }
   0x3   :  { %p1407_p0 = scmp.ne.s32.totalorder %s44_s19, %s1406_s20  ;;  %p1412_p2 = scmp.lt.s32.totalorder %s1406_s20, %s1406_s20 }
   0x5   :  { %p1413_p3 = por %p1412_p2, %p1411_p1 }
   0x7   :  { %p1414_p4 = pnand %p1413_p3, %p1407_p0 }
   0x9   :  { %1417 = shalt.err (!%p1414_p4)
}
   0xa   :  { %s1420_s21 = smov [#allocation3]  }
   0xb   :  { %46 = dma.vmem_to_smem %s44_s19, 16, %s1420_s21, [#allocation4]  }
   0xc   :  { %1418 = dma.done.wait [#allocation4], 16  }
   0xd   :  { %1419 = vsyncadd [#allocation4], 4294967280 }
   0xe   :  { %50 = sfence }
   0xf   :  { %v52_v0 = vld [vmem:[%s2240_s0] sm:$0xff]  ;;  %vm61_vm0 = vcmask 1043456   ;;  %v2252_v23 = vmov 0   ;;  %v143_v38 = vld [vmem:[%s2242_s2 + $0x8] sm:$0xff]  ;;  %v144_v39 = vld [vmem:[%s2242_s2 + $0x10] sm:$0xff]  ;;  %v107_v44 = vlaneseq  ;;  %vm183_vm1 = vcmask 1041408  }
  0x10   :  { %v1498_v1 = vunpack.c.l.bf16 %v52_v0  ;;  %v1500_v2 = vunpack.c.h.bf16 %v52_v0  ;;  %1309 = vset.pattern.permute.xlu1 %v2252_v23  ;;  %228 = vmatprep.mubr.bf16.mxu0 %v2252_v23  ;;  %v93_v32 = vld [vmem:[%s2243_s3] sm:$0xf]  ;;  %v145_v40 = vld [vmem:[%s2242_s2 + $0x18] sm:$0xff]  ;;  %v1422_v42 = vmov 839922192   ;;  %vm176_vm2 = vcmask 31744  }
  0x11   :  { %281 = vmatprep.mubr.bf16.mxu1 %v2252_v23  ;;  %1310 = vset.pattern.permute.xlu0 %v2252_v23  ;;  %v97_v35 = vld [vmem:[%s2244_s4] sm:$0xf]  ;;  %v105_v43 = vunpack.c.l.s4 %v1422_v42  ;;  %v1542_v46 = vshrl.u32 %v107_v44, 7  ;;  %s302_s16 = sld [smem:[#allocation3]]  ;;  %s1424_s17 = smov 16  }
  0x12   :  { %v57_v3 = vcombine.high %v1498_v1, %v1498_v1  ;;  %v58_v4 = vcombine.high %v1500_v2, %v1500_v2  ;;  %v62_v5 = vsel %vm61_vm0, %v1498_v1, 0.0  ;;  %v72_v6 = vmul.f32 %v1498_v1, %v1498_v1  ;;  %v142_v41 = vld [vmem:[%s2242_s2] sm:$0xff]  ;;  %s1425_s18 = smov 15   ;;  %s1426_s19 = smov 1  }
  0x13   :  { %v73_v7 = vmul.f32 %v1500_v2, %v1500_v2  ;;  %v65_v9 = vsel %vm61_vm0, %v1500_v2, 0.0  ;;  %v106_v45 = vunpack.c.0.s8 %v105_v43  ;;  %v1391_v0 = vld [vmem:[%s2241_s1] sm:$0xff]   ;;  %s1427_s20 = smov 127   ;;  %s1428_s13 = smov 113  }
  0x14   :  { %v63_v8 = vsel %vm61_vm0, %v57_v3, 0.0  ;;  %v76_v11 = vcombine.high %v72_v6, %v72_v6  ;;  %v80_v13 = vsel %vm61_vm0, %v72_v6, 0.0  ;;  %v67_v14 = vsel %vm61_vm0, %v58_v4, 0.0  ;;  %s1431_s14 = smov 111  }
  0x15   :  { %v64_v10 = vadd.f32 %v63_v8, %v62_v5  ;;  %v77_v12 = vcombine.high %v73_v7, %v73_v7  ;;  %v83_v17 = vsel %vm61_vm0, %v73_v7, 0.0  ;;  %v109_v47 = vsub.s32 %v106_v45, %v1542_v46 }
  0x16   :  { %v81_v16 = vsel %vm61_vm0, %v76_v11, 0.0 }
  0x17   :  { %v66_v15 = vadd.f32 %v65_v9, %v64_v10  ;;  %v82_v18 = vadd.f32 %v81_v16, %v80_v13  ;;  %v85_v20 = vsel %vm61_vm0, %v77_v12, 0.0 }
  0x19   :  { %v68_v19 = vadd.f32 %v67_v14, %v66_v15  ;;  %v84_v21 = vadd.f32 %v83_v17, %v82_v18  ;;  %v1555_v14 = vstv %s302_s16 }
  0x1b   :  { %69 = vadd.xlane.f32.xlu0 %v68_v19  ;;  %v86_v22 = vadd.f32 %v85_v20, %v84_v21 }
  0x1f   :  { %87 = vadd.xlane.f32.xlu0 %v86_v22 }
  0x35   :  { %148 = vperm.xlu0 %1310, %v142_v41  }
  0xa8   :  { %v70_v24 = vpop.xlane.xlu0 %69 }
  0xa9   :  { %v71_v25 = vmul.f32 0.001953125, %v70_v24 }
  0xab   :  { %v90_v27 = vmul.f32 %v71_v25, %v71_v25 }
  0xac   :  { %v88_v26 = vpop.xlane.xlu0 %87 }
  0xad   :  { %v89_v28 = vmul.f32 0.001953125, %v88_v26 }
  0xaf   :  { %v91_v29 = vsub.f32 %v89_v28, %v90_v27 }
  0xb1   :  { %v92_v30 = vmax.f32 %v91_v29, 0.0 }
  0xb3   :  { %v94_v31 = vadd.f32 1e-05, %v92_v30 }
  0xb5   :  { %1396 = vrsqrt.f32 %v94_v31 }
  0xbf   :  { %v1397_v33 = vpop.eup %1396 }
  0xc0   :  { %v96_v34 = vmul.f32 %v1397_v33, %v93_v32 }
  0xc2   :  { %102 = vperm.xlu1 %1309, %v96_v34   ;;  %v98_v36 = vmul.f32 %v96_v34, %v71_v25 }
  0xc4   :  { %v99_v37 = vsub.f32 %v97_v35, %v98_v36 }
  0xc6   :  { %116 = vperm.xlu1 %1309, %v99_v37  }
  0xca   :  { %153 = vperm.xlu1 %1309, %v143_v38  }
  0xce   :  { %158 = vperm.xlu1 %1309, %v144_v39  }
  0xd2   :  { %163 = vperm.xlu1 %1309, %v145_v40  }
 0x141   :  { %v103_v48 = vpop.permute.xlu1 %102 }
 0x142   :  { %v110_v49 = vrot.slane %v103_v48, %v109_v47 }
 0x144   :  { %v112_v51 = vmul.f32 %v110_v49, %v1498_v1  ;;  %v113_v52 = vmul.f32 %v110_v49, %v1500_v2  ;;  %v1392_v1 = vld [vmem:[%s2241_s1 + $0x8] sm:$0xff]   ;;  %v149_v2 = vpop.permute.xlu0 %148  ;;  %s1423_s1 = smov 17  }
 0x145   :  { %v117_v50 = vpop.permute.xlu1 %116 }
 0x146   :  { %v124_v53 = vrot.slane %v117_v50, %v109_v47 }
 0x148   :  { %v126_v54 = vadd.f32 %v124_v53, %v112_v51  ;;  %v127_v55 = vadd.f32 %v124_v53, %v113_v52 }
 0x149   :  { %v154_v11 = vpop.permute.xlu1 %153 }
 0x14a   :  { %v130_v56 = vcombine.high %v126_v54, %v126_v54  ;;  %v131_v57 = vcombine.high %v127_v55, %v127_v55  ;;  %v134_v58 = vpack.c.bf16 %v126_v54, %v126_v54  ;;  %v136_v59 = vpack.c.bf16 %v127_v55, %v127_v55 }
 0x14c   :  { %v135_v60 = vpack.c.bf16 %v130_v56, %v130_v56  ;;  %v137_v61 = vpack.c.bf16 %v131_v57, %v131_v57  ;;  %v185_v62 = vsel %vm183_vm1, %v134_v58, 0  ;;  %v191_v63 = vsel %vm183_vm1, %v136_v59, 0 }
 0x14d   :  { %v159_v33 = vpop.permute.xlu1 %158 }
 0x14e   :  { %1268 = vmatprep.subr.msk.bf16.mxu0 %vm183_vm1, %v135_v60  ;;  %1271 = vmatprep.subr.msk.bf16.mxu1 %vm183_vm1, %v137_v61 }
 0x14f   :  { %197 = vmatpush1.bf16.msra.mxu0 %v185_v62  ;;  %250 = vmatpush1.bf16.msra.mxu1 %v191_v63 }
 0x151   :  { %v164_v52 = vpop.permute.xlu1 %163 }
 0x152   :  { %1269 = vmatmul.mubr.msk.bf16.vlgmr.msra.gmra.mrb[0].mxu0 %vm176_vm2, %v1391_v0  ;;  %1272 = vmatmul.mubr.msk.bf16.vlgmr.msra.gmra.mrb[0].mxu1 %vm176_vm2, %v1391_v0 }
 0x153   :  { %238 = vmatprep.mubr.bf16.mxu0 %v2252_v23  ;;  %291 = vmatprep.mubr.bf16.mxu1 %v2252_v23 }
 0x15a   :  { %1270 = vmatmul.mubr.msk.bf16.gmra.mrb[4].mxu0 %vm176_vm2, %v1392_v1  ;;  %1273 = vmatmul.mubr.msk.bf16.gmra.mrb[4].mxu1 %vm176_vm2, %v1392_v1 }
 0x225   :  { %v230_v3 = vpop.f32.mrb[0].mxu0  ;;  %v283_v4 = vpop.f32.mrb[0].mxu1 }
 0x226   :  { %v232_v5 = vpop.f32.mrb[1].mxu0  ;;  %v285_v6 = vpop.f32.mrb[1].mxu1  ;;  %v231_v15 = vadd.f32 %v230_v3, %v149_v2  ;;  %v284_v25 = vadd.f32 %v283_v4, %v149_v2 }
 0x227   :  { %v234_v7 = vpop.f32.mrb[2].mxu0  ;;  %v287_v8 = vpop.f32.mrb[2].mxu1  ;;  %v233_v12 = vadd.f32 %v232_v5, %v149_v2  ;;  %v286_v29 = vadd.f32 %v285_v6, %v149_v2 }
 0x228   :  { %v236_v9 = vpop.f32.mrb[3].mxu0  ;;  %v289_v10 = vpop.f32.mrb[3].mxu1  ;;  %v235_v13 = vadd.f32 %v234_v7, %v154_v11  ;;  %v288_v17 = vadd.f32 %v287_v8, %v154_v11  ;;  %v320_v26 = vmul.f32 %v1555_v14, %v231_v15  ;;  %vm303_vm5 = vcmp.gt.f32.partialorder %v231_v15, 0.0 }
 0x229   :  { %v237_v16 = vadd.f32 %v236_v9, %v154_v11  ;;  %v321_v20 = vmul.f32 %v1555_v14, %v233_v12  ;;  %vm304_vm3 = vcmp.gt.f32.partialorder %v233_v12, 0.0  ;;  %v290_v35 = vadd.f32 %v289_v10, %v154_v11 }
 0x22a   :  { %v324_v21 = vmul.f32 %v1555_v14, %v235_v13  ;;  %vm307_vm4 = vcmp.gt.f32.partialorder %v235_v13, 0.0  ;;  %vm309_vm6 = vcmp.gt.f32.partialorder %v288_v17, 0.0  ;;  %v326_v34 = vmul.f32 %v1555_v14, %v288_v17 }
 0x22b   :  { %v325_v30 = vmul.f32 %v1555_v14, %v237_v16  ;;  %vm308_vm7 = vcmp.gt.f32.partialorder %v237_v16, 0.0  ;;  %v1564_v36 = vsel %vm304_vm3, %v233_v12, %v321_v20  ;;  %v322_v40 = vmul.f32 %v1555_v14, %v284_v25 }
 0x22c   :  { %v1566_v37 = vsel %vm307_vm4, %v235_v13, %v324_v21  ;;  %v1569_v41 = vsel %vm303_vm5, %v231_v15, %v320_v26  ;;  %vm306_vm8 = vcmp.gt.f32.partialorder %v286_v29, 0.0  ;;  %v323_v42 = vmul.f32 %v1555_v14, %v286_v29 }
 0x22d   :  { %v240_v18 = vpop.f32.mrb[4].mxu0  ;;  %v293_v19 = vpop.f32.mrb[4].mxu1  ;;  %v1572_v43 = vsel %vm308_vm7, %v237_v16, %v325_v30  ;;  %vm305_vm9 = vcmp.gt.f32.partialorder %v284_v25, 0.0  ;;  %v377_v44 = vmul.f32 %v1564_v36, %v1564_v36  ;;  %v380_v45 = vmul.f32 %v1566_v37, %v1566_v37 }
 0x22e   :  { %v242_v22 = vpop.f32.mrb[5].mxu0  ;;  %v295_v24 = vpop.f32.mrb[5].mxu1  ;;  %v241_v38 = vadd.f32 %v240_v18, %v159_v33  ;;  %v1579_v47 = vsel %vm309_vm6, %v288_v17, %v326_v34  ;;  %vm310_vm10 = vcmp.gt.f32.partialorder %v290_v35, 0.0  ;;  %v327_v48 = vmul.f32 %v1555_v14, %v290_v35 }
 0x22f   :  { %v244_v27 = vpop.f32.mrb[6].mxu0  ;;  %v297_v28 = vpop.f32.mrb[6].mxu1  ;;  %v243_v39 = vadd.f32 %v242_v22, %v159_v33  ;;  %v352_v51 = vadd.f32 %v1564_v36, %v1569_v41  ;;  %v381_v53 = vmul.f32 %v1572_v43, %v1572_v43  ;;  %v1588_v54 = vsel %vm305_vm9, %v284_v25, %v322_v40 }
 0x230   :  { %v246_v31 = vpop.f32.mrb[7].mxu0  ;;  %v1561_v32 = vpop.f32.mrb[7].mxu1  ;;  %v328_v49 = vmul.f32 %v1555_v14, %v241_v38  ;;  %vm311_vm11 = vcmp.gt.f32.partialorder %v241_v38, 0.0  ;;  %v245_v55 = vadd.f32 %v244_v27, %v164_v52  ;;  %v357_v58 = vadd.f32 %v1572_v43, %v1566_v37 }
 0x231   :  { %v329_v50 = vmul.f32 %v1555_v14, %v243_v39  ;;  %vm312_vm12 = vcmp.gt.f32.partialorder %v243_v39, 0.0  ;;  %v247_v56 = vadd.f32 %v246_v31, %v164_v52  ;;  %v353_v57 = vadd.f32 %v352_v51, %v1588_v54 }
 0x232   :  { %v294_v59 = vadd.f32 %v293_v19, %v159_v33  ;;  %v296_v60 = vadd.f32 %v295_v24, %v159_v33  ;;  %v1594_v61 = vsel %vm306_vm8, %v286_v29, %v323_v42  ;;  %v376_v62 = vmul.f32 %v1569_v41, %v1569_v41 }
 0x233   :  { %v1598_v63 = vsel %vm311_vm11, %v241_v38, %v328_v49  ;;  %v1600_v0 = vsel %vm312_vm12, %v243_v39, %v329_v50  ;;  %v354_v1 = vadd.f32 %v353_v57, %v1594_v61  ;;  %v358_v2 = vadd.f32 %v357_v58, %v1579_v47 }
 0x234   :  { %v1605_v3 = vsel %vm310_vm10, %v290_v35, %v327_v48  ;;  %v378_v4 = vmul.f32 %v1588_v54, %v1588_v54  ;;  %v392_v5 = vadd.f32 %v377_v44, %v376_v62  ;;  %v397_v6 = vadd.f32 %v381_v53, %v380_v45 }
 0x235   :  { %vm315_vm13 = vcmp.gt.f32.partialorder %v245_v55, 0.0  ;;  %v332_v7 = vmul.f32 %v1555_v14, %v245_v55  ;;  %v333_v8 = vmul.f32 %v1555_v14, %v247_v56  ;;  %355 = vadd.xlane.f32.xlu1 %v354_v1  ;;  %v359_v9 = vadd.f32 %v358_v2, %v1605_v3 }
 0x236   :  { %vm316_vm14 = vcmp.gt.f32.partialorder %v247_v56, 0.0  ;;  %v379_v10 = vmul.f32 %v1594_v61, %v1594_v61  ;;  %v393_v11 = vadd.f32 %v392_v5, %v378_v4  ;;  %v382_v12 = vmul.f32 %v1579_v47, %v1579_v47 }
 0x237   :  { %v330_v13 = vmul.f32 %v1555_v14, %v294_v59  ;;  %v298_v15 = vadd.f32 %v297_v28, %v164_v52  ;;  %360 = vadd.xlane.f32.xlu0 %v359_v9  ;;  %vm313_vm15 = vcmp.gt.f32.partialorder %v294_v59, 0.0  ;;  %v362_v18 = vadd.f32 %v1600_v0, %v1598_v63 }
 0x238   :  { %v394_v16 = vadd.f32 %v393_v11, %v379_v10  ;;  %v398_v17 = vadd.f32 %v397_v6, %v382_v12  ;;  %v1620_v19 = vsel %vm315_vm13, %v245_v55, %v332_v7  ;;  %v1622_v20 = vsel %vm316_vm14, %v247_v56, %v333_v8 }
 0x239   :  { %v384_v21 = vmul.f32 %v1598_v63, %v1598_v63  ;;  %vm314_vm0 = vcmp.gt.f32.partialorder %v296_v60, 0.0  ;;  %v331_v22 = vmul.f32 %v1555_v14, %v296_v60  ;;  %v383_v24 = vmul.f32 %v1605_v3, %v1605_v3 }
 0x23a   :  { %395 = vadd.xlane.f32.xlu1 %v394_v16  ;;  %v1629_v25 = vsel %vm313_vm15, %v294_v59, %v330_v13  ;;  %v385_v26 = vmul.f32 %v1600_v0, %v1600_v0  ;;  %v334_v27 = vmul.f32 %v1555_v14, %v298_v15  ;;  %v300_v28 = vadd.f32 %v1561_v32, %v164_v52 }
 0x23b   :  { %vm317_vm1 = vcmp.gt.f32.partialorder %v298_v15, 0.0  ;;  %v399_v29 = vadd.f32 %v398_v17, %v383_v24  ;;  %v363_v30 = vadd.f32 %v362_v18, %v1629_v25  ;;  %v367_v31 = vadd.f32 %v1622_v20, %v1620_v19  ;;  %v428_v24 = vld [vmem:[%s2247_s7] sm:$0xff] }
 0x23c   :  { %v388_v33 = vmul.f32 %v1620_v19, %v1620_v19  ;;  %v1640_v34 = vsel %vm317_vm1, %v298_v15, %v334_v27  ;;  %vm318_vm2 = vcmp.gt.f32.partialorder %v300_v28, 0.0  ;;  %v335_v35 = vmul.f32 %v1555_v14, %v300_v28 }
 0x23d   :  { %v1644_v38 = vsel %vm314_vm0, %v296_v60, %v331_v22  ;;  %v389_v32 = vmul.f32 %v1622_v20, %v1622_v20  ;;  %v368_v40 = vadd.f32 %v367_v31, %v1640_v34  ;;  %v402_v42 = vadd.f32 %v385_v26, %v384_v21 }
 0x23e   :  { %400 = vadd.xlane.f32.xlu1 %v399_v29  ;;  %v364_v39 = vadd.f32 %v363_v30, %v1644_v38  ;;  %v386_v44 = vmul.f32 %v1629_v25, %v1629_v25  ;;  %v1652_v45 = vsel %vm318_vm2, %v300_v28, %v335_v35  ;;  %v387_v50 = vmul.f32 %v1644_v38, %v1644_v38  ;;  %v444_v35 = vld [vmem:[%s2248_s8] sm:$0xff] }
 0x23f   :  { %v369_v48 = vadd.f32 %v368_v40, %v1652_v45  ;;  %v407_v49 = vadd.f32 %v389_v32, %v388_v33  ;;  %v390_v51 = vmul.f32 %v1640_v34, %v1640_v34  ;;  %v391_v55 = vmul.f32 %v1652_v45, %v1652_v45  ;;  %v429_v32 = vld [vmem:[%s2247_s7 + $0x8] sm:$0xff] }
 0x240   :  { %v403_v14 = vadd.f32 %v402_v42, %v386_v44  ;;  %vm584_vm3 = vcmask 138240   ;;  %vm733_vm4 = vcmask 121856   ;;  %vm916_vm5 = vcmask 924672  }
 0x241   :  { %v408_v53 = vadd.f32 %v407_v49, %v390_v51  ;;  %vm692_vm6 = vcmask 130048   ;;  %vm810_vm7 = vcmask 7168   ;;  %vm865_vm8 = vcmask 1039360  }
 0x242   :  { %365 = vadd.xlane.f32.xlu1 %v364_v39  ;;  %v404_v52 = vadd.f32 %v403_v14, %v387_v50  ;;  %v445_v50 = vld [vmem:[%s2248_s8 + $0x8] sm:$0xff]  ;;  %vm965_vm9 = vcmask 916480   ;;  %vm1006_vm10 = vcmask 908288   ;;  %vm1061_vm11 = vcmask 261120  }
 0x243   :  { %v409_v56 = vadd.f32 %v408_v53, %v391_v55  ;;  %v430_v55 = vld [vmem:[%s2247_s7 + $0x10] sm:$0xff] }
 0x246   :  { %370 = vadd.xlane.f32.xlu1 %v369_v48 }
 0x24a   :  { %405 = vadd.xlane.f32.xlu1 %v404_v52 }
 0x24d   :  { %1312 = vrot.lane.b32.xlu0 %v2252_v23, %s1423_s1 }
 0x24e   :  { %410 = vadd.xlane.f32.xlu1 %v409_v56 }
 0x251   :  { %1322 = vrot.lane.b32.xlu0 %v2252_v23, %s1424_s17 }
 0x255   :  { %1332 = vrot.lane.b32.xlu0 %v2252_v23, %s1425_s18 }
 0x259   :  { %1342 = vrot.lane.b32.xlu0 %v2252_v23, %s1426_s19 }
 0x25d   :  { %1357 = vrot.lane.b32.xlu0 %v2252_v23, %s1427_s20 }
 0x25f   :  { %1317 = vrot.lane.b32.xlu1 %v2252_v23, %s1423_s1 }
 0x263   :  { %1327 = vrot.lane.b32.xlu1 %v2252_v23, %s1424_s17 }
 0x267   :  { %1337 = vrot.lane.b32.xlu1 %v2252_v23, %s1425_s18 }
 0x26b   :  { %1347 = vrot.lane.b32.xlu1 %v2252_v23, %s1426_s19 }
 0x26f   :  { %1352 = vrot.lane.b32.xlu1 %v2252_v23, %s1427_s20 }
 0x2c2   :  { %v356_v57 = vpop.xlane.xlu1 %355 }
 0x2c3   :  { %v372_v58 = vmul.f32 0.001953125, %v356_v57 }
 0x2c4   :  { %v361_v59 = vpop.xlane.xlu0 %360 }
 0x2c5   :  { %v416_v62 = vmul.f32 %v372_v58, %v372_v58  ;;  %v373_v1 = vmul.f32 0.001953125, %v361_v59  ;;  %v431_v59 = vld [vmem:[%s2247_s7 + $0x18] sm:$0xff] }
 0x2c7   :  { %v396_v60 = vpop.xlane.xlu1 %395  ;;  %v417_v6 = vmul.f32 %v373_v1, %v373_v1 }
 0x2c8   :  { %v412_v2 = vmul.f32 0.001953125, %v396_v60 }
 0x2ca   :  { %v420_v4 = vsub.f32 %v412_v2, %v416_v62 }
 0x2cb   :  { %v401_v5 = vpop.xlane.xlu1 %400 }
 0x2cc   :  { %v424_v7 = vmax.f32 %v420_v4, 0.0  ;;  %v413_v8 = vmul.f32 0.001953125, %v401_v5  ;;  %v447_v4 = vld [vmem:[%s2248_s8 + $0x18] sm:$0xff] }
 0x2ce   :  { %v432_v9 = vadd.f32 1e-05, %v424_v7  ;;  %v421_v10 = vsub.f32 %v413_v8, %v417_v6  ;;  %v1711_v8 = vpop.permute.xlu0 %1312 }
 0x2cf   :  { %v366_v11 = vpop.xlane.xlu1 %365 }
 0x2d0   :  { %1398 = vrsqrt.f32 %v432_v9  ;;  %v425_v12 = vmax.f32 %v421_v10, 0.0  ;;  %v374_v16 = vmul.f32 0.001953125, %v366_v11 }
 0x2d2   :  { %v433_v13 = vadd.f32 1e-05, %v425_v12  ;;  %v418_v18 = vmul.f32 %v374_v16, %v374_v16  ;;  %v1715_v10 = vpop.permute.xlu0 %1322 }
 0x2d3   :  { %v371_v15 = vpop.xlane.xlu1 %370 }
 0x2d4   :  { %1400 = vrsqrt.f32 %v433_v13  ;;  %v375_v21 = vmul.f32 0.001953125, %v371_v15  ;;  %v1429_v15 = vmov 1966171168  }
 0x2d6   :  { %v419_v30 = vmul.f32 %v375_v21, %v375_v21  ;;  %v1719_v12 = vpop.permute.xlu0 %1332 }
 0x2d7   :  { %v406_v17 = vpop.xlane.xlu1 %405 }
 0x2d8   :  { %v414_v22 = vmul.f32 0.001953125, %v406_v17 }
 0x2da   :  { %v1399_v26 = vpop.eup %1398  ;;  %v422_v27 = vsub.f32 %v414_v22, %v418_v18  ;;  %v1723_v17 = vpop.permute.xlu0 %1342  ;;  %v1274_v22 = vld.sshfl [vmem:[%s2249_s9] sm:$0x33 pattern:$0x75316420]  ;;  %s1430_s9 = smov 112  }
 0x2db   :  { %v411_v28 = vpop.xlane.xlu1 %410  ;;  %v440_v29 = vmul.f32 %v1399_v26, %v428_v24  ;;  %v627_v24 = vcombine.high %v1274_v22, %v1274_v22 }
 0x2dc   :  { %v426_v31 = vmax.f32 %v422_v27, 0.0  ;;  %v415_v33 = vmul.f32 0.001953125, %v411_v28 }
 0x2dd   :  { %458 = vperm.xlu1 %1309, %v440_v29   ;;  %v448_v39 = vmul.f32 %v440_v29, %v372_v58  ;;  %v446_v58 = vld [vmem:[%s2248_s8 + $0x10] sm:$0xff] }
 0x2de   :  { %v1401_v40 = vpop.eup %1400  ;;  %v434_v42 = vadd.f32 1e-05, %v426_v31  ;;  %v423_v44 = vsub.f32 %v415_v33, %v419_v30  ;;  %v1731_v27 = vpop.permute.xlu0 %1357 }
 0x2df   :  { %v452_v48 = vsub.f32 %v444_v35, %v448_v39  ;;  %v441_v14 = vmul.f32 %v1401_v40, %v429_v32  ;;  %v1709_v7 = vpop.permute.xlu1 %1317 }
 0x2e0   :  { %1402 = vrsqrt.f32 %v434_v42  ;;  %v427_v49 = vmax.f32 %v423_v44, 0.0 }
 0x2e1   :  { %494 = vperm.xlu1 %1309, %v452_v48   ;;  %463 = vperm.xlu0 %1310, %v441_v14   ;;  %v449_v51 = vmul.f32 %v441_v14, %v373_v1 }
 0x2e2   :  { %v435_v52 = vadd.f32 1e-05, %v427_v49 }
 0x2e3   :  { %v453_v53 = vsub.f32 %v445_v50, %v449_v51  ;;  %v1713_v9 = vpop.permute.xlu1 %1327 }
 0x2e4   :  { %1404 = vrsqrt.f32 %v435_v52 }
 0x2e5   :  { %499 = vperm.xlu1 %1309, %v453_v53  }
 0x2e7   :  { %v1717_v11 = vpop.permute.xlu1 %1337 }
 0x2ea   :  { %v1403_v56 = vpop.eup %1402 }
 0x2eb   :  { %v442_v57 = vmul.f32 %v1403_v56, %v430_v55  ;;  %v1721_v13 = vpop.permute.xlu1 %1347 }
 0x2ed   :  { %468 = vperm.xlu0 %1310, %v442_v57   ;;  %v450_v60 = vmul.f32 %v442_v57, %v374_v16  ;;  %v629_v16 = vunpack.c.l.s4 %v1429_v15 }
 0x2ee   :  { %v1405_v62 = vpop.eup %1404 }
 0x2ef   :  { %v454_v1 = vsub.f32 %v446_v58, %v450_v60  ;;  %v443_v2 = vmul.f32 %v1405_v62, %v431_v59  ;;  %v630_v18 = vunpack.c.0.s8 %v629_v16 }
 0x2f1   :  { %504 = vperm.xlu0 %1310, %v454_v1   ;;  %473 = vperm.xlu1 %1309, %v443_v2   ;;  %v451_v5 = vmul.f32 %v443_v2, %v375_v21  ;;  %v1725_v21 = vpop.permute.xlu1 %1352  ;;  %v633_v26 = vsub.s32 %v630_v18, %v1542_v46 }
 0x2f3   :  { %v455_v6 = vsub.f32 %v447_v4, %v451_v5  ;;  %v1733_v29 = vrot.slane %v1274_v22, %v633_v26  ;;  %v1735_v30 = vrot.slane %v627_v24, %v633_v26 }
 0x2f5   :  { %509 = vperm.xlu1 %1309, %v455_v6   ;;  %1367 = vrot.lane.b32.xlu0 %v2252_v23, %s1428_s13  ;;  %v1739_v35 = vcombine.high %v1733_v29, %v1733_v29  ;;  %v762_v32 = vshrl.u32 %v1733_v29, 16  ;;  %v769_v39 = vshrl.u32 %v1735_v30, 16  ;;  %v1749_v14 = vcombine.high %v1735_v30, %v1735_v30 }
 0x2f7   :  { %v776_v49 = vshrl.u32 %v1739_v35, 16  ;;  %v770_v57 = vpack.i.b16 %v769_v39, %v769_v39 }
 0x2f9   :  { %1362 = vrot.lane.b32.xlu1 %v2252_v23, %s1428_s13 }
 0x35c   :  { %v459_v28 = vpop.permute.xlu1 %458 }
 0x35d   :  { %v476_v40 = vmul.f32 %v459_v28, %v1569_v41  ;;  %v477_v42 = vmul.f32 %v459_v28, %v1564_v36  ;;  %v763_v41 = vpack.i.b16 %v762_v32, %v762_v32  ;;  %v783_v36 = vshrl.u32 %v1749_v14, 16 }
 0x35e   :  { %v478_v62 = vmul.f32 %v459_v28, %v1588_v54 }
 0x35f   :  { %v784_v4 = vpack.i.b16 %v783_v36, %v783_v36  ;;  %v666_v36 = vpack.i.b16 %v1749_v14, %v1749_v14 }
 0x360   :  { %v495_v31 = vpop.permute.xlu1 %494  ;;  %v464_v33 = vpop.permute.xlu0 %463 }
 0x361   :  { %v480_v44 = vmul.f32 %v464_v33, %v1566_v37  ;;  %v481_v48 = vmul.f32 %v464_v33, %v1572_v43  ;;  %v512_v50 = vadd.f32 %v495_v31, %v476_v40  ;;  %v513_v52 = vadd.f32 %v495_v31, %v477_v42 }
 0x362   :  { %v483_v53 = vmul.f32 %v464_v33, %v1605_v3  ;;  %v482_v37 = vmul.f32 %v464_v33, %v1579_v47  ;;  %v479_v43 = vmul.f32 %v459_v28, %v1594_v61  ;;  %v1762_v3 = vsub.s32 0, %v1542_v46 }
 0x363   :  { %v777_v47 = vpack.i.b16 %v776_v49, %v776_v49  ;;  %v514_v61 = vadd.f32 %v495_v31, %v478_v62 }
 0x364   :  { %v500_v51 = vpop.permute.xlu1 %499  ;;  %v515_v2 = vadd.f32 %v495_v31, %v479_v43  ;;  %v1771_v6 = vrot.slane %v763_v41, %v1762_v3  ;;  %v1774_v54 = vrot.slane %v770_v57, %v1762_v3  ;;  %v1786_v16 = vrot.slane %v784_v4, %v1762_v3 }
 0x365   :  { %v516_v55 = vadd.f32 %v500_v51, %v480_v44  ;;  %v517_v56 = vadd.f32 %v500_v51, %v481_v48  ;;  %v519_v58 = vadd.f32 %v500_v51, %v483_v53  ;;  %v518_v1 = vadd.f32 %v500_v51, %v482_v37 }
 0x366   :  { %v1783_v15 = vrot.slane %v777_v47, %v1762_v3  ;;  %v659_v57 = vpack.i.b16 %v1739_v35, %v1739_v35  ;;  %v1314_v37 = vunpack.i.l.bf16 %v1711_v8  ;;  %v1315_v4 = vunpack.i.h.bf16 %v1711_v8 }
 0x367   :  { %v1756_v59 = vpack.c.bf16 %v516_v55, %v512_v50  ;;  %v1758_v60 = vpack.c.bf16 %v517_v56, %v513_v52  ;;  %v1768_v5 = vpack.c.bf16 %v519_v58, %v515_v2  ;;  %v1776_v46 = vpack.c.bf16 %v518_v1, %v514_v61 }
 0x368   :  { %v1947_v47 = vrot.slane %v659_v57, %v1762_v3  ;;  %v1950_v61 = vrot.slane %v666_v36, %v1762_v3 }
 0x369   :  { %576 = vrot.lane.b32.xlu1 %v1758_v60, %s1423_s1  ;;  %574 = vrot.lane.b32.xlu0 %v1756_v59, %s1423_s1 }
 0x36c   :  { %v469_v22 = vpop.permute.xlu0 %468 }
 0x36d   :  { %603 = vrot.lane.b32.xlu1 %v1768_v5, %s1423_s1  ;;  %601 = vrot.lane.b32.xlu0 %v1776_v46, %s1423_s1  ;;  %v484_v31 = vmul.f32 %v469_v22, %v1598_v63  ;;  %v487_v51 = vmul.f32 %v469_v22, %v1644_v38  ;;  %v645_v38 = vpack.i.b16 %v1733_v29, %v1733_v29 }
 0x36f   :  { %v1919_v41 = vrot.slane %v645_v38, %v1762_v3 }
 0x370   :  { %v474_v18 = vpop.permute.xlu1 %473  ;;  %v505_v28 = vpop.permute.xlu0 %504 }
 0x371   :  { %684 = vrot.lane.b32.xlu1 %v1758_v60, %s1424_s17  ;;  %682 = vrot.lane.b32.xlu0 %v1756_v59, %s1424_s17  ;;  %v488_v26 = vmul.f32 %v474_v18, %v1620_v19  ;;  %v490_v32 = vmul.f32 %v474_v18, %v1640_v34  ;;  %v520_v39 = vadd.f32 %v505_v28, %v484_v31 }
 0x372   :  { %v486_v19 = vmul.f32 %v469_v22, %v1629_v25  ;;  %v489_v25 = vmul.f32 %v474_v18, %v1622_v20  ;;  %v485_v34 = vmul.f32 %v469_v22, %v1600_v0  ;;  %v491_v49 = vmul.f32 %v474_v18, %v1652_v45 }
 0x373   :  { %v523_v20 = vadd.f32 %v505_v28, %v487_v51  ;;  %v652_v45 = vpack.i.b16 %v1735_v30, %v1735_v30  ;;  %v1927_v30 = vld [vmem:[%s2245_s5] sm:$0xff] }
 0x374   :  { %v510_v24 = vpop.permute.xlu1 %509  ;;  %v522_v44 = vadd.f32 %v505_v28, %v486_v19  ;;  %v521_v50 = vadd.f32 %v505_v28, %v485_v34  ;;  %v1912_v56 = vpop.permute.xlu0 %1367  ;;  %2255 = vst [vmem:[#allocation6_spill] sm:$0xff] %v1927_v30  ;;  %v1276_v43 = vcombine.high %v1927_v30, %v1927_v30  ;;  %v1335_v34 = vunpack.i.h.bf16 %v1719_v12 }
 0x375   :  { %705 = vrot.lane.b32.xlu1 %v1768_v5, %s1424_s17  ;;  %703 = vrot.lane.b32.xlu0 %v1776_v46, %s1424_s17  ;;  %v524_v33 = vadd.f32 %v510_v24, %v488_v26  ;;  %v526_v40 = vadd.f32 %v510_v24, %v490_v32  ;;  %v525_v48 = vadd.f32 %v510_v24, %v489_v25 }
 0x376   :  { %v527_v52 = vadd.f32 %v510_v24, %v491_v49  ;;  %v1922_v29 = vrot.slane %v652_v45, %v1762_v3  ;;  %1097 = vmatprep.mubr.bf16.mxu0 %v1276_v43  ;;  %1179 = vmatprep.mubr.bf16.mxu1 %v1276_v43  ;;  %v1045_v49 = vld [vmem:[%s2246_s6] sm:$0xff] }
 0x377   :  { %v1824_v42 = vpack.c.bf16 %v524_v33, %v520_v39  ;;  %v1830_v63 = vpack.c.bf16 %v526_v40, %v522_v44  ;;  %v1848_v53 = vpack.c.bf16 %v525_v48, %v521_v50  ;;  %v1334_v39 = vunpack.i.l.bf16 %v1719_v12 }
 0x378   :  { %v1854_v0 = vpack.c.bf16 %v527_v52, %v523_v20  ;;  %v1910_v55 = vpop.permute.xlu1 %1362  ;;  %v1340_v52 = vunpack.i.h.bf16 %v1717_v11 }
 0x379   :  { %725 = vrot.lane.b32.xlu1 %v1758_v60, %s1425_s18  ;;  %723 = vrot.lane.b32.xlu0 %v1756_v59, %s1425_s18 }
 0x37d   :  { %746 = vrot.lane.b32.xlu1 %v1768_v5, %s1425_s18  ;;  %744 = vrot.lane.b32.xlu0 %v1776_v46, %s1425_s18 }
 0x381   :  { %802 = vrot.lane.b32.xlu1 %v1758_v60, %s1426_s19  ;;  %800 = vrot.lane.b32.xlu0 %v1756_v59, %s1426_s19 }
 0x385   :  { %823 = vrot.lane.b32.xlu1 %v1768_v5, %s1426_s19  ;;  %821 = vrot.lane.b32.xlu0 %v1776_v46, %s1426_s19 }
 0x389   :  { %853 = vrot.lane.b32.xlu1 %v1756_v59, %s1427_s20  ;;  %855 = vrot.lane.b32.xlu0 %v1758_v60, %s1427_s20 }
 0x38d   :  { %904 = vrot.lane.b32.xlu1 %v1756_v59, %s1428_s13  ;;  %878 = vrot.lane.b32.xlu0 %v1768_v5, %s1427_s20 }
 0x391   :  { %580 = vrot.lane.b32.xlu1 %v1824_v42, %s1423_s1  ;;  %876 = vrot.lane.b32.xlu0 %v1776_v46, %s1427_s20 }
 0x395   :  { %607 = vrot.lane.b32.xlu1 %v1830_v63, %s1423_s1  ;;  %906 = vrot.lane.b32.xlu0 %v1758_v60, %s1428_s13 }
 0x399   :  { %688 = vrot.lane.b32.xlu1 %v1824_v42, %s1424_s17  ;;  %927 = vrot.lane.b32.xlu0 %v1768_v5, %s1428_s13 }
 0x39d   :  { %709 = vrot.lane.b32.xlu1 %v1830_v63, %s1424_s17  ;;  %925 = vrot.lane.b32.xlu0 %v1776_v46, %s1428_s13 }
 0x3a1   :  { %729 = vrot.lane.b32.xlu1 %v1824_v42, %s1425_s18  ;;  %582 = vrot.lane.b32.xlu0 %v1848_v53, %s1423_s1 }
 0x3a5   :  { %750 = vrot.lane.b32.xlu1 %v1830_v63, %s1425_s18  ;;  %609 = vrot.lane.b32.xlu0 %v1854_v0, %s1423_s1 }
 0x3a9   :  { %806 = vrot.lane.b32.xlu1 %v1824_v42, %s1426_s19  ;;  %690 = vrot.lane.b32.xlu0 %v1848_v53, %s1424_s17 }
 0x3ad   :  { %827 = vrot.lane.b32.xlu1 %v1830_v63, %s1426_s19  ;;  %711 = vrot.lane.b32.xlu0 %v1854_v0, %s1424_s17 }
 0x3b1   :  { %1372 = vrot.lane.b32.xlu1 %v2252_v23, %s1430_s9  ;;  %731 = vrot.lane.b32.xlu0 %v1848_v53, %s1425_s18 }
 0x3b5   :  { %953 = vrot.lane.b32.xlu1 %v1756_v59, %s1430_s9  ;;  %752 = vrot.lane.b32.xlu0 %v1854_v0, %s1425_s18 }
 0x3b9   :  { %861 = vrot.lane.b32.xlu1 %v1848_v53, %s1427_s20  ;;  %808 = vrot.lane.b32.xlu0 %v1848_v53, %s1426_s19 }
 0x3bd   :  { %884 = vrot.lane.b32.xlu1 %v1854_v0, %s1427_s20  ;;  %829 = vrot.lane.b32.xlu0 %v1854_v0, %s1426_s19  ;;  %s1280_s19 = sld [smem:[#allocation3 + $0x1]] }
 0x3c1   :  { %1382 = vrot.lane.b32.xlu1 %v2252_v23, %s1431_s14  ;;  %955 = vrot.lane.b32.xlu0 %v1758_v60, %s1430_s9 }
 0x3c5   :  { %882 = vrot.lane.b32.xlu1 %v1830_v63, %s1427_s20  ;;  %976 = vrot.lane.b32.xlu0 %v1768_v5, %s1430_s9 }
 0x3c9   :  { %912 = vrot.lane.b32.xlu1 %v1848_v53, %s1428_s13  ;;  %974 = vrot.lane.b32.xlu0 %v1776_v46, %s1430_s9 }
 0x3cd   :  { %933 = vrot.lane.b32.xlu1 %v1854_v0, %s1428_s13  ;;  %1377 = vrot.lane.b32.xlu0 %v2252_v23, %s1430_s9 }
 0x3d1   :  { %994 = vrot.lane.b32.xlu1 %v1756_v59, %s1431_s14  ;;  %859 = vrot.lane.b32.xlu0 %v1824_v42, %s1427_s20 }
 0x3d5   :  { %931 = vrot.lane.b32.xlu1 %v1830_v63, %s1428_s13  ;;  %996 = vrot.lane.b32.xlu0 %v1758_v60, %s1431_s14 }
 0x3d9   :  { %961 = vrot.lane.b32.xlu1 %v1848_v53, %s1430_s9  ;;  %910 = vrot.lane.b32.xlu0 %v1824_v42, %s1428_s13 }
 0x3db   :  { %v577_v58 = vpop.permute.xlu1 %576  ;;  %v575_v62 = vpop.permute.xlu0 %574 }
 0x3dc   :  { %v585_v1 = vsel %vm584_vm3, %v1314_v37, %v575_v62  ;;  %v586_v2 = vsel %vm584_vm3, %v575_v62, %v577_v58 }
 0x3dd   :  { %v672_v35 = vmul.bf16 %v1919_v41, %v585_v1  ;;  %v673_v14 = vmul.bf16 %v1922_v29, %v586_v2  ;;  %982 = vrot.lane.b32.xlu1 %v1854_v0, %s1430_s9  ;;  %1017 = vrot.lane.b32.xlu0 %v1768_v5, %s1431_s14 }
 0x3df   :  { %v604_v18 = vpop.permute.xlu1 %603  ;;  %1065 = vmatprep.subr.bf16.mxu0 %v673_v14  ;;  %v602_v22 = vpop.permute.xlu0 %601 }
 0x3e0   :  { %1066 = vmatpush1.bf16.msra.mxu0 %v672_v35  ;;  %v611_v24 = vsel %vm584_vm3, %v1315_v4, %v602_v22  ;;  %v612_v26 = vsel %vm584_vm3, %v602_v22, %v604_v18 }
 0x3e1   :  { %980 = vrot.lane.b32.xlu1 %v1830_v63, %s1430_s9  ;;  %v674_v28 = vmul.bf16 %v1947_v47, %v611_v24  ;;  %v675_v31 = vmul.bf16 %v1950_v61, %v612_v26  ;;  %959 = vrot.lane.b32.xlu0 %v1824_v42, %s1430_s9  ;;  %v1319_v24 = vunpack.i.l.bf16 %v1709_v7  ;;  %v1339_v26 = vunpack.i.l.bf16 %v1717_v11 }
 0x3e3   :  { %v1961_v3 = vpop.permute.xlu1 %684  ;;  %1147 = vmatprep.subr.bf16.mxu1 %v675_v31  ;;  %v1963_v8 = vpop.permute.xlu0 %682 }
 0x3e4   :  { %1148 = vmatpush1.bf16.msra.mxu1 %v674_v28  ;;  %v694_v11 = vsel %vm692_vm6, %v1963_v8, %v1961_v3 }
 0x3e5   :  { %1002 = vrot.lane.b32.xlu1 %v1848_v53, %s1431_s14  ;;  %1015 = vrot.lane.b32.xlu0 %v1776_v46, %s1431_s14 }
 0x3e7   :  { %v1969_v33 = vpop.permute.xlu1 %705  ;;  %v1971_v32 = vpop.permute.xlu0 %703 }
 0x3e8   :  { %v714_v3 = vsel %vm692_vm6, %v1971_v32, %v1969_v33 }
 0x3e9   :  { %1023 = vrot.lane.b32.xlu1 %v1854_v0, %s1431_s14  ;;  %1387 = vrot.lane.b32.xlu0 %v2252_v23, %s1431_s14  ;;  %v1320_v23 = vunpack.i.h.bf16 %v1709_v7 }
 0x3eb   :  { %v726_v19 = vpop.permute.xlu1 %725  ;;  %v724_v40 = vpop.permute.xlu0 %723 }
 0x3ec   :  { %v1979_v44 = vsel %vm733_vm4, %v1334_v39, %v724_v40 }
 0x3ed   :  { %1021 = vrot.lane.b32.xlu1 %v1830_v63, %s1431_s14  ;;  %1000 = vrot.lane.b32.xlu0 %v1824_v42, %s1431_s14 }
 0x3ef   :  { %v1988_v48 = vpop.permute.xlu1 %746  ;;  %v1993_v50 = vpop.permute.xlu0 %744 }
 0x3f0   :  { %v1997_v51 = vsel %vm733_vm4, %v1335_v34, %v1993_v50 }
 0x3f1   :  { %1048 = vperm.xlu0 %1310, %v1045_v49  }
 0x3f3   :  { %v2001_v20 = vpop.permute.xlu1 %802  ;;  %v2003_v38 = vpop.permute.xlu0 %800 }
 0x3f7   :  { %v2005_v12 = vpop.permute.xlu1 %823  ;;  %v2007_v45 = vpop.permute.xlu0 %821 }
 0x3fb   :  { %v2009_v57 = vpop.permute.xlu1 %853  ;;  %v2011_v36 = vpop.permute.xlu0 %855 }
 0x3ff   :  { %v905_v37 = vpop.permute.xlu1 %904  ;;  %v2013_v43 = vpop.permute.xlu0 %878 }
 0x403   :  { %v581_v58 = vpop.permute.xlu1 %580  ;;  %v2015_v62 = vpop.permute.xlu0 %876 }
 0x404   :  { %v587_v31 = vsel %vm584_vm3, %v1319_v24, %v581_v58 }
 0x405   :  { %v676_v30 = vmul.bf16 %v1919_v41, %v587_v31  ;;  %v1324_v31 = vunpack.i.l.bf16 %v1715_v10 }
 0x407   :  { %v608_v1 = vpop.permute.xlu1 %607  ;;  %v2017_v2 = vpop.permute.xlu0 %906 }
 0x408   :  { %v2021_v35 = vsel %vm916_vm5, %v905_v37, %v2017_v2  ;;  %v613_v24 = vsel %vm584_vm3, %v1320_v23, %v608_v1 }
 0x409   :  { %2256 = vst [vmem:[#allocation7_spill] sm:$0xff] %v2021_v35  ;;  %v678_v23 = vmul.bf16 %v1947_v47, %v613_v24  ;;  %v1325_v24 = vunpack.i.h.bf16 %v1715_v10  ;;  %v1330_v10 = vunpack.i.h.bf16 %v1713_v9 }
 0x40b   :  { %v689_v14 = vpop.permute.xlu1 %688  ;;  %v2023_v4 = vpop.permute.xlu0 %927 }
 0x40f   :  { %v710_v18 = vpop.permute.xlu1 %709  ;;  %v2025_v22 = vpop.permute.xlu0 %925 }
 0x410   :  { %2257 = vst [vmem:[#allocation8_spill] sm:$0xff] %v2025_v22 }
 0x413   :  { %v730_v28 = vpop.permute.xlu1 %729  ;;  %v583_v34 = vpop.permute.xlu0 %582 }
 0x414   :  { %v2031_v39 = vsel %vm733_vm4, %v1339_v26, %v730_v28  ;;  %v588_v37 = vsel %vm584_vm3, %v581_v58, %v583_v34 }
 0x415   :  { %v794_v49 = vmul.bf16 %v1771_v6, %v2031_v39  ;;  %v677_v25 = vmul.bf16 %v1922_v29, %v588_v37 }
 0x417   :  { %v751_v35 = vpop.permute.xlu1 %750  ;;  %v610_v22 = vpop.permute.xlu0 %609  ;;  %1067 = vmatprep.subr.bf16.mxu0 %v677_v25  ;;  %v693_v25 = vsel %vm692_vm6, %v1324_v31, %v1963_v8  ;;  %v713_v8 = vsel %vm692_vm6, %v1325_v24, %v1971_v32  ;;  %v755_v31 = vsel %vm733_vm4, %v1993_v50, %v1988_v48  ;;  %v812_v48 = vsel %vm810_vm7, %v2003_v38, %v2001_v20 }
 0x418   :  { %v2042_v26 = vsel %vm733_vm4, %v1340_v52, %v751_v35  ;;  %v614_v7 = vsel %vm584_vm3, %v608_v1, %v610_v22  ;;  %1068 = vmatpush1.bf16.msra.mxu0 %v676_v30  ;;  %v735_v1 = vsel %vm733_vm4, %v724_v40, %v726_v19  ;;  %v1329_v22 = vunpack.i.l.bf16 %v1713_v9 }
 0x419   :  { %v796_v58 = vmul.bf16 %v1783_v15, %v2042_v26  ;;  %v679_v34 = vmul.bf16 %v1950_v61, %v614_v7  ;;  %1069 = vmatprep.subr.bf16.mxu0 %v694_v11  ;;  %v791_v19 = vmul.bf16 %v1774_v54, %v735_v1  ;;  %v793_v32 = vmul.bf16 %v1786_v16, %v755_v31 }
 0x41a   :  { %v695_v40 = vsel %vm692_vm6, %v1329_v22, %v689_v14  ;;  %v1344_v9 = vunpack.i.l.bf16 %v1723_v17  ;;  %v1345_v22 = vunpack.i.h.bf16 %v1723_v17  ;;  %v1350_v17 = vunpack.i.h.bf16 %v1721_v13 }
 0x41b   :  { %v807_v52 = vpop.permute.xlu1 %806  ;;  %v691_v37 = vpop.permute.xlu0 %690  ;;  %1149 = vmatprep.subr.bf16.mxu1 %v679_v34 }
 0x41c   :  { %1070 = vmatpush1.bf16.msra.mxu0 %v693_v25  ;;  %1150 = vmatpush1.bf16.msra.mxu1 %v678_v23  ;;  %v696_v30 = vsel %vm692_vm6, %v689_v14, %v691_v37  ;;  %v715_v14 = vsel %vm692_vm6, %v1330_v10, %v710_v18  ;;  %v2258_v25 = vmul.bf16 %v1771_v6, %v1979_v44 }
 0x41d   :  { %1071 = vmatprep.subr.bf16.mxu0 %v696_v30  ;;  %1151 = vmatprep.subr.bf16.mxu1 %v714_v3  ;;  %v840_v30 = vmul.bf16 %v812_v48, %v1922_v29  ;;  %v832_v44 = vsel %vm810_vm7, %v2007_v45, %v2005_v12  ;;  %v2259_v3 = vmul.bf16 %v1783_v15, %v1997_v51 }
 0x41e   :  { %v842_v39 = vmul.bf16 %v832_v44, %v1950_v61 }
 0x41f   :  { %v828_v7 = vpop.permute.xlu1 %827  ;;  %v712_v11 = vpop.permute.xlu0 %711 }
 0x420   :  { %1072 = vmatpush1.bf16.msra.mxu0 %v695_v40  ;;  %1152 = vmatpush1.bf16.msra.mxu1 %v713_v8  ;;  %v716_v33 = vsel %vm692_vm6, %v710_v18, %v712_v11  ;;  %v811_v18 = vsel %vm810_vm7, %v1344_v9, %v2003_v38  ;;  %v1349_v38 = vunpack.i.l.bf16 %v1721_v13  ;;  %v1354_v13 = vunpack.i.l.bf16 %v1725_v21 }
 0x421   :  { %1073 = vmatprep.subr.bf16.mxu0 %v791_v19  ;;  %1153 = vmatprep.subr.bf16.mxu1 %v716_v33  ;;  %v839_v8 = vmul.bf16 %v811_v18, %v1919_v41  ;;  %v833_v33 = vsel %vm810_vm7, %v1350_v17, %v828_v7 }
 0x423   :  { %v2071_v34 = vpop.permute.xlu1 %1372  ;;  %v732_v23 = vpop.permute.xlu0 %731 }
 0x424   :  { %v737_v50 = vsel %vm733_vm4, %v730_v28, %v732_v23  ;;  %1074 = vmatpush1.bf16.msra.mxu0 %v2258_v25  ;;  %1154 = vmatpush1.bf16.msra.mxu1 %v715_v14  ;;  %v867_v23 = vsel %vm865_vm8, %v2011_v36, %v1354_v13 }
 0x425   :  { %v795_v37 = vmul.bf16 %v1774_v54, %v737_v50  ;;  %1155 = vmatprep.subr.bf16.mxu1 %v793_v32  ;;  %v866_v50 = vsel %vm865_vm8, %v2009_v57, %v2011_v36  ;;  %v897_v25 = vmul.bf16 %v867_v23, %v1774_v54 }
 0x427   :  { %v2084_v1 = vpop.permute.xlu1 %953  ;;  %v753_v20 = vpop.permute.xlu0 %752  ;;  %1075 = vmatprep.subr.bf16.mxu0 %v795_v37  ;;  %v888_v37 = vsel %vm865_vm8, %v2015_v62, %v2013_v43 }
 0x428   :  { %v757_v28 = vsel %vm733_vm4, %v751_v35, %v753_v20  ;;  %1076 = vmatpush1.bf16.msra.mxu0 %v794_v49  ;;  %1156 = vmatpush1.bf16.msra.mxu1 %v2259_v3  ;;  %v831_v35 = vsel %vm810_vm7, %v1345_v22, %v2007_v45  ;;  %v813_v49 = vsel %vm810_vm7, %v1349_v38, %v807_v52 }
 0x429   :  { %v797_v24 = vmul.bf16 %v1786_v16, %v757_v28  ;;  %1077 = vmatprep.subr.bf16.mxu0 %v840_v30  ;;  %v841_v45 = vmul.bf16 %v831_v35, %v1947_v47  ;;  %v843_v11 = vmul.bf16 %v813_v49, %v1919_v41  ;;  %v1364_v28 = vunpack.i.l.bf16 %v1910_v55 }
 0x42b   :  { %v2103_v12 = vpop.permute.xlu1 %861  ;;  %v809_v51 = vpop.permute.xlu0 %808  ;;  %1157 = vmatprep.subr.bf16.mxu1 %v797_v24  ;;  %v918_v22 = vsel %vm916_vm5, %v2017_v2, %v1364_v28 }
 0x42c   :  { %v814_v19 = vsel %vm810_vm7, %v807_v52, %v809_v51  ;;  %1078 = vmatpush1.bf16.msra.mxu0 %v839_v8  ;;  %1158 = vmatpush1.bf16.msra.mxu1 %v796_v58  ;;  %v845_v58 = vmul.bf16 %v833_v33, %v1947_v47  ;;  %v2260_v8 = vld [vmem:[#allocation8_spill] sm:$0xff]  ;;  %v1369_v51 = vunpack.i.l.bf16 %v1912_v56  ;;  %v946_v2 = vmul.bf16 %v918_v22, %v1922_v29 }
 0x42d   :  { %v844_v40 = vmul.bf16 %v814_v19, %v1922_v29  ;;  %1159 = vmatprep.subr.bf16.mxu1 %v842_v39  ;;  %v937_v35 = vsel %vm916_vm5, %v2260_v8, %v2023_v4 }
 0x42e   :  { %v947_v17 = vmul.bf16 %v937_v35, %v1947_v47 }
 0x42f   :  { %v885_v31 = vpop.permute.xlu1 %884  ;;  %v830_v10 = vpop.permute.xlu0 %829  ;;  %1079 = vmatprep.subr.bf16.mxu0 %v844_v40 }
 0x430   :  { %v834_v52 = vsel %vm810_vm7, %v828_v7, %v830_v10  ;;  %1080 = vmatpush1.bf16.msra.mxu0 %v843_v11  ;;  %1160 = vmatpush1.bf16.msra.mxu1 %v841_v45  ;;  %v1359_v7 = vunpack.i.l.bf16 %v1731_v27  ;;  %v1375_v10 = vunpack.i.h.bf16 %v2071_v34 }
 0x431   :  { %v846_v26 = vmul.bf16 %v834_v52, %v1950_v61  ;;  %1081 = vmatprep.subr.bf16.mxu0 %v1758_v60  ;;  %v1355_v60 = vunpack.i.h.bf16 %v1725_v21  ;;  %v1360_v21 = vunpack.i.h.bf16 %v1731_v27  ;;  %v1365_v27 = vunpack.i.h.bf16 %v1910_v55 }
 0x433   :  { %v2123_v32 = vpop.permute.xlu1 %1382  ;;  %v2125_v14 = vpop.permute.xlu0 %955  ;;  %1161 = vmatprep.subr.bf16.mxu1 %v846_v26  ;;  %v938_v62 = vsel %vm916_vm5, %v2023_v4, %v1365_v27 }
 0x434   :  { %1082 = vmatpush1.bf16.msra.mxu0 %v1756_v59  ;;  %1162 = vmatpush1.bf16.msra.mxu1 %v845_v58  ;;  %v889_v59 = vsel %vm865_vm8, %v2013_v43, %v1355_v60  ;;  %v948_v24 = vmul.bf16 %v938_v62, %v1950_v61  ;;  %v1374_v58 = vunpack.i.l.bf16 %v2071_v34 }
 0x435   :  { %1083 = vmatprep.subr.bf16.mxu0 %v1848_v53  ;;  %1163 = vmatprep.subr.bf16.mxu1 %v1768_v5  ;;  %v869_v53 = vsel %vm865_vm8, %v2103_v12, %v1359_v7  ;;  %v896_v5 = vmul.bf16 %v866_v50, %v1771_v6  ;;  %v899_v36 = vmul.bf16 %v889_v59, %v1786_v16 }
 0x436   :  { %v901_v18 = vmul.bf16 %v869_v53, %v1774_v54 }
 0x437   :  { %v883_v48 = vpop.permute.xlu1 %882  ;;  %v2138_v9 = vpop.permute.xlu0 %976 }
 0x438   :  { %1084 = vmatpush1.bf16.msra.mxu0 %v1824_v42  ;;  %1164 = vmatpush1.bf16.msra.mxu1 %v1776_v46  ;;  %v891_v42 = vsel %vm865_vm8, %v885_v31, %v1360_v21  ;;  %v898_v46 = vmul.bf16 %v888_v37, %v1783_v15  ;;  %v890_v44 = vsel %vm865_vm8, %v883_v48, %v885_v31 }
 0x439   :  { %1085 = vmatprep.subr.bf16.mxu0 %v897_v25  ;;  %1165 = vmatprep.subr.bf16.mxu1 %v1854_v0  ;;  %v903_v20 = vmul.bf16 %v891_v42, %v1786_v16  ;;  %v902_v3 = vmul.bf16 %v890_v44, %v1783_v15  ;;  %v967_v25 = vsel %vm965_vm9, %v2125_v14, %v1374_v58 }
 0x43b   :  { %v913_v57 = vpop.permute.xlu1 %912  ;;  %v975_v30 = vpop.permute.xlu0 %974 }
 0x43c   :  { %1086 = vmatpush1.bf16.msra.mxu0 %v896_v5  ;;  %1166 = vmatpush1.bf16.msra.mxu1 %v1830_v63  ;;  %v1370_v63 = vunpack.i.h.bf16 %v1912_v56  ;;  %v920_v45 = vsel %vm916_vm5, %v913_v57, %v1369_v51  ;;  %v2261_v56 = vld [vmem:[#allocation7_spill] sm:$0xff]  ;;  %v986_v48 = vsel %vm965_vm9, %v975_v30, %v2138_v9  ;;  %v2262_v5 = vld [vmem:[#allocation6_spill] sm:$0xff] }
 0x43d   :  { %1087 = vmatprep.subr.bf16.mxu0 %v901_v18  ;;  %1167 = vmatprep.subr.bf16.mxu1 %v899_v36  ;;  %v945_v33 = vmul.bf16 %v2261_v56, %v1919_v41  ;;  %v950_v52 = vmul.bf16 %v920_v45, %v1922_v29  ;;  %v1385_v29 = vunpack.i.h.bf16 %v2123_v32 }
 0x43f   :  { %v934_v0 = vpop.permute.xlu1 %933  ;;  %v2160_v43 = vpop.permute.xlu0 %1377 }
 0x440   :  { %1168 = vmatpush1.bf16.msra.mxu1 %v898_v46  ;;  %v940_v49 = vsel %vm916_vm5, %v934_v0, %v1370_v63  ;;  %v1380_v23 = vunpack.i.h.bf16 %v2160_v43  ;;  %v1379_v53 = vunpack.i.l.bf16 %v2160_v43 }
 0x441   :  { %1169 = vmatprep.subr.bf16.mxu1 %v903_v20  ;;  %v952_v4 = vmul.bf16 %v940_v49, %v1950_v61  ;;  %v2263_v20 = vmov 0  }
 0x443   :  { %v2167_v38 = vpop.permute.xlu1 %994  ;;  %v860_v39 = vpop.permute.xlu0 %859 }
 0x444   :  { %v868_v55 = vsel %vm865_vm8, %v860_v39, %v2103_v12  ;;  %1170 = vmatpush1.bf16.msra.mxu1 %v902_v3 }
 0x445   :  { %v900_v19 = vmul.bf16 %v868_v55, %v1771_v6  ;;  %1171 = vmatprep.subr.bf16.mxu1 %v948_v24 }
 0x447   :  { %v932_v40 = vpop.permute.xlu1 %931  ;;  %v997_v31 = vpop.permute.xlu0 %996  ;;  %1088 = vmatpush1.bf16.msra.mxu0 %v900_v19 }
 0x448   :  { %v939_v11 = vsel %vm916_vm5, %v932_v40, %v934_v0  ;;  %1089 = vmatprep.subr.bf16.mxu0 %v946_v2  ;;  %1172 = vmatpush1.bf16.msra.mxu1 %v947_v17  ;;  %v1395_v2 = vld [vmem:[%s2245_s5 + $0x8] ss:$0 sps:$4 sm:$0xff]  }
 0x449   :  { %v951_v12 = vmul.bf16 %v939_v11, %v1947_v47  ;;  %1173 = vmatprep.subr.bf16.mxu1 %v952_v4  ;;  %v987_v47 = vsel %vm965_vm9, %v2138_v9, %v1375_v10  ;;  %v966_v9 = vsel %vm965_vm9, %v2084_v1, %v2125_v14  ;;  %v1007_v1 = vsel %vm1006_vm10, %v2167_v38, %v997_v31 }
 0x44a   :  { %v1035_v44 = vmul.bf16 %v1007_v1, %v1771_v6 }
 0x44b   :  { %v962_v26 = vpop.permute.xlu1 %961  ;;  %v911_v13 = vpop.permute.xlu0 %910  ;;  %1090 = vmatpush1.bf16.msra.mxu0 %v945_v33 }
 0x44c   :  { %v919_v61 = vsel %vm916_vm5, %v911_v13, %v913_v57  ;;  %1091 = vmatprep.subr.bf16.mxu0 %v950_v52  ;;  %1174 = vmatpush1.bf16.msra.mxu1 %v951_v12  ;;  %v1275_v57 = vcombine.low %v2262_v5, %v2262_v5 }
 0x44d   :  { %v949_v60 = vmul.bf16 %v919_v61, %v1919_v41  ;;  %1175 = vmatprep.subr.bf16.mxu1 %v987_v47  ;;  %v1384_v41 = vunpack.i.l.bf16 %v2123_v32  ;;  %v969_v32 = vsel %vm965_vm9, %v962_v26, %v1379_v53 }
 0x44f   :  { %v983_v7 = vpop.permute.xlu1 %982  ;;  %v1018_v50 = vpop.permute.xlu0 %1017  ;;  %1092 = vmatpush1.bf16.msra.mxu0 %v949_v60  ;;  %v1008_v36 = vsel %vm1006_vm10, %v997_v31, %v1384_v41 }
 0x450   :  { %v989_v59 = vsel %vm965_vm9, %v983_v7, %v1380_v23  ;;  %v1028_v34 = vsel %vm1006_vm10, %v1018_v50, %v1385_v29  ;;  %1093 = vmatprep.subr.bf16.mxu0 %v967_v25  ;;  %1176 = vmatpush1.bf16.msra.mxu1 %v986_v48  ;;  %v1036_v14 = vmul.bf16 %v1008_v36, %v1774_v54 }
 0x451   :  { %1177 = vmatprep.subr.bf16.mxu1 %v989_v59  ;;  %v1038_v37 = vmul.bf16 %v1028_v34, %v1786_v16 }
 0x453   :  { %v981_v21 = vpop.permute.xlu1 %980  ;;  %v960_v30 = vpop.permute.xlu0 %959  ;;  %1094 = vmatpush1.bf16.msra.mxu0 %v966_v9 }
 0x454   :  { %v988_v18 = vsel %vm965_vm9, %v981_v21, %v983_v7  ;;  %1095 = vmatprep.subr.bf16.mxu0 %v969_v32  ;;  %v968_v42 = vsel %vm965_vm9, %v960_v30, %v962_v26 }
 0x455   :  { %1178 = vmatpush1.bf16.msra.mxu1 %v988_v18 }
 0x456   :  { %1188 = vmatprep.subr.bf16.mxu1 %v1038_v37 }
 0x457   :  { %v1003_v27 = vpop.permute.xlu1 %1002  ;;  %v1016_v46 = vpop.permute.xlu0 %1015  ;;  %1096 = vmatpush1.bf16.msra.mxu0 %v968_v42 }
 0x458   :  { %1180 = vmatmul.mubr.bf16.vlgmr.msra.gmra.mrb[8].mxu1 %v1275_v57  ;;  %v1027_v0 = vsel %vm1006_vm10, %v1016_v46, %v1018_v50  ;;  %1106 = vmatprep.subr.bf16.mxu0 %v1036_v14 }
 0x459   :  { %1220 = vmatprep.mubr.bf16.mxu1 %v2263_v20  ;;  %v1037_v43 = vmul.bf16 %v1027_v0, %v1783_v15 }
 0x45a   :  { %1098 = vmatmul.mubr.bf16.vlgmr.msra.gmra.mrb[8].mxu0 %v1275_v57 }
 0x45b   :  { %v1024_v62 = vpop.permute.xlu1 %1023  ;;  %v1388_v28 = vpop.permute.xlu0 %1387  ;;  %1107 = vmatpush1.bf16.msra.mxu0 %v1035_v44  ;;  %1189 = vmatpush1.bf16.msra.mxu1 %v1037_v43 }
 0x45c   :  { %v1390_v63 = vunpack.i.h.bf16 %v1388_v28  ;;  %v1389_v3 = vunpack.i.l.bf16 %v1388_v28  ;;  %1138 = vmatprep.mubr.bf16.mxu0 %v2263_v20 }
 0x45e   :  { %v1010_v22 = vsel %vm1006_vm10, %v1003_v27, %v1389_v3  ;;  %v1030_v24 = vsel %vm1006_vm10, %v1024_v62, %v1390_v63 }
 0x45f   :  { %v1022_v38 = vpop.permute.xlu1 %1021  ;;  %v1001_v35 = vpop.permute.xlu0 %1000  ;;  %v1040_v39 = vmul.bf16 %v1010_v22, %v1774_v54  ;;  %v1042_v49 = vmul.bf16 %v1030_v24, %v1786_v16  ;;  %v1234_v16 = vstv %s1280_s19 }
 0x460   :  { %v1029_v8 = vsel %vm1006_vm10, %v1022_v38, %v1024_v62  ;;  %v1009_v51 = vsel %vm1006_vm10, %v1001_v35, %v1003_v27 }
 0x461   :  { %v1041_v55 = vmul.bf16 %v1029_v8, %v1783_v15  ;;  %v1039_v19 = vmul.bf16 %v1009_v51, %v1771_v6  ;;  %1108 = vmatprep.subr.bf16.mxu0 %v1040_v39  ;;  %1190 = vmatprep.subr.bf16.mxu1 %v1042_v49 }
 0x463   :  { %1191 = vmatpush1.bf16.msra.mxu1 %v1041_v55  ;;  %1109 = vmatpush1.bf16.msra.mxu0 %v1039_v19 }
 0x466   :  { %1279 = vmatmul.mubr.msk.bf16.vlgmr.msra.gmra.mrb[8].mxu1 %vm1061_vm11, %v1395_v2  ;;  %1278 = vmatmul.mubr.msk.bf16.vlgmr.msra.gmra.mrb[8].mxu0 %vm1061_vm11, %v1395_v2 }
 0x470   :  { %v1049_v54 = vpop.permute.xlu0 %1048 }
 0x539   :  { %v1222_v17 = vpop.f32.mrb[8].mxu1  ;;  %v1140_v15 = vpop.f32.mrb[8].mxu0 }
 0x53a   :  { %v1287_v40 = vadd.f32 %v1222_v17, %v1049_v54  ;;  %v1224_v45 = vpop.f32.mrb[9].mxu1  ;;  %v1285_v4 = vadd.f32 %v1140_v15, %v1049_v54  ;;  %v1142_v6 = vpop.f32.mrb[9].mxu0 }
 0x53b   :  { %v1288_v11 = vadd.f32 %v1224_v45, %v1049_v54  ;;  %v1226_v31 = vpop.f32.mrb[10].mxu1  ;;  %v1286_v56 = vadd.f32 %v1142_v6, %v1049_v54  ;;  %v1144_v33 = vpop.f32.mrb[10].mxu0 }
 0x53c   :  { %vm1232_vm12 = vcmp.gt.f32.partialorder %v1287_v40, 0.0  ;;  %v1237_v12 = vmul.f32 %v1287_v40, %v1234_v16  ;;  %v1227_v10 = vpop.f32.mrb[11].mxu1  ;;  %vm1230_vm13 = vcmp.gt.f32.partialorder %v1285_v4, 0.0  ;;  %v1235_v52 = vmul.f32 %v1285_v4, %v1234_v16  ;;  %v1145_v13 = vpop.f32.mrb[11].mxu0 }
 0x53d   :  { %vm1233_vm14 = vcmp.gt.f32.partialorder %v1288_v11, 0.0  ;;  %v1238_v26 = vmul.f32 %v1288_v11, %v1234_v16  ;;  %vm1231_vm15 = vcmp.gt.f32.partialorder %v1286_v56, 0.0  ;;  %v1236_v47 = vmul.f32 %v1286_v56, %v1234_v16 }
 0x53e   :  { %v1241_v61 = vsel %vm1232_vm12, %v1287_v40, %v1237_v12  ;;  %v1239_v58 = vsel %vm1230_vm13, %v1285_v4, %v1235_v52 }
 0x53f   :  { %v1242_v23 = vsel %vm1233_vm14, %v1288_v11, %v1238_v26  ;;  %v1240_v60 = vsel %vm1231_vm15, %v1286_v56, %v1236_v47 }
 0x540   :  { %v1284_v29 = vpack.c.bf16 %v1242_v23, %v1241_v61  ;;  %v1283_v7 = vpack.c.bf16 %v1240_v60, %v1239_v58 }
 0x542   :  { %1260 = vst [vmem:[%s2251_s11 + $0x8] sm:$0xff] %v1284_v29  ;;  %1259 = vst [vmem:[%s2251_s11] sm:$0xff] %v1283_v7 }
 0x543   :  { %1265 = vsyncpa [#allocation4], 1 }

// kernel: dense_block_forward.3
= control target key start
LH: loop header
LB: loop body
LE: loop exit
PB: predicated region body
PF: predicated region fallthrough
CT: control target
= control target key end

     0   :  { %17 = vsyncpa [#allocation4], 0  ;;  %s2363_s0 = inlined_call_operand.vmem [shape: bf16[4,512], index: 0, kind: input, shape index: {}]   ;;  %s2364_s1 = inlined_call_operand.vmem [shape: bf16[8,512], index: 1, kind: input, shape index: {}]   ;;  %s2365_s2 = inlined_call_operand.vmem [shape: bf16[32,12], index: 2, kind: input, shape index: {}]   ;;  %s2366_s3 = inlined_call_operand.vmem [shape: f32[32,1], index: 3, kind: input, shape index: {}]   ;;  %s2367_s4 = inlined_call_operand.vmem [shape: f32[12,1], index: 4, kind: input, shape index: {}]   ;;  %s2368_s5 = inlined_call_operand.vmem [shape: f32[12,1], index: 5, kind: input, shape index: {}]   ;;  %s2369_s6 = inlined_call_operand.vmem [shape: bf16[8,288], index: 6, kind: input, shape index: {}]   ;;  %s2370_s7 = inlined_call_operand.vmem [shape: f32[8,1], index: 7, kind: input, shape index: {}]   ;;  %s2371_s8 = inlined_call_operand.vmem [shape: f32[32,1], index: 8, kind: input, shape index: {}]   ;;  %s2372_s9 = inlined_call_operand.vmem [shape: f32[32,1], index: 9, kind: input, shape index: {}]   ;;  %s2373_s10 = inlined_call_operand.vmem [shape: bf16[2,512], index: 10, kind: input, shape index: {}]   ;;  %s2374_s11 = inlined_call_operand.vmem [shape: f32[2], index: 11, kind: input, shape index: {}]   ;;  %s2375_s12 = inlined_call_operand.vmem [shape: bf16[8,512], index: 12, kind: output, shape index: {}]  }
   0x1   :  { %s46_s23 = sshll.u32 %s2374_s11, 4  ;;  %s47_s23 = int_to_ptr.vmem [resolvable:$true] %s46_s23 }
   0x2   :  { %s1456_s24 = scalar_lea.vmem %s47_s23, 16  ;;  %p1461_p1 = scmp.lt.s32.totalorder %s47_s23, %s47_s23 }
   0x3   :  { %p1457_p0 = scmp.ne.s32.totalorder %s47_s23, %s1456_s24  ;;  %p1462_p2 = scmp.lt.s32.totalorder %s1456_s24, %s1456_s24 }
   0x5   :  { %p1463_p3 = por %p1462_p2, %p1461_p1 }
   0x7   :  { %p1464_p4 = pnand %p1463_p3, %p1457_p0 }
   0x9   :  { %1467 = shalt.err (!%p1464_p4)
}
   0xa   :  { %s1470_s25 = smov [#allocation3]  }
   0xb   :  { %49 = dma.vmem_to_smem %s47_s23, 16, %s1470_s25, [#allocation4]  }
   0xc   :  { %1468 = dma.done.wait [#allocation4], 16  }
   0xd   :  { %1469 = vsyncadd [#allocation4], 4294967280 }
   0xe   :  { %53 = sfence }
   0xf   :  { %v55_v0 = vld [vmem:[%s2363_s0] sm:$0xff]  ;;  %v59_v2 = vld [vmem:[%s2364_s1 + $0x8] sm:$0xff]  ;;  %vm82_vm0 = vcmask 1043456   ;;  %v2376_v47 = vmov 0   ;;  %vm232_vm1 = vcmask 1045504   ;;  %vm225_vm2 = vcmask 97280  }
  0x10   :  { %v58_v1 = vld [vmem:[%s2364_s1] sm:$0xff]  ;;  %v56_v3 = vunpack.c.l.bf16 %v55_v0  ;;  %v57_v4 = vunpack.c.h.bf16 %v55_v0  ;;  %v62_v7 = vunpack.c.l.bf16 %v59_v2  ;;  %v63_v8 = vunpack.c.h.bf16 %v59_v2  ;;  %1357 = vset.pattern.permute.xlu0 %v2376_v47  ;;  %1358 = vset.pattern.permute.xlu1 %v2376_v47  ;;  %s351_s28 = sld [smem:[#allocation3]]  ;;  %s1473_s29 = smov 16  }
  0x11   :  { %v60_v5 = vunpack.c.l.bf16 %v58_v1  ;;  %v61_v6 = vunpack.c.h.bf16 %v58_v1  ;;  %277 = vmatprep.mubr.bf16.mxu0 %v2376_v47  ;;  %330 = vmatprep.mubr.bf16.mxu1 %v2376_v47  ;;  %v133_v0 = vld [vmem:[%s2367_s4] sm:$0xff]  ;;  %s1474_s11 = smov 15   ;;  %s1475_s30 = smov 1  }
  0x12   :  { %v66_v9 = vcombine.high %v56_v3, %v56_v3  ;;  %v67_v10 = vcombine.high %v57_v4, %v57_v4  ;;  %v1562_v13 = vrot.slane %v62_v7, 4  ;;  %v1564_v14 = vrot.slane %v63_v8, 4  ;;  %v141_v7 = vld [vmem:[%s2368_s5] sm:$0xff]  ;;  %s1476_s0 = smov 127   ;;  %s1477_s1 = smov 113  }
  0x13   :  { %v1558_v11 = vrot.slane %v60_v5, 4  ;;  %v1560_v12 = vrot.slane %v61_v6, 4  ;;  %s1480_s26 = smov 111  }
  0x14   :  { %v1580_v19 = vsel %vm82_vm0, %v57_v4, %v1562_v13  ;;  %v1584_v20 = vsel %vm82_vm0, %v67_v10, %v1564_v14  ;;  %v95_v28 = vsel %vm82_vm0, %v1562_v13, 0.0  ;;  %v97_v29 = vsel %vm82_vm0, %v1564_v14, 0.0  ;;  %v142_v10 = vld [vmem:[%s2368_s5 + $0x8] sm:$0xf] }
  0x15   :  { %v1568_v15 = vsel %vm82_vm0, %v56_v3, %v1558_v11  ;;  %v1572_v16 = vsel %vm82_vm0, %v66_v9, %v1560_v12  ;;  %v92_v17 = vsel %vm82_vm0, %v1558_v11, 0.0  ;;  %v93_v18 = vsel %vm82_vm0, %v1560_v12, 0.0  ;;  %v134_v3 = vld [vmem:[%s2367_s4 + $0x8] sm:$0xf] }
  0x16   :  { %v87_v21 = vadd.f32 %v1572_v16, %v1568_v15  ;;  %v103_v22 = vmul.f32 %v1568_v15, %v1568_v15  ;;  %v104_v23 = vmul.f32 %v1572_v16, %v1572_v16  ;;  %v105_v24 = vmul.f32 %v1580_v19, %v1580_v19 }
  0x17   :  { %v106_v25 = vmul.f32 %v1584_v20, %v1584_v20  ;;  %v94_v26 = vadd.f32 %v93_v18, %v92_v17  ;;  %v107_v30 = vmul.f32 %v1558_v11, %v1558_v11  ;;  %v108_v33 = vmul.f32 %v1560_v12, %v1560_v12  ;;  %v191_v18 = vld [vmem:[%s2366_s3] sm:$0xff] }
  0x18   :  { %v88_v27 = vadd.f32 %v87_v21, %v1580_v19  ;;  %v111_v31 = vadd.f32 %v104_v23, %v103_v22  ;;  %v109_v34 = vmul.f32 %v1562_v13, %v1562_v13  ;;  %v110_v36 = vmul.f32 %v1564_v14, %v1564_v14  ;;  %v192_v21 = vld [vmem:[%s2366_s3 + $0x8] sm:$0xff]  ;;  %v193_v22 = vld [vmem:[%s2366_s3 + $0x10] sm:$0xff]  ;;  %v194_v23 = vld [vmem:[%s2366_s3 + $0x18] sm:$0xff] }
  0x19   :  { %v96_v32 = vadd.f32 %v95_v28, %v94_v26  ;;  %v116_v37 = vsel %vm82_vm0, %v107_v30, 0.0  ;;  %v117_v39 = vsel %vm82_vm0, %v108_v33, 0.0 }
  0x1a   :  { %v89_v35 = vadd.f32 %v88_v27, %v1584_v20  ;;  %v112_v38 = vadd.f32 %v111_v31, %v105_v24  ;;  %v119_v40 = vsel %vm82_vm0, %v109_v34, 0.0  ;;  %v118_v42 = vadd.f32 %v117_v39, %v116_v37 }
  0x1b   :  { %v98_v41 = vadd.f32 %v97_v29, %v96_v32  ;;  %v121_v44 = vsel %vm82_vm0, %v110_v36, 0.0 }
  0x1c   :  { %90 = vadd.xlane.f32.xlu0 %v89_v35  ;;  %v113_v43 = vadd.f32 %v112_v38, %v106_v25  ;;  %v120_v45 = vadd.f32 %v119_v40, %v118_v42 }
  0x1e   :  { %114 = vadd.xlane.f32.xlu1 %v113_v43  ;;  %v122_v46 = vadd.f32 %v121_v44, %v120_v45  ;;  %v1440_v43 = vld [vmem:[%s2365_s2 + $0x8] sm:$0xff]  }
  0x20   :  { %99 = vadd.xlane.f32.xlu0 %v98_v41 }
  0x22   :  { %123 = vadd.xlane.f32.xlu1 %v122_v46 }
  0xa9   :  { %v91_v48 = vpop.xlane.xlu0 %90 }
  0xaa   :  { %v101_v49 = vmul.f32 0.001953125, %v91_v48 }
  0xab   :  { %v115_v51 = vpop.xlane.xlu1 %114 }
  0xac   :  { %v127_v50 = vmul.f32 %v101_v49, %v101_v49  ;;  %v125_v52 = vmul.f32 0.001953125, %v115_v51 }
  0xad   :  { %v100_v53 = vpop.xlane.xlu0 %99 }
  0xae   :  { %v102_v54 = vmul.f32 0.001953125, %v100_v53  ;;  %v129_v55 = vsub.f32 %v125_v52, %v127_v50  ;;  %v1658_v50 = vstv %s351_s28 }
  0xaf   :  { %v124_v57 = vpop.xlane.xlu1 %123 }
  0xb0   :  { %v128_v56 = vmul.f32 %v102_v54, %v102_v54  ;;  %v131_v58 = vmax.f32 %v129_v55, 0.0  ;;  %v126_v59 = vmul.f32 0.001953125, %v124_v57 }
  0xb2   :  { %v135_v60 = vadd.f32 1e-05, %v131_v58  ;;  %v130_v61 = vsub.f32 %v126_v59, %v128_v56 }
  0xb4   :  { %1444 = vrsqrt.f32 %v135_v60  ;;  %v132_v62 = vmax.f32 %v130_v61, 0.0 }
  0xb6   :  { %v136_v63 = vadd.f32 1e-05, %v132_v62 }
  0xb8   :  { %1446 = vrsqrt.f32 %v136_v63 }
  0xbe   :  { %v1445_v1 = vpop.eup %1444 }
  0xbf   :  { %v139_v2 = vmul.f32 %v1445_v1, %v133_v0 }
  0xc1   :  { %149 = vperm.xlu0 %1357, %v139_v2   ;;  %v143_v6 = vmul.f32 %v139_v2, %v101_v49 }
  0xc2   :  { %v1447_v4 = vpop.eup %1446 }
  0xc3   :  { %v140_v5 = vmul.f32 %v1447_v4, %v134_v3  ;;  %v145_v8 = vsub.f32 %v141_v7, %v143_v6 }
  0xc5   :  { %154 = vperm.xlu1 %1358, %v140_v5   ;;  %v144_v9 = vmul.f32 %v140_v5, %v102_v54 }
  0xc7   :  { %v146_v17 = vsub.f32 %v142_v10, %v144_v9 }
  0xc9   :  { %167 = vperm.xlu1 %1358, %v145_v8  }
  0xcd   :  { %172 = vperm.xlu1 %1358, %v146_v17  }
  0xd1   :  { %197 = vperm.xlu1 %1358, %v191_v18  }
  0xd5   :  { %202 = vperm.xlu1 %1358, %v192_v21  }
  0xd9   :  { %207 = vperm.xlu1 %1358, %v193_v22  }
  0xdd   :  { %212 = vperm.xlu1 %1358, %v194_v23  }
 0x140   :  { %v150_v25 = vpop.permute.xlu0 %149 }
 0x141   :  { %v157_v27 = vmul.f32 %v150_v25, %v1568_v15  ;;  %v159_v28 = vmul.f32 %v150_v25, %v1580_v19  ;;  %v158_v29 = vmul.f32 %v150_v25, %v1572_v16  ;;  %v160_v30 = vmul.f32 %v150_v25, %v1584_v20 }
 0x144   :  { %v155_v24 = vpop.permute.xlu1 %154 }
 0x145   :  { %v162_v31 = vmul.f32 %v155_v24, %v1560_v12  ;;  %v164_v32 = vmul.f32 %v155_v24, %v1564_v14  ;;  %v161_v33 = vmul.f32 %v155_v24, %v1558_v11  ;;  %v163_v34 = vmul.f32 %v155_v24, %v1562_v13  ;;  %v1439_v13 = vld [vmem:[%s2365_s2] sm:$0xff]   ;;  %s1472_s2 = smov 17  }
 0x148   :  { %v168_v26 = vpop.permute.xlu1 %167 }
 0x149   :  { %v176_v36 = vadd.f32 %v168_v26, %v158_v29  ;;  %v178_v37 = vadd.f32 %v168_v26, %v160_v30  ;;  %v175_v38 = vadd.f32 %v168_v26, %v157_v27  ;;  %v177_v39 = vadd.f32 %v168_v26, %v159_v28 }
 0x14c   :  { %v173_v35 = vpop.permute.xlu1 %172 }
 0x14d   :  { %v180_v15 = vadd.f32 %v173_v35, %v162_v31  ;;  %v182_v40 = vadd.f32 %v173_v35, %v164_v32  ;;  %v179_v19 = vadd.f32 %v173_v35, %v161_v33  ;;  %v181_v41 = vadd.f32 %v173_v35, %v163_v34 }
 0x14f   :  { %v184_v16 = vpack.c.bf16 %v180_v15, %v176_v36  ;;  %v186_v20 = vpack.c.bf16 %v182_v40, %v178_v37  ;;  %v183_v42 = vpack.c.bf16 %v179_v19, %v175_v38  ;;  %v185_v12 = vpack.c.bf16 %v181_v41, %v177_v39 }
 0x150   :  { %v198_v44 = vpop.permute.xlu1 %197 }
 0x151   :  { %1317 = vmatprep.subr.msk.bf16.mxu0 %vm232_vm1, %v184_v16  ;;  %1320 = vmatprep.subr.msk.bf16.mxu1 %vm232_vm1, %v186_v20  ;;  %v234_v14 = vsel %vm232_vm1, %v183_v42, 0  ;;  %v240_v11 = vsel %vm232_vm1, %v185_v12, 0 }
 0x152   :  { %246 = vmatpush1.bf16.msra.mxu0 %v234_v14  ;;  %299 = vmatpush1.bf16.msra.mxu1 %v240_v11 }
 0x154   :  { %v203_v45 = vpop.permute.xlu1 %202 }
 0x155   :  { %1318 = vmatmul.mubr.msk.bf16.vlgmr.msra.gmra.mrb[0].mxu0 %vm225_vm2, %v1439_v13  ;;  %1321 = vmatmul.mubr.msk.bf16.vlgmr.msra.gmra.mrb[0].mxu1 %vm225_vm2, %v1439_v13 }
 0x156   :  { %287 = vmatprep.mubr.bf16.mxu0 %v2376_v47  ;;  %340 = vmatprep.mubr.bf16.mxu1 %v2376_v47 }
 0x158   :  { %v208_v63 = vpop.permute.xlu1 %207 }
 0x15c   :  { %v213_v33 = vpop.permute.xlu1 %212 }
 0x15d   :  { %1319 = vmatmul.mubr.msk.bf16.gmra.mrb[4].mxu0 %vm225_vm2, %v1440_v43  ;;  %1322 = vmatmul.mubr.msk.bf16.gmra.mrb[4].mxu1 %vm225_vm2, %v1440_v43 }
 0x228   :  { %v279_v46 = vpop.f32.mrb[0].mxu0  ;;  %v332_v48 = vpop.f32.mrb[0].mxu1 }
 0x229   :  { %v280_v49 = vadd.f32 %v279_v46, %v198_v44  ;;  %v281_v51 = vpop.f32.mrb[1].mxu0  ;;  %v334_v52 = vpop.f32.mrb[1].mxu1  ;;  %v333_v53 = vadd.f32 %v332_v48, %v198_v44 }
 0x22a   :  { %v282_v54 = vadd.f32 %v281_v51, %v198_v44  ;;  %v283_v55 = vpop.f32.mrb[2].mxu0  ;;  %v336_v56 = vpop.f32.mrb[2].mxu1  ;;  %v1662_v61 = vadd.f32 %v334_v52, %v198_v44 }
 0x22b   :  { %v285_v57 = vpop.f32.mrb[3].mxu0  ;;  %v338_v58 = vpop.f32.mrb[3].mxu1  ;;  %v369_v59 = vmul.f32 %v1658_v50, %v280_v49  ;;  %vm352_vm3 = vcmp.gt.f32.partialorder %v280_v49, 0.0  ;;  %v284_v62 = vadd.f32 %v283_v55, %v203_v45  ;;  %v371_v0 = vmul.f32 %v1658_v50, %v333_v53 }
 0x22c   :  { %v370_v60 = vmul.f32 %v1658_v50, %v282_v54  ;;  %vm353_vm4 = vcmp.gt.f32.partialorder %v282_v54, 0.0  ;;  %v337_v1 = vadd.f32 %v336_v56, %v203_v45  ;;  %v286_v2 = vadd.f32 %v285_v57, %v203_v45 }
 0x22d   :  { %vm354_vm5 = vcmp.gt.f32.partialorder %v333_v53, 0.0  ;;  %vm356_vm6 = vcmp.gt.f32.partialorder %v284_v62, 0.0  ;;  %v373_v3 = vmul.f32 %v1658_v50, %v284_v62  ;;  %v1666_v4 = vsel %vm352_vm3, %v280_v49, %v369_v59 }
 0x22e   :  { %vm357_vm7 = vcmp.gt.f32.partialorder %v286_v2, 0.0  ;;  %v374_v5 = vmul.f32 %v1658_v50, %v286_v2  ;;  %v339_v6 = vadd.f32 %v338_v58, %v203_v45  ;;  %v1669_v9 = vsel %vm353_vm4, %v282_v54, %v370_v60 }
 0x22f   :  { %vm355_vm8 = vcmp.gt.f32.partialorder %v1662_v61, 0.0  ;;  %v372_v10 = vmul.f32 %v1658_v50, %v1662_v61  ;;  %v1674_v22 = vsel %vm354_vm5, %v333_v53, %v371_v0  ;;  %v1676_v23 = vsel %vm356_vm6, %v284_v62, %v373_v3 }
 0x230   :  { %v289_v7 = vpop.f32.mrb[4].mxu0  ;;  %v342_v8 = vpop.f32.mrb[4].mxu1  ;;  %v375_v24 = vmul.f32 %v1658_v50, %v337_v1  ;;  %v425_v28 = vmul.f32 %v1666_v4, %v1666_v4  ;;  %vm358_vm9 = vcmp.gt.f32.partialorder %v337_v1, 0.0  ;;  %v1682_v29 = vsel %vm357_vm7, %v286_v2, %v374_v5 }
 0x231   :  { %v290_v17 = vadd.f32 %v289_v7, %v208_v63  ;;  %v291_v18 = vpop.f32.mrb[5].mxu0  ;;  %v344_v21 = vpop.f32.mrb[5].mxu1  ;;  %v426_v34 = vmul.f32 %v1669_v9, %v1669_v9  ;;  %vm359_vm10 = vcmp.gt.f32.partialorder %v339_v6, 0.0  ;;  %v343_v35 = vadd.f32 %v342_v8, %v208_v63 }
 0x232   :  { %v292_v25 = vadd.f32 %v291_v18, %v208_v63  ;;  %v293_v26 = vpop.f32.mrb[6].mxu0  ;;  %v346_v27 = vpop.f32.mrb[6].mxu1  ;;  %v429_v36 = vmul.f32 %v1676_v23, %v1676_v23  ;;  %v376_v37 = vmul.f32 %v1658_v50, %v339_v6  ;;  %v1690_v15 = vsel %vm358_vm9, %v337_v1, %v375_v24 }
 0x233   :  { %v377_v30 = vmul.f32 %v1658_v50, %v290_v17  ;;  %v295_v31 = vpop.f32.mrb[7].mxu0  ;;  %v348_v32 = vpop.f32.mrb[7].mxu1  ;;  %vm360_vm11 = vcmp.gt.f32.partialorder %v290_v17, 0.0  ;;  %v294_v38 = vadd.f32 %v293_v26, %v213_v33  ;;  %v430_v40 = vmul.f32 %v1682_v29, %v1682_v29 }
 0x234   :  { %v296_v39 = vadd.f32 %v295_v31, %v213_v33  ;;  %v378_v19 = vmul.f32 %v1658_v50, %v292_v25  ;;  %v347_v41 = vadd.f32 %v346_v27, %v213_v33  ;;  %vm361_vm12 = vcmp.gt.f32.partialorder %v292_v25, 0.0 }
 0x235   :  { %v1695_v16 = vsel %vm360_vm11, %v290_v17, %v377_v30  ;;  %vm364_vm13 = vcmp.gt.f32.partialorder %v294_v38, 0.0  ;;  %v381_v20 = vmul.f32 %v1658_v50, %v294_v38  ;;  %vm362_vm14 = vcmp.gt.f32.partialorder %v343_v35, 0.0 }
 0x236   :  { %v379_v42 = vmul.f32 %v1658_v50, %v343_v35  ;;  %vm365_vm15 = vcmp.gt.f32.partialorder %v296_v39, 0.0  ;;  %v382_v12 = vmul.f32 %v1658_v50, %v296_v39  ;;  %v345_v14 = vadd.f32 %v344_v21, %v208_v63 }
 0x237   :  { %v1700_v11 = vsel %vm364_vm13, %v294_v38, %v381_v20  ;;  %v349_v13 = vadd.f32 %v348_v32, %v213_v33  ;;  %v401_v43 = vadd.f32 %v1669_v9, %v1666_v4  ;;  %v433_v44 = vmul.f32 %v1695_v16, %v1695_v16 }
 0x238   :  { %v1706_v45 = vsel %vm361_vm12, %v292_v25, %v378_v19  ;;  %vm366_vm0 = vcmp.gt.f32.partialorder %v347_v41, 0.0  ;;  %v1708_v46 = vsel %vm365_vm15, %v296_v39, %v382_v12  ;;  %v383_v48 = vmul.f32 %v1658_v50, %v347_v41 }
 0x239   :  { %v1714_v49 = vsel %vm355_vm8, %v1662_v61, %v372_v10  ;;  %v402_v51 = vadd.f32 %v401_v43, %v1674_v22  ;;  %v1718_v52 = vsel %vm359_vm10, %v339_v6, %v376_v37  ;;  %v437_v53 = vmul.f32 %v1700_v11, %v1700_v11 }
 0x23a   :  { %v406_v54 = vadd.f32 %v1682_v29, %v1676_v23  ;;  %v431_v55 = vmul.f32 %v1690_v15, %v1690_v15  ;;  %v446_v56 = vadd.f32 %v430_v40, %v429_v36  ;;  %v438_v57 = vmul.f32 %v1708_v46, %v1708_v46 }
 0x23b   :  { %v384_v58 = vmul.f32 %v1658_v50, %v349_v13  ;;  %v403_v59 = vadd.f32 %v402_v51, %v1714_v49  ;;  %v441_v60 = vadd.f32 %v426_v34, %v425_v28  ;;  %v432_v62 = vmul.f32 %v1718_v52, %v1718_v52 }
 0x23c   :  { %v407_v61 = vadd.f32 %v406_v54, %v1690_v15  ;;  %v447_v63 = vadd.f32 %v446_v56, %v431_v55  ;;  %v427_v0 = vmul.f32 %v1674_v22, %v1674_v22  ;;  %v434_v1 = vmul.f32 %v1706_v45, %v1706_v45 }
 0x23d   :  { %v1738_v2 = vsel %vm366_vm0, %v347_v41, %v383_v48  ;;  %vm367_vm1 = vcmp.gt.f32.partialorder %v349_v13, 0.0  ;;  %404 = vadd.xlane.f32.xlu1 %v403_v59  ;;  %v416_v3 = vadd.f32 %v1708_v46, %v1700_v11  ;;  %v411_v8 = vadd.f32 %v1706_v45, %v1695_v16 }
 0x23e   :  { %v408_v5 = vadd.f32 %v407_v61, %v1718_v52  ;;  %v448_v6 = vadd.f32 %v447_v63, %v432_v62  ;;  %v442_v7 = vadd.f32 %v441_v60, %v427_v0  ;;  %v428_v17 = vmul.f32 %v1714_v49, %v1714_v49 }
 0x23f   :  { %v417_v10 = vadd.f32 %v416_v3, %v1738_v2  ;;  %v1748_v18 = vsel %vm367_vm1, %v349_v13, %v384_v58  ;;  %v456_v21 = vadd.f32 %v438_v57, %v437_v53  ;;  %v1751_v24 = vsel %vm362_vm14, %v343_v35, %v379_v42 }
 0x240   :  { %409 = vadd.xlane.f32.xlu0 %v408_v5  ;;  %v380_v25 = vmul.f32 %v1658_v50, %v345_v14  ;;  %v439_v27 = vmul.f32 %v1738_v2, %v1738_v2  ;;  %vm363_vm2 = vcmp.gt.f32.partialorder %v345_v14, 0.0  ;;  %v443_v28 = vadd.f32 %v442_v7, %v428_v17 }
 0x241   :  { %449 = vadd.xlane.f32.xlu1 %v448_v6  ;;  %v418_v26 = vadd.f32 %v417_v10, %v1748_v18  ;;  %v412_v30 = vadd.f32 %v411_v8, %v1751_v24  ;;  %v451_v31 = vadd.f32 %v434_v1, %v433_v44  ;;  %v435_v33 = vmul.f32 %v1751_v24, %v1751_v24 }
 0x242   :  { %v457_v32 = vadd.f32 %v456_v21, %v439_v27  ;;  %v1760_v34 = vsel %vm363_vm2, %v345_v14, %v380_v25  ;;  %v440_v50 = vmul.f32 %v1748_v18, %v1748_v18  ;;  %v478_v21 = vld [vmem:[%s2371_s8 + $0x8] sm:$0xff]  ;;  %vm633_vm3 = vcmask 138240  }
 0x243   :  { %v413_v35 = vadd.f32 %v412_v30, %v1760_v34  ;;  %v452_v36 = vadd.f32 %v451_v31, %v435_v33  ;;  %v436_v38 = vmul.f32 %v1760_v34, %v1760_v34  ;;  %v494_v33 = vld [vmem:[%s2372_s9 + $0x8] sm:$0xff]  ;;  %vm782_vm4 = vcmask 121856  }
 0x244   :  { %444 = vadd.xlane.f32.xlu0 %v443_v28  ;;  %v458_v37 = vadd.f32 %v457_v32, %v440_v50  ;;  %v493_v32 = vld [vmem:[%s2372_s9] sm:$0xff]  ;;  %vm914_vm5 = vcmask 1039360   ;;  %vm965_vm6 = vcmask 924672   ;;  %vm741_vm7 = vcmask 130048  }
 0x245   :  { %419 = vadd.xlane.f32.xlu1 %v418_v26  ;;  %v453_v39 = vadd.f32 %v452_v36, %v436_v38  ;;  %v477_v26 = vld [vmem:[%s2371_s8] sm:$0xff]  ;;  %vm859_vm8 = vcmask 7168   ;;  %vm1014_vm9 = vcmask 916480   ;;  %vm1055_vm10 = vcmask 908288  }
 0x246   :  { %vm1110_vm11 = vcmask 261120  }
 0x248   :  { %414 = vadd.xlane.f32.xlu0 %v413_v35  ;;  %v480_v35 = vld [vmem:[%s2371_s8 + $0x18] sm:$0xff] }
 0x249   :  { %459 = vadd.xlane.f32.xlu1 %v458_v37 }
 0x24c   :  { %454 = vadd.xlane.f32.xlu0 %v453_v39  ;;  %v479_v39 = vld [vmem:[%s2371_s8 + $0x10] sm:$0xff] }
 0x25a   :  { %1360 = vrot.lane.b32.xlu1 %v2376_v47, %s1472_s2 }
 0x25e   :  { %1370 = vrot.lane.b32.xlu1 %v2376_v47, %s1473_s29 }
 0x262   :  { %1365 = vrot.lane.b32.xlu0 %v2376_v47, %s1472_s2  ;;  %1380 = vrot.lane.b32.xlu1 %v2376_v47, %s1474_s11 }
 0x266   :  { %1375 = vrot.lane.b32.xlu0 %v2376_v47, %s1473_s29  ;;  %1390 = vrot.lane.b32.xlu1 %v2376_v47, %s1475_s30 }
 0x26a   :  { %1385 = vrot.lane.b32.xlu0 %v2376_v47, %s1474_s11  ;;  %1405 = vrot.lane.b32.xlu1 %v2376_v47, %s1476_s0 }
 0x26e   :  { %1395 = vrot.lane.b32.xlu0 %v2376_v47, %s1475_s30 }
 0x272   :  { %1400 = vrot.lane.b32.xlu0 %v2376_v47, %s1476_s0 }
 0x276   :  { %1410 = vrot.lane.b32.xlu0 %v2376_v47, %s1477_s1 }
 0x2ca   :  { %v405_v40 = vpop.xlane.xlu1 %404 }
 0x2cb   :  { %v421_v41 = vmul.f32 0.001953125, %v405_v40 }
 0x2cd   :  { %v410_v19 = vpop.xlane.xlu0 %409  ;;  %v465_v43 = vmul.f32 %v421_v41, %v421_v41 }
 0x2ce   :  { %v422_v20 = vmul.f32 0.001953125, %v410_v19  ;;  %v450_v42 = vpop.xlane.xlu1 %449 }
 0x2cf   :  { %v462_v12 = vmul.f32 0.001953125, %v450_v42 }
 0x2d0   :  { %v466_v14 = vmul.f32 %v422_v20, %v422_v20 }
 0x2d1   :  { %v445_v13 = vpop.xlane.xlu0 %444 }
 0x2d2   :  { %v470_v44 = vsub.f32 %v462_v12, %v466_v14  ;;  %v461_v48 = vmul.f32 0.001953125, %v445_v13  ;;  %v420_v51 = vpop.xlane.xlu1 %419  ;;  %v495_v12 = vld [vmem:[%s2372_s9 + $0x10] sm:$0xff] }
 0x2d3   :  { %v424_v53 = vmul.f32 0.001953125, %v420_v51 }
 0x2d4   :  { %v474_v54 = vmax.f32 %v470_v44, 0.0  ;;  %v469_v55 = vsub.f32 %v461_v48, %v465_v43 }
 0x2d5   :  { %v415_v56 = vpop.xlane.xlu0 %414  ;;  %v468_v61 = vmul.f32 %v424_v53, %v424_v53 }
 0x2d6   :  { %v482_v57 = vadd.f32 1e-05, %v474_v54  ;;  %v473_v58 = vmax.f32 %v469_v55, 0.0  ;;  %v423_v59 = vmul.f32 0.001953125, %v415_v56  ;;  %v460_v60 = vpop.xlane.xlu1 %459 }
 0x2d7   :  { %v464_v62 = vmul.f32 0.001953125, %v460_v60 }
 0x2d8   :  { %1448 = vrsqrt.f32 %v482_v57  ;;  %v481_v63 = vadd.f32 1e-05, %v473_v58  ;;  %v467_v3 = vmul.f32 %v423_v59, %v423_v59 }
 0x2d9   :  { %v455_v0 = vpop.xlane.xlu0 %454  ;;  %v472_v1 = vsub.f32 %v464_v62, %v468_v61  ;;  %v1478_v61 = vmov 1966171168  }
 0x2da   :  { %1450 = vrsqrt.f32 %v481_v63  ;;  %v463_v5 = vmul.f32 0.001953125, %v455_v0  ;;  %v1819_v51 = vpop.permute.xlu1 %1360  ;;  %v678_v62 = vunpack.c.l.s4 %v1478_v61  ;;  %v680_v63 = vlaneseq }
 0x2db   :  { %v476_v6 = vmax.f32 %v472_v1, 0.0 }
 0x2dc   :  { %v471_v7 = vsub.f32 %v463_v5, %v467_v3  ;;  %v679_v3 = vunpack.c.0.s8 %v678_v62  ;;  %v681_v5 = vshrl.u32 %v680_v63, 7 }
 0x2dd   :  { %v484_v8 = vadd.f32 1e-05, %v476_v6  ;;  %v1815_v44 = vpop.permute.xlu0 %1365  ;;  %v1323_v6 = vld.sshfl [vmem:[%s2373_s10] sm:$0x33 pattern:$0x75316420] }
 0x2de   :  { %v475_v10 = vmax.f32 %v471_v7, 0.0  ;;  %v1823_v54 = vpop.permute.xlu1 %1370  ;;  %s1479_s10 = smov 112  }
 0x2df   :  { %1452 = vrsqrt.f32 %v484_v8 }
 0x2e0   :  { %v483_v17 = vadd.f32 1e-05, %v475_v10 }
 0x2e1   :  { %v1817_v48 = vpop.permute.xlu0 %1375 }
 0x2e2   :  { %v1449_v25 = vpop.eup %1448  ;;  %1454 = vrsqrt.f32 %v483_v17  ;;  %v1827_v56 = vpop.permute.xlu1 %1380 }
 0x2e3   :  { %v490_v27 = vmul.f32 %v1449_v25, %v478_v21 }
 0x2e4   :  { %v1451_v28 = vpop.eup %1450 }
 0x2e5   :  { %512 = vperm.xlu1 %1358, %v490_v27   ;;  %v489_v30 = vmul.f32 %v1451_v28, %v477_v26  ;;  %v498_v31 = vmul.f32 %v490_v27, %v422_v20  ;;  %v496_v20 = vld [vmem:[%s2372_s9 + $0x18] sm:$0xff]  ;;  %v676_v28 = vcombine.high %v1323_v6, %v1323_v6 }
 0x2e6   :  { %v1831_v58 = vpop.permute.xlu1 %1390 }
 0x2e7   :  { %507 = vperm.xlu0 %1357, %v489_v30   ;;  %v497_v50 = vmul.f32 %v489_v30, %v421_v41  ;;  %v502_v38 = vsub.f32 %v494_v33, %v498_v31  ;;  %v682_v30 = vsub.s32 %v679_v3, %v681_v5 }
 0x2e9   :  { %v1453_v36 = vpop.eup %1452  ;;  %v501_v37 = vsub.f32 %v493_v32, %v497_v50 }
 0x2ea   :  { %v492_v40 = vmul.f32 %v1453_v36, %v480_v35  ;;  %v1835_v60 = vpop.permute.xlu1 %1405 }
 0x2eb   :  { %543 = vperm.xlu1 %1358, %v501_v37   ;;  %548 = vperm.xlu0 %1357, %v502_v38  }
 0x2ec   :  { %v1455_v19 = vpop.eup %1454  ;;  %v500_v41 = vmul.f32 %v492_v40, %v424_v53  ;;  %v1821_v53 = vpop.permute.xlu0 %1385 }
 0x2ed   :  { %v491_v42 = vmul.f32 %v1455_v19, %v479_v39  ;;  %v1852_v39 = vrot.slane %v1323_v6, %v682_v30 }
 0x2ee   :  { %v504_v13 = vsub.f32 %v496_v20, %v500_v41  ;;  %v1876_v41 = vsub.s32 0, %v681_v5 }
 0x2ef   :  { %517 = vperm.xlu1 %1358, %v491_v42   ;;  %522 = vperm.xlu0 %1357, %v492_v40   ;;  %v499_v14 = vmul.f32 %v491_v42, %v423_v59  ;;  %v1854_v40 = vrot.slane %v676_v28, %v682_v30  ;;  %v1868_v19 = vcombine.high %v1852_v39, %v1852_v39 }
 0x2f0   :  { %v1825_v55 = vpop.permute.xlu0 %1395 }
 0x2f1   :  { %v503_v43 = vsub.f32 %v495_v12, %v499_v14  ;;  %v1872_v20 = vcombine.high %v1854_v40, %v1854_v40  ;;  %v825_v14 = vshrl.u32 %v1868_v19, 16 }
 0x2f3   :  { %553 = vperm.xlu1 %1358, %v503_v43   ;;  %558 = vperm.xlu0 %1357, %v504_v13   ;;  %v832_v13 = vshrl.u32 %v1872_v20, 16  ;;  %v826_v62 = vpack.i.b16 %v825_v14, %v825_v14 }
 0x2f4   :  { %v1829_v57 = vpop.permute.xlu0 %1400 }
 0x2f5   :  { %v833_v63 = vpack.i.b16 %v832_v13, %v832_v13 }
 0x2f7   :  { %1415 = vrot.lane.b32.xlu1 %v2376_v47, %s1477_s1 }
 0x2f8   :  { %v1833_v59 = vpop.permute.xlu0 %1410 }
 0x364   :  { %v513_v0 = vpop.permute.xlu1 %512 }
 0x365   :  { %v529_v7 = vmul.f32 %v513_v0, %v1676_v23  ;;  %v530_v8 = vmul.f32 %v513_v0, %v1682_v29  ;;  %v532_v31 = vmul.f32 %v513_v0, %v1718_v52  ;;  %v531_v23 = vmul.f32 %v513_v0, %v1690_v15 }
 0x366   :  { %v508_v1 = vpop.permute.xlu0 %507  ;;  %v818_v15 = vshrl.u32 %v1854_v40, 16  ;;  %v1893_v0 = vrot.slane %v826_v62, %v1876_v41 }
 0x367   :  { %v525_v10 = vmul.f32 %v508_v1, %v1666_v4  ;;  %v526_v17 = vmul.f32 %v508_v1, %v1669_v9  ;;  %v528_v32 = vmul.f32 %v508_v1, %v1714_v49  ;;  %v527_v29 = vmul.f32 %v508_v1, %v1674_v22 }
 0x368   :  { %v811_v22 = vshrl.u32 %v1852_v39, 16  ;;  %v819_v12 = vpack.i.b16 %v818_v15, %v818_v15  ;;  %v1896_v1 = vrot.slane %v833_v63, %v1876_v41  ;;  %v1363_v63 = vunpack.i.h.bf16 %v1819_v51 }
 0x36a   :  { %v549_v21 = vpop.permute.xlu0 %548  ;;  %v544_v25 = vpop.permute.xlu1 %543  ;;  %v812_v42 = vpack.i.b16 %v811_v22, %v811_v22  ;;  %v1886_v61 = vrot.slane %v819_v12, %v1876_v41  ;;  %v1362_v22 = vunpack.i.l.bf16 %v1819_v51 }
 0x36b   :  { %v565_v26 = vadd.f32 %v549_v21, %v529_v7  ;;  %v566_v27 = vadd.f32 %v549_v21, %v530_v8  ;;  %v561_v33 = vadd.f32 %v544_v25, %v525_v10  ;;  %v562_v50 = vadd.f32 %v544_v25, %v526_v17 }
 0x36c   :  { %v568_v35 = vadd.f32 %v549_v21, %v532_v31  ;;  %v564_v4 = vadd.f32 %v544_v25, %v528_v32  ;;  %v567_v37 = vadd.f32 %v549_v21, %v531_v23  ;;  %v563_v38 = vadd.f32 %v544_v25, %v527_v29 }
 0x36d   :  { %v1848_v36 = vpack.c.bf16 %v565_v26, %v561_v33  ;;  %v1850_v9 = vpack.c.bf16 %v566_v27, %v562_v50  ;;  %v1883_v43 = vrot.slane %v812_v42, %v1876_v41  ;;  %v701_v29 = vpack.i.b16 %v1854_v40, %v1854_v40 }
 0x36e   :  { %v1862_v49 = vpack.c.bf16 %v568_v35, %v564_v4  ;;  %v1864_v52 = vpack.c.bf16 %v567_v37, %v563_v38  ;;  %v523_v3 = vpop.permute.xlu0 %522  ;;  %v518_v5 = vpop.permute.xlu1 %517  ;;  %v2028_v4 = vld [vmem:[%s2369_s6] sm:$0xff]  ;;  %v708_v38 = vpack.i.b16 %v1868_v19, %v1868_v19 }
 0x36f   :  { %625 = vrot.lane.b32.xlu0 %v1850_v9, %s1472_s2  ;;  %623 = vrot.lane.b32.xlu1 %v1848_v36, %s1472_s2  ;;  %v537_v8 = vmul.f32 %v523_v3, %v1700_v11  ;;  %v533_v10 = vmul.f32 %v518_v5, %v1695_v16  ;;  %v539_v25 = vmul.f32 %v523_v3, %v1738_v2 }
 0x370   :  { %v535_v26 = vmul.f32 %v518_v5, %v1751_v24  ;;  %v538_v2 = vmul.f32 %v523_v3, %v1708_v46  ;;  %v534_v24 = vmul.f32 %v518_v5, %v1706_v45  ;;  %v540_v32 = vmul.f32 %v523_v3, %v1748_v18  ;;  %2380 = vst [vmem:[#allocation6_spill] sm:$0xff] %v2028_v4 }
 0x371   :  { %v536_v33 = vmul.f32 %v518_v5, %v1760_v34  ;;  %v694_v18 = vpack.i.b16 %v1852_v39, %v1852_v39  ;;  %v2033_v37 = vrot.slane %v701_v29, %v1876_v41  ;;  %v715_v39 = vpack.i.b16 %v1872_v20, %v1872_v20 }
 0x372   :  { %v559_v6 = vpop.permute.xlu0 %558  ;;  %v554_v7 = vpop.permute.xlu1 %553  ;;  %v1325_v40 = vcombine.high %v2028_v4, %v2028_v4  ;;  %v2051_v13 = vrot.slane %v708_v38, %v1876_v41  ;;  %v1402_v38 = vunpack.i.l.bf16 %v1829_v57 }
 0x373   :  { %652 = vrot.lane.b32.xlu0 %v1862_v49, %s1472_s2  ;;  %650 = vrot.lane.b32.xlu1 %v1864_v52, %s1472_s2  ;;  %v573_v17 = vadd.f32 %v559_v6, %v537_v8  ;;  %v569_v21 = vadd.f32 %v554_v7, %v533_v10  ;;  %v575_v11 = vadd.f32 %v559_v6, %v539_v25  ;;  %v1382_v25 = vunpack.i.l.bf16 %v1827_v56 }
 0x374   :  { %v571_v16 = vadd.f32 %v554_v7, %v535_v26  ;;  %v574_v30 = vadd.f32 %v559_v6, %v538_v2  ;;  %v570_v31 = vadd.f32 %v554_v7, %v534_v24  ;;  %v576_v50 = vadd.f32 %v559_v6, %v540_v32  ;;  %1146 = vmatprep.mubr.bf16.mxu0 %v1325_v40 }
 0x375   :  { %v1930_v27 = vpack.c.bf16 %v573_v17, %v569_v21  ;;  %v572_v23 = vadd.f32 %v554_v7, %v536_v33  ;;  %v2023_v35 = vrot.slane %v694_v18, %v1876_v41  ;;  %1228 = vmatprep.mubr.bf16.mxu1 %v1325_v40  ;;  %v2054_v62 = vrot.slane %v715_v39, %v1876_v41 }
 0x376   :  { %v1936_v28 = vpack.c.bf16 %v575_v11, %v571_v16  ;;  %v1954_v46 = vpack.c.bf16 %v574_v30, %v570_v31  ;;  %v2016_v34 = vpop.permute.xlu1 %1415  ;;  %v1383_v24 = vunpack.i.h.bf16 %v1827_v56  ;;  %v1094_v31 = vld [vmem:[%s2370_s7] sm:$0xff]  ;;  %v1388_v2 = vunpack.i.h.bf16 %v1821_v53 }
 0x377   :  { %733 = vrot.lane.b32.xlu0 %v1850_v9, %s1473_s29  ;;  %731 = vrot.lane.b32.xlu1 %v1848_v36, %s1473_s29  ;;  %v1960_v45 = vpack.c.bf16 %v576_v50, %v572_v23  ;;  %v1368_v50 = vunpack.i.h.bf16 %v1815_v44 }
 0x37b   :  { %754 = vrot.lane.b32.xlu0 %v1862_v49, %s1473_s29  ;;  %752 = vrot.lane.b32.xlu1 %v1864_v52, %s1473_s29 }
 0x37f   :  { %774 = vrot.lane.b32.xlu0 %v1850_v9, %s1474_s11  ;;  %772 = vrot.lane.b32.xlu1 %v1848_v36, %s1474_s11 }
 0x383   :  { %795 = vrot.lane.b32.xlu0 %v1862_v49, %s1474_s11  ;;  %793 = vrot.lane.b32.xlu1 %v1864_v52, %s1474_s11 }
 0x387   :  { %851 = vrot.lane.b32.xlu0 %v1850_v9, %s1475_s30  ;;  %849 = vrot.lane.b32.xlu1 %v1848_v36, %s1475_s30 }
 0x38b   :  { %872 = vrot.lane.b32.xlu0 %v1862_v49, %s1475_s30  ;;  %870 = vrot.lane.b32.xlu1 %v1864_v52, %s1475_s30 }
 0x38f   :  { %902 = vrot.lane.b32.xlu0 %v1848_v36, %s1476_s0  ;;  %904 = vrot.lane.b32.xlu1 %v1850_v9, %s1476_s0 }
 0x393   :  { %953 = vrot.lane.b32.xlu0 %v1848_v36, %s1477_s1  ;;  %927 = vrot.lane.b32.xlu1 %v1862_v49, %s1476_s0 }
 0x397   :  { %629 = vrot.lane.b32.xlu0 %v1930_v27, %s1472_s2  ;;  %925 = vrot.lane.b32.xlu1 %v1864_v52, %s1476_s0 }
 0x39b   :  { %656 = vrot.lane.b32.xlu0 %v1936_v28, %s1472_s2  ;;  %955 = vrot.lane.b32.xlu1 %v1850_v9, %s1477_s1 }
 0x39f   :  { %737 = vrot.lane.b32.xlu0 %v1930_v27, %s1473_s29  ;;  %976 = vrot.lane.b32.xlu1 %v1862_v49, %s1477_s1 }
 0x3a3   :  { %758 = vrot.lane.b32.xlu0 %v1936_v28, %s1473_s29  ;;  %974 = vrot.lane.b32.xlu1 %v1864_v52, %s1477_s1 }
 0x3a7   :  { %778 = vrot.lane.b32.xlu0 %v1930_v27, %s1474_s11  ;;  %631 = vrot.lane.b32.xlu1 %v1954_v46, %s1472_s2 }
 0x3ab   :  { %799 = vrot.lane.b32.xlu0 %v1936_v28, %s1474_s11  ;;  %658 = vrot.lane.b32.xlu1 %v1960_v45, %s1472_s2 }
 0x3af   :  { %855 = vrot.lane.b32.xlu0 %v1930_v27, %s1475_s30  ;;  %739 = vrot.lane.b32.xlu1 %v1954_v46, %s1473_s29 }
 0x3b3   :  { %876 = vrot.lane.b32.xlu0 %v1936_v28, %s1475_s30  ;;  %760 = vrot.lane.b32.xlu1 %v1960_v45, %s1473_s29 }
 0x3b7   :  { %1420 = vrot.lane.b32.xlu0 %v2376_v47, %s1479_s10  ;;  %780 = vrot.lane.b32.xlu1 %v1954_v46, %s1474_s11 }
 0x3bb   :  { %1002 = vrot.lane.b32.xlu0 %v1848_v36, %s1479_s10  ;;  %801 = vrot.lane.b32.xlu1 %v1960_v45, %s1474_s11 }
 0x3bf   :  { %910 = vrot.lane.b32.xlu0 %v1954_v46, %s1476_s0  ;;  %857 = vrot.lane.b32.xlu1 %v1954_v46, %s1475_s30 }
 0x3c3   :  { %933 = vrot.lane.b32.xlu0 %v1960_v45, %s1476_s0  ;;  %878 = vrot.lane.b32.xlu1 %v1960_v45, %s1475_s30  ;;  %s1329_s30 = sld [smem:[#allocation3 + $0x1]] }
 0x3c7   :  { %1430 = vrot.lane.b32.xlu0 %v2376_v47, %s1480_s26  ;;  %1004 = vrot.lane.b32.xlu1 %v1850_v9, %s1479_s10 }
 0x3cb   :  { %931 = vrot.lane.b32.xlu0 %v1936_v28, %s1476_s0  ;;  %1025 = vrot.lane.b32.xlu1 %v1862_v49, %s1479_s10 }
 0x3cf   :  { %961 = vrot.lane.b32.xlu0 %v1954_v46, %s1477_s1  ;;  %1023 = vrot.lane.b32.xlu1 %v1864_v52, %s1479_s10 }
 0x3d3   :  { %982 = vrot.lane.b32.xlu0 %v1960_v45, %s1477_s1  ;;  %1425 = vrot.lane.b32.xlu1 %v2376_v47, %s1479_s10 }
 0x3d7   :  { %1043 = vrot.lane.b32.xlu0 %v1848_v36, %s1480_s26  ;;  %908 = vrot.lane.b32.xlu1 %v1930_v27, %s1476_s0 }
 0x3db   :  { %980 = vrot.lane.b32.xlu0 %v1936_v28, %s1477_s1  ;;  %1045 = vrot.lane.b32.xlu1 %v1850_v9, %s1480_s26 }
 0x3df   :  { %1010 = vrot.lane.b32.xlu0 %v1954_v46, %s1479_s10  ;;  %959 = vrot.lane.b32.xlu1 %v1930_v27, %s1477_s1 }
 0x3e1   :  { %v626_v15 = vpop.permute.xlu0 %625  ;;  %v624_v42 = vpop.permute.xlu1 %623 }
 0x3e2   :  { %v634_v12 = vsel %vm633_vm3, %v1362_v22, %v624_v42  ;;  %v635_v14 = vsel %vm633_vm3, %v624_v42, %v626_v15  ;;  %v1403_v42 = vunpack.i.h.bf16 %v1829_v57 }
 0x3e3   :  { %1031 = vrot.lane.b32.xlu0 %v1960_v45, %s1479_s10  ;;  %v721_v19 = vmul.bf16 %v2023_v35, %v634_v12  ;;  %v722_v20 = vmul.bf16 %v2033_v37, %v635_v14  ;;  %1066 = vrot.lane.b32.xlu1 %v1862_v49, %s1480_s26 }
 0x3e5   :  { %v653_v3 = vpop.permute.xlu0 %652  ;;  %1114 = vmatprep.subr.bf16.mxu0 %v722_v20  ;;  %v651_v5 = vpop.permute.xlu1 %650 }
 0x3e6   :  { %v660_v6 = vsel %vm633_vm3, %v1363_v63, %v651_v5  ;;  %v661_v7 = vsel %vm633_vm3, %v651_v5, %v653_v3  ;;  %1115 = vmatpush1.bf16.msra.mxu0 %v721_v19 }
 0x3e7   :  { %1029 = vrot.lane.b32.xlu0 %v1936_v28, %s1479_s10  ;;  %v723_v8 = vmul.bf16 %v2051_v13, %v660_v6  ;;  %v724_v10 = vmul.bf16 %v2054_v62, %v661_v7  ;;  %1008 = vrot.lane.b32.xlu1 %v1930_v27, %s1479_s10 }
 0x3e9   :  { %v2065_v41 = vpop.permute.xlu0 %733  ;;  %1196 = vmatprep.subr.bf16.mxu1 %v724_v10  ;;  %v2067_v51 = vpop.permute.xlu1 %731 }
 0x3ea   :  { %1197 = vmatpush1.bf16.msra.mxu1 %v723_v8 }
 0x3eb   :  { %1051 = vrot.lane.b32.xlu0 %v1954_v46, %s1480_s26  ;;  %1064 = vrot.lane.b32.xlu1 %v1864_v52, %s1480_s26 }
 0x3ed   :  { %v2073_v17 = vpop.permute.xlu0 %754  ;;  %v2075_v21 = vpop.permute.xlu1 %752 }
 0x3ef   :  { %1072 = vrot.lane.b32.xlu0 %v1960_v45, %s1480_s26  ;;  %1435 = vrot.lane.b32.xlu1 %v2376_v47, %s1480_s26 }
 0x3f1   :  { %v2082_v26 = vpop.permute.xlu0 %774  ;;  %v2084_v11 = vpop.permute.xlu1 %772 }
 0x3f2   :  { %v2088_v16 = vsel %vm782_vm4, %v1382_v25, %v2084_v11 }
 0x3f3   :  { %1070 = vrot.lane.b32.xlu0 %v1936_v28, %s1480_s26  ;;  %1049 = vrot.lane.b32.xlu1 %v1930_v27, %s1480_s26 }
 0x3f5   :  { %v2097_v30 = vpop.permute.xlu0 %795  ;;  %v2102_v32 = vpop.permute.xlu1 %793 }
 0x3f6   :  { %v2106_v33 = vsel %vm782_vm4, %v1383_v24, %v2102_v32  ;;  %v1367_v24 = vunpack.i.l.bf16 %v1815_v44 }
 0x3f7   :  { %1097 = vperm.xlu1 %1358, %v1094_v31   ;;  %v1387_v31 = vunpack.i.l.bf16 %v1821_v53  ;;  %v743_v53 = vsel %vm741_vm7, %v2067_v51, %v2065_v41 }
 0x3f9   :  { %v2110_v23 = vpop.permute.xlu0 %851  ;;  %v2112_v18 = vpop.permute.xlu1 %849 }
 0x3fd   :  { %v2114_v56 = vpop.permute.xlu0 %872  ;;  %v2116_v29 = vpop.permute.xlu1 %870 }
 0x401   :  { %v2119_v39 = vpop.permute.xlu0 %902  ;;  %v2121_v40 = vpop.permute.xlu1 %904 }
 0x402   :  { %v2125_v22 = vsel %vm914_vm5, %v2121_v40, %v1402_v38 }
 0x405   :  { %v954_v12 = vpop.permute.xlu0 %953  ;;  %v2130_v14 = vpop.permute.xlu1 %927 }
 0x406   :  { %v2134_v19 = vsel %vm914_vm5, %v2130_v14, %v1403_v42 }
 0x409   :  { %v630_v63 = vpop.permute.xlu0 %629  ;;  %v2138_v3 = vpop.permute.xlu1 %925 }
 0x40a   :  { %v636_v42 = vsel %vm633_vm3, %v1367_v24, %v630_v63 }
 0x40d   :  { %v657_v5 = vpop.permute.xlu0 %656  ;;  %v2140_v6 = vpop.permute.xlu1 %955 }
 0x40e   :  { %2381 = vst [vmem:[#allocation7_spill] sm:$0xff] %v2140_v6  ;;  %v2144_v57 = vsel %vm965_vm6, %v954_v12, %v2140_v6  ;;  %v662_v24 = vsel %vm633_vm3, %v1368_v50, %v657_v5 }
 0x40f   :  { %2382 = vst [vmem:[#allocation8_spill] sm:$0xff] %v2144_v57  ;;  %v725_v57 = vmul.bf16 %v2023_v35, %v636_v42 }
 0x411   :  { %v738_v7 = vpop.permute.xlu0 %737  ;;  %v2146_v8 = vpop.permute.xlu1 %976 }
 0x415   :  { %v759_v10 = vpop.permute.xlu0 %758  ;;  %v2148_v25 = vpop.permute.xlu1 %974 }
 0x416   :  { %2383 = vst [vmem:[#allocation9_spill] sm:$0xff] %v2148_v25 }
 0x419   :  { %v779_v38 = vpop.permute.xlu0 %778  ;;  %v632_v20 = vpop.permute.xlu1 %631 }
 0x41a   :  { %v2154_v47 = vsel %vm782_vm4, %v1387_v31, %v779_v38  ;;  %v637_v15 = vsel %vm633_vm3, %v630_v63, %v632_v20 }
 0x41b   :  { %v843_v12 = vmul.bf16 %v1883_v43, %v2154_v47  ;;  %v726_v4 = vmul.bf16 %v2033_v37, %v637_v15  ;;  %v1372_v15 = vunpack.i.l.bf16 %v1823_v54 }
 0x41d   :  { %v800_v25 = vpop.permute.xlu0 %799  ;;  %v659_v6 = vpop.permute.xlu1 %658  ;;  %1116 = vmatprep.subr.bf16.mxu0 %v726_v4  ;;  %v742_v4 = vsel %vm741_vm7, %v1372_v15, %v2067_v51  ;;  %v804_v15 = vsel %vm782_vm4, %v2102_v32, %v2097_v30  ;;  %v861_v30 = vsel %vm859_vm8, %v2112_v18, %v2110_v23 }
 0x41e   :  { %v2165_v31 = vsel %vm782_vm4, %v1388_v2, %v800_v25  ;;  %v663_v44 = vsel %vm633_vm3, %v657_v5, %v659_v6  ;;  %1117 = vmatpush1.bf16.msra.mxu0 %v725_v57  ;;  %v727_v2 = vmul.bf16 %v2051_v13, %v662_v24  ;;  %v784_v5 = vsel %vm782_vm4, %v2084_v11, %v2082_v26 }
 0x41f   :  { %v845_v20 = vmul.bf16 %v1893_v0, %v2165_v31  ;;  %v728_v63 = vmul.bf16 %v2054_v62, %v663_v44  ;;  %1118 = vmatprep.subr.bf16.mxu0 %v743_v53  ;;  %v763_v6 = vsel %vm741_vm7, %v2075_v21, %v2073_v17  ;;  %v1377_v57 = vunpack.i.l.bf16 %v1817_v48 }
 0x420   :  { %v1373_v24 = vunpack.i.h.bf16 %v1823_v54  ;;  %v840_v26 = vmul.bf16 %v1886_v61, %v784_v5  ;;  %v1378_v54 = vunpack.i.h.bf16 %v1817_v48  ;;  %v1392_v48 = vunpack.i.l.bf16 %v1831_v58 }
 0x421   :  { %v856_v50 = vpop.permute.xlu0 %855  ;;  %v740_v42 = vpop.permute.xlu1 %739  ;;  %1198 = vmatprep.subr.bf16.mxu1 %v728_v63  ;;  %v744_v11 = vsel %vm741_vm7, %v1377_v57, %v738_v7  ;;  %v1393_v57 = vunpack.i.h.bf16 %v1831_v58  ;;  %v1398_v58 = vunpack.i.h.bf16 %v1825_v55 }
 0x422   :  { %1119 = vmatpush1.bf16.msra.mxu0 %v742_v4  ;;  %1199 = vmatpush1.bf16.msra.mxu1 %v727_v2  ;;  %v745_v41 = vsel %vm741_vm7, %v738_v7, %v740_v42  ;;  %v762_v44 = vsel %vm741_vm7, %v1373_v24, %v2075_v21  ;;  %v842_v21 = vmul.bf16 %v1896_v1, %v804_v15 }
 0x423   :  { %1120 = vmatprep.subr.bf16.mxu0 %v745_v41  ;;  %1200 = vmatprep.subr.bf16.mxu1 %v763_v6  ;;  %v764_v7 = vsel %vm741_vm7, %v1378_v54, %v759_v10  ;;  %v2384_v4 = vmul.bf16 %v1883_v43, %v2088_v16  ;;  %v889_v41 = vmul.bf16 %v861_v30, %v2033_v37 }
 0x424   :  { %v881_v16 = vsel %vm859_vm8, %v2116_v29, %v2114_v56  ;;  %v2385_v6 = vmul.bf16 %v1893_v0, %v2106_v33 }
 0x425   :  { %v877_v51 = vpop.permute.xlu0 %876  ;;  %v761_v53 = vpop.permute.xlu1 %760  ;;  %v891_v47 = vmul.bf16 %v881_v16, %v2054_v62 }
 0x426   :  { %1121 = vmatpush1.bf16.msra.mxu0 %v744_v11  ;;  %1201 = vmatpush1.bf16.msra.mxu1 %v762_v44  ;;  %v765_v17 = vsel %vm741_vm7, %v759_v10, %v761_v53  ;;  %v860_v10 = vsel %vm859_vm8, %v1392_v48, %v2112_v18  ;;  %v1397_v18 = vunpack.i.l.bf16 %v1825_v55 }
 0x427   :  { %1122 = vmatprep.subr.bf16.mxu0 %v840_v26  ;;  %1202 = vmatprep.subr.bf16.mxu1 %v765_v17  ;;  %v888_v44 = vmul.bf16 %v860_v10, %v2023_v35  ;;  %v882_v17 = vsel %vm859_vm8, %v1398_v58, %v877_v51 }
 0x428   :  { %v894_v55 = vmul.bf16 %v882_v17, %v2051_v13 }
 0x429   :  { %v2196_v63 = vpop.permute.xlu0 %1420  ;;  %v781_v2 = vpop.permute.xlu1 %780 }
 0x42a   :  { %v786_v32 = vsel %vm782_vm4, %v779_v38, %v781_v2  ;;  %1123 = vmatpush1.bf16.msra.mxu0 %v2384_v4  ;;  %1203 = vmatpush1.bf16.msra.mxu1 %v764_v7 }
 0x42b   :  { %v844_v42 = vmul.bf16 %v1886_v61, %v786_v32  ;;  %1204 = vmatprep.subr.bf16.mxu1 %v842_v21 }
 0x42d   :  { %v2209_v5 = vpop.permute.xlu0 %1002  ;;  %v802_v23 = vpop.permute.xlu1 %801  ;;  %1124 = vmatprep.subr.bf16.mxu0 %v844_v42 }
 0x42e   :  { %v806_v38 = vsel %vm782_vm4, %v800_v25, %v802_v23  ;;  %1125 = vmatpush1.bf16.msra.mxu0 %v843_v12  ;;  %1205 = vmatpush1.bf16.msra.mxu1 %v2385_v6  ;;  %v880_v25 = vsel %vm859_vm8, %v1393_v57, %v2116_v29  ;;  %v862_v12 = vsel %vm859_vm8, %v1397_v18, %v856_v50  ;;  %v2388_v23 = vld [vmem:[#allocation7_spill] sm:$0xff]  ;;  %v2389_v6 = vld [vmem:[#allocation9_spill] sm:$0xff] }
 0x42f   :  { %v846_v24 = vmul.bf16 %v1896_v1, %v806_v38  ;;  %1126 = vmatprep.subr.bf16.mxu0 %v889_v41  ;;  %v890_v29 = vmul.bf16 %v880_v25, %v2051_v13  ;;  %v892_v53 = vmul.bf16 %v862_v12, %v2023_v35  ;;  %v986_v18 = vsel %vm965_vm6, %v2389_v6, %v2146_v8 }
 0x430   :  { %v996_v12 = vmul.bf16 %v986_v18, %v2051_v13 }
 0x431   :  { %v2228_v56 = vpop.permute.xlu0 %910  ;;  %v858_v33 = vpop.permute.xlu1 %857  ;;  %1206 = vmatprep.subr.bf16.mxu1 %v846_v24 }
 0x432   :  { %v863_v26 = vsel %vm859_vm8, %v856_v50, %v858_v33  ;;  %1127 = vmatpush1.bf16.msra.mxu0 %v888_v44  ;;  %1207 = vmatpush1.bf16.msra.mxu1 %v845_v20  ;;  %v1417_v44 = vunpack.i.l.bf16 %v2016_v34 }
 0x433   :  { %v893_v11 = vmul.bf16 %v863_v26, %v2033_v37  ;;  %1208 = vmatprep.subr.bf16.mxu1 %v891_v47 }
 0x435   :  { %v934_v15 = vpop.permute.xlu0 %933  ;;  %v879_v54 = vpop.permute.xlu1 %878  ;;  %1128 = vmatprep.subr.bf16.mxu0 %v893_v11 }
 0x436   :  { %v883_v50 = vsel %vm859_vm8, %v877_v51, %v879_v54  ;;  %1129 = vmatpush1.bf16.msra.mxu0 %v892_v53  ;;  %1209 = vmatpush1.bf16.msra.mxu1 %v890_v29  ;;  %v1407_v51 = vunpack.i.l.bf16 %v1835_v60  ;;  %v1423_v53 = vunpack.i.h.bf16 %v2196_v63 }
 0x437   :  { %v895_v31 = vmul.bf16 %v883_v50, %v2054_v62  ;;  %1130 = vmatprep.subr.bf16.mxu0 %v1850_v9  ;;  %v915_v9 = vsel %vm914_vm5, %v2119_v39, %v2121_v40  ;;  %v937_v40 = vsel %vm914_vm5, %v2138_v3, %v2130_v14  ;;  %v1422_v50 = vunpack.i.l.bf16 %v2196_v63 }
 0x438   :  { %v918_v30 = vsel %vm914_vm5, %v2228_v56, %v1407_v51 }
 0x439   :  { %v2247_v20 = vpop.permute.xlu0 %1430  ;;  %v2249_v21 = vpop.permute.xlu1 %1004  ;;  %1210 = vmatprep.subr.bf16.mxu1 %v895_v31  ;;  %v950_v32 = vmul.bf16 %v918_v30, %v1886_v61 }
 0x43a   :  { %1131 = vmatpush1.bf16.msra.mxu0 %v1848_v36  ;;  %1211 = vmatpush1.bf16.msra.mxu1 %v894_v55  ;;  %v2386_v36 = vmul.bf16 %v2125_v22, %v1886_v61  ;;  %v947_v22 = vmul.bf16 %v937_v40, %v1893_v0  ;;  %v1016_v30 = vsel %vm1014_vm9, %v2249_v21, %v1422_v50 }
 0x43b   :  { %1132 = vmatprep.subr.bf16.mxu0 %v1954_v46  ;;  %1212 = vmatprep.subr.bf16.mxu1 %v1862_v49  ;;  %v1408_v49 = vunpack.i.h.bf16 %v1835_v60  ;;  %v945_v46 = vmul.bf16 %v915_v9, %v1883_v43  ;;  %v1413_v60 = vunpack.i.h.bf16 %v1833_v59 }
 0x43d   :  { %v932_v7 = vpop.permute.xlu0 %931  ;;  %v2258_v2 = vpop.permute.xlu1 %1025  ;;  %v987_v42 = vsel %vm965_vm6, %v2146_v8, %v1413_v60 }
 0x43e   :  { %1133 = vmatpush1.bf16.msra.mxu0 %v1930_v27  ;;  %1213 = vmatpush1.bf16.msra.mxu1 %v1864_v52  ;;  %v940_v52 = vsel %vm914_vm5, %v934_v15, %v1408_v49  ;;  %v939_v3 = vsel %vm914_vm5, %v932_v7, %v934_v15  ;;  %v997_v38 = vmul.bf16 %v987_v42, %v2054_v62 }
 0x43f   :  { %1134 = vmatprep.subr.bf16.mxu0 %v2386_v36  ;;  %1214 = vmatprep.subr.bf16.mxu1 %v1960_v45  ;;  %v2387_v45 = vmul.bf16 %v2134_v19, %v1896_v1  ;;  %v952_v14 = vmul.bf16 %v940_v52, %v1896_v1  ;;  %v1418_v19 = vunpack.i.h.bf16 %v2016_v34  ;;  %v951_v10 = vmul.bf16 %v939_v3, %v1893_v0  ;;  %v2390_v34 = vld [vmem:[#allocation8_spill] sm:$0xff] }
 0x440   :  { %v994_v29 = vmul.bf16 %v2390_v34, %v2023_v35  ;;  %v2392_v3 = vmov 0  }
 0x441   :  { %v962_v39 = vpop.permute.xlu0 %961  ;;  %v1024_v27 = vpop.permute.xlu1 %1023 }
 0x442   :  { %1135 = vmatpush1.bf16.msra.mxu0 %v945_v46  ;;  %1215 = vmatpush1.bf16.msra.mxu1 %v1936_v28  ;;  %v1412_v28 = vunpack.i.l.bf16 %v1833_v59  ;;  %v969_v26 = vsel %vm965_vm6, %v962_v39, %v1417_v44  ;;  %v1035_v7 = vsel %vm1014_vm9, %v1024_v27, %v2258_v2 }
 0x443   :  { %1136 = vmatprep.subr.bf16.mxu0 %v950_v32  ;;  %1216 = vmatprep.subr.bf16.mxu1 %v2387_v45  ;;  %v999_v15 = vmul.bf16 %v969_v26, %v2033_v37 }
 0x444   :  { %v967_v16 = vsel %vm965_vm6, %v2388_v23, %v1412_v28 }
 0x445   :  { %v983_v4 = vpop.permute.xlu0 %982  ;;  %v2283_v48 = vpop.permute.xlu1 %1425  ;;  %v995_v47 = vmul.bf16 %v967_v16, %v2033_v37  ;;  %v1433_v37 = vunpack.i.h.bf16 %v2247_v20 }
 0x446   :  { %1217 = vmatpush1.bf16.msra.mxu1 %v947_v22  ;;  %v989_v24 = vsel %vm965_vm6, %v983_v4, %v1418_v19  ;;  %v1428_v31 = vunpack.i.h.bf16 %v2283_v48  ;;  %v1427_v49 = vunpack.i.l.bf16 %v2283_v48 }
 0x447   :  { %1218 = vmatprep.subr.bf16.mxu1 %v952_v14  ;;  %v1001_v8 = vmul.bf16 %v989_v24, %v2054_v62 }
 0x449   :  { %v2290_v41 = vpop.permute.xlu0 %1043  ;;  %v909_v57 = vpop.permute.xlu1 %908 }
 0x44a   :  { %v917_v59 = vsel %vm914_vm5, %v909_v57, %v2228_v56  ;;  %1219 = vmatpush1.bf16.msra.mxu1 %v951_v10 }
 0x44b   :  { %v949_v25 = vmul.bf16 %v917_v59, %v1883_v43  ;;  %1220 = vmatprep.subr.bf16.mxu1 %v997_v38 }
 0x44d   :  { %v981_v33 = vpop.permute.xlu0 %980  ;;  %v1046_v11 = vpop.permute.xlu1 %1045  ;;  %1137 = vmatpush1.bf16.msra.mxu0 %v949_v25 }
 0x44e   :  { %v988_v58 = vsel %vm965_vm6, %v981_v33, %v983_v4  ;;  %1138 = vmatprep.subr.bf16.mxu0 %v995_v47  ;;  %1221 = vmatpush1.bf16.msra.mxu1 %v996_v12  ;;  %v1443_v47 = vld [vmem:[%s2369_s6 + $0x8] ss:$0 sps:$4 sm:$0xff]  }
 0x44f   :  { %v1000_v56 = vmul.bf16 %v988_v58, %v2051_v13  ;;  %1222 = vmatprep.subr.bf16.mxu1 %v1001_v8  ;;  %v1036_v13 = vsel %vm1014_vm9, %v2258_v2, %v1423_v53  ;;  %v1015_v2 = vsel %vm1014_vm9, %v2209_v5, %v2249_v21  ;;  %v1056_v5 = vsel %vm1055_vm10, %v2290_v41, %v1046_v11 }
 0x450   :  { %v1084_v48 = vmul.bf16 %v1056_v5, %v1883_v43 }
 0x451   :  { %v1011_v17 = vpop.permute.xlu0 %1010  ;;  %v960_v54 = vpop.permute.xlu1 %959  ;;  %1139 = vmatpush1.bf16.msra.mxu0 %v994_v29 }
 0x452   :  { %v968_v62 = vsel %vm965_vm6, %v960_v54, %v962_v39  ;;  %1140 = vmatprep.subr.bf16.mxu0 %v999_v15  ;;  %1223 = vmatpush1.bf16.msra.mxu1 %v1000_v56  ;;  %v2391_v39 = vld [vmem:[#allocation6_spill] sm:$0xff] }
 0x453   :  { %v998_v55 = vmul.bf16 %v968_v62, %v2023_v35  ;;  %1224 = vmatprep.subr.bf16.mxu1 %v1036_v13  ;;  %v1432_v35 = vunpack.i.l.bf16 %v2247_v20  ;;  %v1324_v40 = vcombine.low %v2391_v39, %v2391_v39  ;;  %v1018_v20 = vsel %vm1014_vm9, %v1011_v17, %v1427_v49 }
 0x455   :  { %v1032_v51 = vpop.permute.xlu0 %1031  ;;  %v1067_v9 = vpop.permute.xlu1 %1066  ;;  %1141 = vmatpush1.bf16.msra.mxu0 %v998_v55  ;;  %v1057_v32 = vsel %vm1055_vm10, %v1046_v11, %v1432_v35 }
 0x456   :  { %v1038_v36 = vsel %vm1014_vm9, %v1032_v51, %v1428_v31  ;;  %v1077_v63 = vsel %vm1055_vm10, %v1067_v9, %v1433_v37  ;;  %1142 = vmatprep.subr.bf16.mxu0 %v1016_v30  ;;  %1225 = vmatpush1.bf16.msra.mxu1 %v1035_v7  ;;  %v1085_v21 = vmul.bf16 %v1057_v32, %v1886_v61 }
 0x457   :  { %1226 = vmatprep.subr.bf16.mxu1 %v1038_v36  ;;  %v1087_v27 = vmul.bf16 %v1077_v63, %v1896_v1 }
 0x459   :  { %v1030_v46 = vpop.permute.xlu0 %1029  ;;  %v1009_v45 = vpop.permute.xlu1 %1008  ;;  %1143 = vmatpush1.bf16.msra.mxu0 %v1015_v2 }
 0x45a   :  { %v1037_v52 = vsel %vm1014_vm9, %v1030_v46, %v1032_v51  ;;  %1144 = vmatprep.subr.bf16.mxu0 %v1018_v20  ;;  %v1017_v60 = vsel %vm1014_vm9, %v1009_v45, %v1011_v17 }
 0x45b   :  { %1227 = vmatpush1.bf16.msra.mxu1 %v1037_v52 }
 0x45c   :  { %1237 = vmatprep.subr.bf16.mxu1 %v1087_v27 }
 0x45d   :  { %v1052_v22 = vpop.permute.xlu0 %1051  ;;  %v1065_v4 = vpop.permute.xlu1 %1064  ;;  %1145 = vmatpush1.bf16.msra.mxu0 %v1017_v60 }
 0x45e   :  { %1229 = vmatmul.mubr.bf16.vlgmr.msra.gmra.mrb[8].mxu1 %v1324_v40  ;;  %v1076_v14 = vsel %vm1055_vm10, %v1065_v4, %v1067_v9  ;;  %1155 = vmatprep.subr.bf16.mxu0 %v1085_v21 }
 0x45f   :  { %1269 = vmatprep.mubr.bf16.mxu1 %v2392_v3  ;;  %v1086_v42 = vmul.bf16 %v1076_v14, %v1893_v0 }
 0x460   :  { %1147 = vmatmul.mubr.bf16.vlgmr.msra.gmra.mrb[8].mxu0 %v1324_v40 }
 0x461   :  { %v1073_v28 = vpop.permute.xlu0 %1072  ;;  %v1436_v19 = vpop.permute.xlu1 %1435  ;;  %1156 = vmatpush1.bf16.msra.mxu0 %v1084_v48  ;;  %1238 = vmatpush1.bf16.msra.mxu1 %v1086_v42 }
 0x462   :  { %v1438_v10 = vunpack.i.h.bf16 %v1436_v19  ;;  %v1437_v41 = vunpack.i.l.bf16 %v1436_v19  ;;  %1187 = vmatprep.mubr.bf16.mxu0 %v2392_v3 }
 0x464   :  { %v1059_v16 = vsel %vm1055_vm10, %v1052_v22, %v1437_v41  ;;  %v1079_v38 = vsel %vm1055_vm10, %v1073_v28, %v1438_v10 }
 0x465   :  { %v1071_v23 = vpop.permute.xlu0 %1070  ;;  %v1050_v18 = vpop.permute.xlu1 %1049  ;;  %v1089_v57 = vmul.bf16 %v1059_v16, %v1886_v61  ;;  %v1091_v24 = vmul.bf16 %v1079_v38, %v1896_v1  ;;  %v1283_v1 = vstv %s1329_s30 }
 0x466   :  { %v1078_v6 = vsel %vm1055_vm10, %v1071_v23, %v1073_v28  ;;  %v1058_v44 = vsel %vm1055_vm10, %v1050_v18, %v1052_v22 }
 0x467   :  { %v1090_v59 = vmul.bf16 %v1078_v6, %v1893_v0  ;;  %v1088_v25 = vmul.bf16 %v1058_v44, %v1883_v43  ;;  %1157 = vmatprep.subr.bf16.mxu0 %v1089_v57  ;;  %1239 = vmatprep.subr.bf16.mxu1 %v1091_v24 }
 0x469   :  { %1240 = vmatpush1.bf16.msra.mxu1 %v1090_v59  ;;  %1158 = vmatpush1.bf16.msra.mxu0 %v1088_v25 }
 0x46c   :  { %1328 = vmatmul.mubr.msk.bf16.vlgmr.msra.gmra.mrb[8].mxu1 %vm1110_vm11, %v1443_v47  ;;  %1327 = vmatmul.mubr.msk.bf16.vlgmr.msra.gmra.mrb[8].mxu0 %vm1110_vm11, %v1443_v47 }
 0x476   :  { %v1098_v61 = vpop.permute.xlu1 %1097 }
 0x53f   :  { %v1271_v12 = vpop.f32.mrb[8].mxu1  ;;  %v1189_v0 = vpop.f32.mrb[8].mxu0 }
 0x540   :  { %v1336_v33 = vadd.f32 %v1271_v12, %v1098_v61  ;;  %v1273_v26 = vpop.f32.mrb[9].mxu1  ;;  %v1334_v8 = vadd.f32 %v1189_v0, %v1098_v61  ;;  %v1191_v43 = vpop.f32.mrb[9].mxu0 }
 0x541   :  { %v1337_v58 = vadd.f32 %v1273_v26, %v1098_v61  ;;  %v1275_v11 = vpop.f32.mrb[10].mxu1  ;;  %v1335_v34 = vadd.f32 %v1191_v43, %v1098_v61  ;;  %v1193_v29 = vpop.f32.mrb[10].mxu0 }
 0x542   :  { %vm1281_vm12 = vcmp.gt.f32.partialorder %v1336_v33, 0.0  ;;  %v1286_v56 = vmul.f32 %v1336_v33, %v1283_v1  ;;  %v1276_v53 = vpop.f32.mrb[11].mxu1  ;;  %vm1279_vm13 = vcmp.gt.f32.partialorder %v1334_v8, 0.0  ;;  %v1284_v15 = vmul.f32 %v1334_v8, %v1283_v1  ;;  %v1194_v54 = vpop.f32.mrb[11].mxu0 }
 0x543   :  { %vm1282_vm14 = vcmp.gt.f32.partialorder %v1337_v58, 0.0  ;;  %v1287_v17 = vmul.f32 %v1337_v58, %v1283_v1  ;;  %vm1280_vm15 = vcmp.gt.f32.partialorder %v1335_v34, 0.0  ;;  %v1285_v13 = vmul.f32 %v1335_v34, %v1283_v1 }
 0x544   :  { %v1290_v62 = vsel %vm1281_vm12, %v1336_v33, %v1286_v56  ;;  %v1288_v50 = vsel %vm1279_vm13, %v1334_v8, %v1284_v15 }
 0x545   :  { %v1291_v31 = vsel %vm1282_vm14, %v1337_v58, %v1287_v17  ;;  %v1289_v55 = vsel %vm1280_vm15, %v1335_v34, %v1285_v13 }
 0x546   :  { %v1333_v37 = vpack.c.bf16 %v1291_v31, %v1290_v62  ;;  %v1332_v51 = vpack.c.bf16 %v1289_v55, %v1288_v50 }
 0x548   :  { %1309 = vst [vmem:[%s2375_s12 + $0x8] sm:$0xff] %v1333_v37  ;;  %1308 = vst [vmem:[%s2375_s12] sm:$0xff] %v1332_v51 }
 0x549   :  { %1314 = vsyncpa [#allocation4], 1 }

</bundles_post_ra>
